<compile_context>
chip_gen: v7x
topology: tpu7x:2x2x1
jax: 0.10.0
libtpu: 0.0.40
codegen_flags: <defaults>
</compile_context>

<pallas_src>
import functools

import jax
import jax.numpy as jnp
from jax import lax
from jax.experimental import pallas as pl
from jax.experimental.pallas import tpu as pltpu

EPS = 1e-3


# ------------------------------------------------------------------
# Fused kernel: all four branches + channel concat for B_blk images.
# ------------------------------------------------------------------
def _inception_kernel(x_ref, w1_ref, b1_ref, wr2_ref, br2_ref, wr3_ref,
                      br3_ref, w2_ref, b2_ref, w3_ref, b3_ref, wp_ref, bp_ref,
                      out_ref, *, bblk, h, w):
    cin = x_ref.shape[-1]
    m = bblk * h * w

    x = x_ref[...]                                        # (B, H, W, Cin) f32
    xm = x.astype(jnp.bfloat16).reshape(m, cin)           # bf16 MXU operand

    def matmul(lhs, w_r, b_r):
        return (jnp.dot(lhs, w_r[...], preferred_element_type=jnp.float32)
                + b_r[...])

    # ---- branch1: 1x1 conv (BN scale folded) + bias + ReLU ---------------
    y1 = jnp.maximum(matmul(xm, w1_ref, b1_ref), 0.0)

    # ---- 1x1 reduce convs for branches 2 & 3 (separate, lane-aligned) ----
    r2 = jnp.maximum(matmul(xm, wr2_ref, br2_ref), 0.0)
    r3 = jnp.maximum(matmul(xm, wr3_ref, br3_ref), 0.0)
    r2 = r2.astype(jnp.bfloat16).reshape(bblk, h, w, -1)
    r3 = r3.astype(jnp.bfloat16).reshape(bblk, h, w, -1)

    # Zero-padded spatial shifts built in registers (no scratch slab).
    def shift_w(a, dx):                                   # tap column dx
        if dx == 1:
            return a
        z = jnp.zeros_like(a[:, :, :1, :])
        if dx == 0:                                       # needs a[.., x-1, :]
            return jnp.concatenate([z, a[:, :, :w - 1, :]], axis=2)
        return jnp.concatenate([a[:, :, 1:, :], z], axis=2)

    def shift_h(a, dy):                                   # tap row dy (cheap)
        if dy == 1:
            return a
        z = jnp.zeros_like(a[:, :1, :, :])
        if dy == 0:
            return jnp.concatenate([z, a[:, :h - 1, :, :]], axis=1)
        return jnp.concatenate([a[:, 1:, :, :], z], axis=1)

    def conv3x3(r, w_r, b_r):
        out = None
        for dx in range(3):                    # one deep-K matmul per dx
            s = shift_w(r, dx)                 # single W (sublane) shift
            lhs = jnp.concatenate([shift_h(s, dy) for dy in range(3)], axis=-1)
            part = jnp.dot(lhs.reshape(m, -1), w_r[dx],
                           preferred_element_type=jnp.float32)
            out = part if out is None else out + part
        return jnp.maximum(out + b_r[...], 0.0)

    y2 = conv3x3(r2, w2_ref, b2_ref)           # branch2 (3x3)
    y3 = conv3x3(r3, w3_ref, b3_ref)           # branch3 (module uses 3x3)

    # ---- branch4: 3x3/s1 max-pool (separable, replicate edge == -inf pad) -
    xl = jnp.concatenate([x[:, :, :1, :], x[:, :, :w - 1, :]], axis=2)
    xr = jnp.concatenate([x[:, :, 1:, :], x[:, :, w - 1:, :]], axis=2)
    mw = jnp.maximum(jnp.maximum(xl, x), xr)
    mu = jnp.concatenate([mw[:, :1], mw[:, :h - 1]], axis=1)
    md = jnp.concatenate([mw[:, 1:], mw[:, h - 1:]], axis=1)
    mp = jnp.maximum(jnp.maximum(mu, mw), md)
    y4 = jnp.maximum(matmul(mp.astype(jnp.bfloat16).reshape(m, cin),
                            wp_ref, bp_ref), 0.0)

    # ---- channel concat, single lane-dense store --------------------------
    ctot = out_ref.shape[-1]
    out_ref[...] = jnp.concatenate([y1, y2, y3, y4], axis=-1).reshape(
        bblk, h, w, ctot).astype(out_ref.dtype)


# ------------------------------------------------------------------
# Host-side weight preparation (eval-mode BN folded into conv weights).
# ------------------------------------------------------------------
def _fold_scale(gamma):
    return gamma / jnp.sqrt(1.0 + EPS)        # running_mean=0, running_var=1


def _conv1x1(w_oi11, gamma):
    w = w_oi11[:, :, 0, 0] * _fold_scale(gamma)[:, None]     # (O, I)
    return w.T.astype(jnp.bfloat16)                          # (I, O)


def _conv3x3(w_oihw, gamma):
    w = w_oihw * _fold_scale(gamma).reshape(-1, 1, 1, 1)      # (O, I, 3, 3)
    cols = []
    for dx in range(3):                                       # per tap column
        cols.append(jnp.concatenate([w[:, :, dy, dx].T for dy in range(3)],
                                    axis=0))                  # (3*I, O)
    return jnp.stack(cols, axis=0).astype(jnp.bfloat16)       # (3, 3*I, O)


def _bias(beta):
    return beta.reshape(1, -1).astype(jnp.float32)


def _pick_batch_block(n, h, w, per_img_bytes, vmem_budget=12 << 20,
                      row_target=512):
    best = 1
    for b in range(1, n + 1):
        if n % b:
            continue
        if b * per_img_bytes > vmem_budget:
            break
        # Keep >=2 grid steps (megacore) once M is already >=128.
        if b == n and n > 1 and best * h * w >= 128:
            break
        best = b
        if b * h * w >= row_target:
            break
    return best


def inception_pallas(x_nchw, params):
    """x_nchw: (N, Cin, H, W) float32. Returns (N, Ctot, H, W) float32."""
    n, cin, h, w = x_nchw.shape

    w1 = _conv1x1(params["b1_w"], params["b1_g"]);    b1 = _bias(params["b1_b"])
    wr2 = _conv1x1(params["b2_w1"], params["b2_g1"]); br2 = _bias(params["b2_b1"])
    wr3 = _conv1x1(params["b3_w1"], params["b3_g1"]); br3 = _bias(params["b3_b1"])
    w2 = _conv3x3(params["b2_w2"], params["b2_g2"]);  b2 = _bias(params["b2_b2"])
    w3 = _conv3x3(params["b3_w2"], params["b3_g2"]);  b3 = _bias(params["b3_b2"])
    wp = _conv1x1(params["b4_w"], params["b4_g"]);    bp = _bias(params["b4_b"])

    ch1x1 = w1.shape[1]
    cred2, ch3x3 = wr2.shape[1], w2.shape[2]
    cred3, ch5x5 = wr3.shape[1], w3.shape[2]
    pool_proj = wp.shape[1]
    ctot = ch1x1 + ch3x3 + ch5x5 + pool_proj

    # Pad output channels to a multiple of 128 (lane-dense output store);
    # extra channels are zero pool-proj weights/bias, sliced off afterwards.
    ctot_pad = -(-ctot // 128) * 128
    pad = ctot_pad - ctot
    if pad:
        wp = jnp.concatenate([wp, jnp.zeros((cin, pad), wp.dtype)], axis=1)
        bp = jnp.concatenate([bp, jnp.zeros((1, pad), bp.dtype)], axis=1)

    per_img = h * w * (2 * 4 * cin + 2 * 4 * ctot_pad
                       + 12 * 2 * (cred2 + cred3) + 6 * 4 * cin)
    bblk = _pick_batch_block(n, h, w, per_img)

    # TODO(synk): keep activations NHWC end-to-end if the surrounding model
    # allows; here we honour the module's NCHW interface.
    x_nhwc = jnp.transpose(x_nchw, (0, 2, 3, 1))

    def _full(a):
        nd = a.ndim
        return pl.BlockSpec(a.shape, lambda i, _nd=nd: (0,) * _nd)

    kernel = functools.partial(_inception_kernel, bblk=bblk, h=h, w=w)

    out_nhwc = pl.pallas_call(
        kernel,
        out_shape=jax.ShapeDtypeStruct((n, h, w, ctot_pad), jnp.float32),
        grid=(n // bblk,),
        in_specs=[pl.BlockSpec((bblk, h, w, cin), lambda i: (i, 0, 0, 0)),
                  _full(w1), _full(b1), _full(wr2), _full(br2),
                  _full(wr3), _full(br3), _full(w2), _full(b2),
                  _full(w3), _full(b3), _full(wp), _full(bp)],
        out_specs=pl.BlockSpec((bblk, h, w, ctot_pad), lambda i: (i, 0, 0, 0)),
        compiler_params=pltpu.CompilerParams(
            dimension_semantics=("parallel",),
            vmem_limit_bytes=48 * 1024 * 1024),
    )(x_nhwc, w1, b1, wr2, br2, wr3, br3, w2, b2, w3, b3, wp, bp)

    return jnp.transpose(out_nhwc[..., :ctot], (0, 3, 1, 2))   # back to NCHW


# ------------------------------------------------------------------
# Pure-JAX reference (mirrors the PyTorch module, eval-mode BN, f32).
# ------------------------------------------------------------------
def _conv_ref(x, w, pad):
    return lax.conv_general_dilated(
        x, w, window_strides=(1, 1), padding=pad,
        dimension_numbers=("NCHW", "OIHW", "NCHW"))


def _bn_relu_ref(x, gamma, beta):
    s = (gamma / jnp.sqrt(1.0 + EPS)).reshape(1, -1, 1, 1)
    b = beta.reshape(1, -1, 1, 1)
    return jnp.maximum(x * s + b, 0.0)


def inception_ref(x, p):
    b1 = _bn_relu_ref(_conv_ref(x, p["b1_w"], "VALID"), p["b1_g"], p["b1_b"])

    t2 = _bn_relu_ref(_conv_ref(x, p["b2_w1"], "VALID"), p["b2_g1"], p["b2_b1"])
    b2 = _bn_relu_ref(_conv_ref(t2, p["b2_w2"], [(1, 1), (1, 1)]),
                      p["b2_g2"], p["b2_b2"])

    t3 = _bn_relu_ref(_conv_ref(x, p["b3_w1"], "VALID"), p["b3_g1"], p["b3_b1"])
    b3 = _bn_relu_ref(_conv_ref(t3, p["b3_w2"], [(1, 1), (1, 1)]),
                      p["b3_g2"], p["b3_b2"])

    mp = lax.reduce_window(x, -jnp.inf, lax.max, (1, 1, 3, 3), (1, 1, 1, 1),
                           ((0, 0), (0, 0), (1, 1), (1, 1)))
    b4 = _bn_relu_ref(_conv_ref(mp, p["b4_w"], "VALID"), p["b4_g"], p["b4_b"])

    return jnp.concatenate([b1, b2, b3, b4], axis=1)


# ------------------------------------------------------------------
if __name__ == "__main__":
    # Small, deterministic configuration.
    N, Cin, H, W = 4, 8, 8, 8
    ch1x1, ch3x3red, ch3x3 = 16, 8, 16
    ch5x5red, ch5x5, pool_proj = 8, 16, 16

    key = jax.random.PRNGKey(0)
    ks = jax.random.split(key, 16)

    def rnd(k, shape, scale=0.1):
        return (scale * jax.random.normal(k, shape)).astype(jnp.float32)

    params = {
        "b1_w": rnd(ks[0], (ch1x1, Cin, 1, 1)),
        "b1_g": rnd(ks[1], (ch1x1,), 1.0), "b1_b": rnd(ks[2], (ch1x1,)),
        "b2_w1": rnd(ks[3], (ch3x3red, Cin, 1, 1)),
        "b2_g1": rnd(ks[4], (ch3x3red,), 1.0), "b2_b1": rnd(ks[5], (ch3x3red,)),
        "b2_w2": rnd(ks[6], (ch3x3, ch3x3red, 3, 3)),
        "b2_g2": rnd(ks[7], (ch3x3,), 1.0), "b2_b2": rnd(ks[8], (ch3x3,)),
        "b3_w1": rnd(ks[9], (ch5x5red, Cin, 1, 1)),
        "b3_g1": rnd(ks[10], (ch5x5red,), 1.0), "b3_b1": rnd(ks[11], (ch5x5red,)),
        "b3_w2": rnd(ks[12], (ch5x5, ch5x5red, 3, 3)),
        "b3_g2": rnd(ks[13], (ch5x5,), 1.0), "b3_b2": rnd(ks[14], (ch5x5,)),
        "b4_w": rnd(ks[15], (pool_proj, Cin, 1, 1)),
        "b4_g": rnd(jax.random.fold_in(key, 100), (pool_proj,), 1.0),
        "b4_b": rnd(jax.random.fold_in(key, 101), (pool_proj,)),
    }

    x = jax.random.normal(jax.random.fold_in(key, 999),
                          (N, Cin, H, W)).astype(jnp.float32)

    out = jax.block_until_ready(jax.jit(inception_pallas)(x, params))
    ref = jax.block_until_ready(inception_ref(x, params))

    assert out.shape == (N, ch1x1 + ch3x3 + ch5x5 + pool_proj, H, W), out.shape
    # bf16 MXU operands -> loosened tolerance (expected, per review).
    assert jnp.allclose(out, ref, atol=3e-2, rtol=3e-2), \
        float(jnp.max(jnp.abs(out - ref)))
    print("KERNEL_OK")
</pallas_src>

<mosaic_0001>
module attributes {stable_mosaic.version = 11 : i64} {
  func.func @_inception_kernel(%arg0: i32, %arg1: memref<2x8x8x8xf32, #tpu.memory_space<vmem>>, %arg2: memref<8x16xbf16, #tpu.memory_space<vmem>>, %arg3: memref<1x16xf32, #tpu.memory_space<vmem>>, %arg4: memref<8x8xbf16, #tpu.memory_space<vmem>>, %arg5: memref<1x8xf32, #tpu.memory_space<vmem>>, %arg6: memref<8x8xbf16, #tpu.memory_space<vmem>>, %arg7: memref<1x8xf32, #tpu.memory_space<vmem>>, %arg8: memref<3x24x16xbf16, #tpu.memory_space<vmem>>, %arg9: memref<1x16xf32, #tpu.memory_space<vmem>>, %arg10: memref<3x24x16xbf16, #tpu.memory_space<vmem>>, %arg11: memref<1x16xf32, #tpu.memory_space<vmem>>, %arg12: memref<8x80xbf16, #tpu.memory_space<vmem>>, %arg13: memref<1x80xf32, #tpu.memory_space<vmem>>, %arg14: memref<2x8x8x128xf32, #tpu.memory_space<vmem>>) attributes {dimension_semantics = [#tpu.dimension_semantics<parallel>], iteration_bounds = array<i64: 2>, scalar_prefetch = 0 : i64, scratch_operands = 0 : i64, tpu.core_type = #tpu.core_type<tc>, window_params = [{transform_indices = @transform_0, window_bounds = array<i64: 2, 8, 8, 8>}, {pipeline_mode = #tpu.pipeline_mode<synchronous>, transform_indices = @transform_1, window_bounds = array<i64: 8, 16>}, {pipeline_mode = #tpu.pipeline_mode<synchronous>, transform_indices = @transform_2, window_bounds = array<i64: 1, 16>}, {pipeline_mode = #tpu.pipeline_mode<synchronous>, transform_indices = @transform_3, window_bounds = array<i64: 8, 8>}, {pipeline_mode = #tpu.pipeline_mode<synchronous>, transform_indices = @transform_4, window_bounds = array<i64: 1, 8>}, {pipeline_mode = #tpu.pipeline_mode<synchronous>, transform_indices = @transform_5, window_bounds = array<i64: 8, 8>}, {pipeline_mode = #tpu.pipeline_mode<synchronous>, transform_indices = @transform_6, window_bounds = array<i64: 1, 8>}, {pipeline_mode = #tpu.pipeline_mode<synchronous>, transform_indices = @transform_7, window_bounds = array<i64: 3, 24, 16>}, {pipeline_mode = #tpu.pipeline_mode<synchronous>, transform_indices = @transform_8, window_bounds = array<i64: 1, 16>}, {pipeline_mode = #tpu.pipeline_mode<synchronous>, transform_indices = @transform_9, window_bounds = array<i64: 3, 24, 16>}, {pipeline_mode = #tpu.pipeline_mode<synchronous>, transform_indices = @transform_10, window_bounds = array<i64: 1, 16>}, {pipeline_mode = #tpu.pipeline_mode<synchronous>, transform_indices = @transform_11, window_bounds = array<i64: 8, 80>}, {pipeline_mode = #tpu.pipeline_mode<synchronous>, transform_indices = @transform_12, window_bounds = array<i64: 1, 80>}, {transform_indices = @transform_13, window_bounds = array<i64: 2, 8, 8, 128>}]} {
    %c0 = arith.constant 0 : index
    %c0_0 = arith.constant 0 : index
    %c0_1 = arith.constant 0 : index
    %c0_2 = arith.constant 0 : index
    %0 = vector.load %arg1[%c0, %c0_0, %c0_1, %c0_2] : memref<2x8x8x8xf32, #tpu.memory_space<vmem>>, vector<2x8x8x8xf32>
    %1 = arith.truncf %0 : vector<2x8x8x8xf32> to vector<2x8x8x8xbf16>
    %2 = vector.shape_cast %1 : vector<2x8x8x8xbf16> to vector<128x8xbf16>
    %c0_3 = arith.constant 0 : index
    %c0_4 = arith.constant 0 : index
    %3 = vector.load %arg2[%c0_3, %c0_4] : memref<8x16xbf16, #tpu.memory_space<vmem>>, vector<8x16xbf16>
    %cst = arith.constant dense<0.000000e+00> : vector<128x16xf32>
    %4 = tpu.matmul %2, %3, %cst {dimension_numbers = #tpu.dot_dimension_numbers<[1], [0], [0], [1], [0, 0, 1, 1], [], []>} : vector<128x8xbf16>, vector<8x16xbf16>, vector<128x16xf32> -> vector<128x16xf32>
    %c0_5 = arith.constant 0 : index
    %c0_6 = arith.constant 0 : index
    %5 = vector.load %arg3[%c0_5, %c0_6] : memref<1x16xf32, #tpu.memory_space<vmem>>, vector<1x16xf32>
    %6 = vector.broadcast %5 : vector<1x16xf32> to vector<128x16xf32>
    %7 = arith.addf %4, %6 : vector<128x16xf32>
    %cst_7 = arith.constant 0.000000e+00 : f32
    %8 = vector.broadcast %cst_7 : f32 to vector<128x16xf32>
    %9 = arith.maximumf %7, %8 : vector<128x16xf32>
    %c0_8 = arith.constant 0 : index
    %c0_9 = arith.constant 0 : index
    %10 = vector.load %arg4[%c0_8, %c0_9] : memref<8x8xbf16, #tpu.memory_space<vmem>>, vector<8x8xbf16>
    %cst_10 = arith.constant dense<0.000000e+00> : vector<128x8xf32>
    %11 = tpu.matmul %2, %10, %cst_10 {dimension_numbers = #tpu.dot_dimension_numbers<[1], [0], [0], [1], [0, 0, 1, 1], [], []>} : vector<128x8xbf16>, vector<8x8xbf16>, vector<128x8xf32> -> vector<128x8xf32>
    %c0_11 = arith.constant 0 : index
    %c0_12 = arith.constant 0 : index
    %12 = vector.load %arg5[%c0_11, %c0_12] : memref<1x8xf32, #tpu.memory_space<vmem>>, vector<1x8xf32>
    %13 = vector.broadcast %12 : vector<1x8xf32> to vector<128x8xf32>
    %14 = arith.addf %11, %13 : vector<128x8xf32>
    %cst_13 = arith.constant 0.000000e+00 : f32
    %15 = vector.broadcast %cst_13 : f32 to vector<128x8xf32>
    %16 = arith.maximumf %14, %15 : vector<128x8xf32>
    %c0_14 = arith.constant 0 : index
    %c0_15 = arith.constant 0 : index
    %17 = vector.load %arg6[%c0_14, %c0_15] : memref<8x8xbf16, #tpu.memory_space<vmem>>, vector<8x8xbf16>
    %cst_16 = arith.constant dense<0.000000e+00> : vector<128x8xf32>
    %18 = tpu.matmul %2, %17, %cst_16 {dimension_numbers = #tpu.dot_dimension_numbers<[1], [0], [0], [1], [0, 0, 1, 1], [], []>} : vector<128x8xbf16>, vector<8x8xbf16>, vector<128x8xf32> -> vector<128x8xf32>
    %c0_17 = arith.constant 0 : index
    %c0_18 = arith.constant 0 : index
    %19 = vector.load %arg7[%c0_17, %c0_18] : memref<1x8xf32, #tpu.memory_space<vmem>>, vector<1x8xf32>
    %20 = vector.broadcast %19 : vector<1x8xf32> to vector<128x8xf32>
    %21 = arith.addf %18, %20 : vector<128x8xf32>
    %cst_19 = arith.constant 0.000000e+00 : f32
    %22 = vector.broadcast %cst_19 : f32 to vector<128x8xf32>
    %23 = arith.maximumf %21, %22 : vector<128x8xf32>
    %24 = arith.truncf %16 : vector<128x8xf32> to vector<128x8xbf16>
    %25 = vector.shape_cast %24 : vector<128x8xbf16> to vector<2x8x8x8xbf16>
    %26 = arith.truncf %23 : vector<128x8xf32> to vector<128x8xbf16>
    %27 = vector.shape_cast %26 : vector<128x8xbf16> to vector<2x8x8x8xbf16>
    %cst_20 = arith.constant 0.000000e+00 : bf16
    %28 = vector.broadcast %cst_20 : bf16 to vector<2x8x1x8xbf16>
    %29 = vector.extract_strided_slice %25 {offsets = [0, 0, 0, 0], sizes = [2, 8, 7, 8], strides = [1, 1, 1, 1]} : vector<2x8x8x8xbf16> to vector<2x8x7x8xbf16>
    %30 = tpu.concatenate %28, %29 in 2 : vector<2x8x1x8xbf16>, vector<2x8x7x8xbf16> -> vector<2x8x8x8xbf16>
    %cst_21 = arith.constant 0.000000e+00 : bf16
    %31 = vector.broadcast %cst_21 : bf16 to vector<2x1x8x8xbf16>
    %32 = vector.extract_strided_slice %30 {offsets = [0, 0, 0, 0], sizes = [2, 7, 8, 8], strides = [1, 1, 1, 1]} : vector<2x8x8x8xbf16> to vector<2x7x8x8xbf16>
    %33 = tpu.concatenate %31, %32 in 1 : vector<2x1x8x8xbf16>, vector<2x7x8x8xbf16> -> vector<2x8x8x8xbf16>
    %cst_22 = arith.constant 0.000000e+00 : bf16
    %34 = vector.broadcast %cst_22 : bf16 to vector<2x1x8x8xbf16>
    %35 = vector.extract_strided_slice %30 {offsets = [0, 1, 0, 0], sizes = [2, 7, 8, 8], strides = [1, 1, 1, 1]} : vector<2x8x8x8xbf16> to vector<2x7x8x8xbf16>
    %36 = tpu.concatenate %35, %34 in 1 : vector<2x7x8x8xbf16>, vector<2x1x8x8xbf16> -> vector<2x8x8x8xbf16>
    %37 = tpu.concatenate %33, %30, %36 in 3 : vector<2x8x8x8xbf16>, vector<2x8x8x8xbf16>, vector<2x8x8x8xbf16> -> vector<2x8x8x24xbf16>
    %38 = vector.shape_cast %37 : vector<2x8x8x24xbf16> to vector<128x24xbf16>
    %c0_23 = arith.constant 0 : index
    %c0_24 = arith.constant 0 : index
    %c0_25 = arith.constant 0 : index
    %39 = vector.load %arg8[%c0_23, %c0_24, %c0_25] : memref<3x24x16xbf16, #tpu.memory_space<vmem>>, vector<1x24x16xbf16>
    %40 = vector.shape_cast %39 : vector<1x24x16xbf16> to vector<24x16xbf16>
    %cst_26 = arith.constant dense<0.000000e+00> : vector<128x16xf32>
    %41 = tpu.matmul %38, %40, %cst_26 {dimension_numbers = #tpu.dot_dimension_numbers<[1], [0], [0], [1], [0, 0, 1, 1], [], []>} : vector<128x24xbf16>, vector<24x16xbf16>, vector<128x16xf32> -> vector<128x16xf32>
    %cst_27 = arith.constant 0.000000e+00 : bf16
    %42 = vector.broadcast %cst_27 : bf16 to vector<2x1x8x8xbf16>
    %43 = vector.extract_strided_slice %25 {offsets = [0, 0, 0, 0], sizes = [2, 7, 8, 8], strides = [1, 1, 1, 1]} : vector<2x8x8x8xbf16> to vector<2x7x8x8xbf16>
    %44 = tpu.concatenate %42, %43 in 1 : vector<2x1x8x8xbf16>, vector<2x7x8x8xbf16> -> vector<2x8x8x8xbf16>
    %cst_28 = arith.constant 0.000000e+00 : bf16
    %45 = vector.broadcast %cst_28 : bf16 to vector<2x1x8x8xbf16>
    %46 = vector.extract_strided_slice %25 {offsets = [0, 1, 0, 0], sizes = [2, 7, 8, 8], strides = [1, 1, 1, 1]} : vector<2x8x8x8xbf16> to vector<2x7x8x8xbf16>
    %47 = tpu.concatenate %46, %45 in 1 : vector<2x7x8x8xbf16>, vector<2x1x8x8xbf16> -> vector<2x8x8x8xbf16>
    %48 = tpu.concatenate %44, %25, %47 in 3 : vector<2x8x8x8xbf16>, vector<2x8x8x8xbf16>, vector<2x8x8x8xbf16> -> vector<2x8x8x24xbf16>
    %49 = vector.shape_cast %48 : vector<2x8x8x24xbf16> to vector<128x24xbf16>
    %c1 = arith.constant 1 : index
    %c0_29 = arith.constant 0 : index
    %c0_30 = arith.constant 0 : index
    %50 = vector.load %arg8[%c1, %c0_29, %c0_30] : memref<3x24x16xbf16, #tpu.memory_space<vmem>>, vector<1x24x16xbf16>
    %51 = vector.shape_cast %50 : vector<1x24x16xbf16> to vector<24x16xbf16>
    %cst_31 = arith.constant dense<0.000000e+00> : vector<128x16xf32>
    %52 = tpu.matmul %49, %51, %cst_31 {dimension_numbers = #tpu.dot_dimension_numbers<[1], [0], [0], [1], [0, 0, 1, 1], [], []>} : vector<128x24xbf16>, vector<24x16xbf16>, vector<128x16xf32> -> vector<128x16xf32>
    %53 = arith.addf %41, %52 : vector<128x16xf32>
    %cst_32 = arith.constant 0.000000e+00 : bf16
    %54 = vector.broadcast %cst_32 : bf16 to vector<2x8x1x8xbf16>
    %55 = vector.extract_strided_slice %25 {offsets = [0, 0, 1, 0], sizes = [2, 8, 7, 8], strides = [1, 1, 1, 1]} : vector<2x8x8x8xbf16> to vector<2x8x7x8xbf16>
    %56 = tpu.concatenate %55, %54 in 2 : vector<2x8x7x8xbf16>, vector<2x8x1x8xbf16> -> vector<2x8x8x8xbf16>
    %cst_33 = arith.constant 0.000000e+00 : bf16
    %57 = vector.broadcast %cst_33 : bf16 to vector<2x1x8x8xbf16>
    %58 = vector.extract_strided_slice %56 {offsets = [0, 0, 0, 0], sizes = [2, 7, 8, 8], strides = [1, 1, 1, 1]} : vector<2x8x8x8xbf16> to vector<2x7x8x8xbf16>
    %59 = tpu.concatenate %57, %58 in 1 : vector<2x1x8x8xbf16>, vector<2x7x8x8xbf16> -> vector<2x8x8x8xbf16>
    %cst_34 = arith.constant 0.000000e+00 : bf16
    %60 = vector.broadcast %cst_34 : bf16 to vector<2x1x8x8xbf16>
    %61 = vector.extract_strided_slice %56 {offsets = [0, 1, 0, 0], sizes = [2, 7, 8, 8], strides = [1, 1, 1, 1]} : vector<2x8x8x8xbf16> to vector<2x7x8x8xbf16>
    %62 = tpu.concatenate %61, %60 in 1 : vector<2x7x8x8xbf16>, vector<2x1x8x8xbf16> -> vector<2x8x8x8xbf16>
    %63 = tpu.concatenate %59, %56, %62 in 3 : vector<2x8x8x8xbf16>, vector<2x8x8x8xbf16>, vector<2x8x8x8xbf16> -> vector<2x8x8x24xbf16>
    %64 = vector.shape_cast %63 : vector<2x8x8x24xbf16> to vector<128x24xbf16>
    %c2 = arith.constant 2 : index
    %c0_35 = arith.constant 0 : index
    %c0_36 = arith.constant 0 : index
    %65 = vector.load %arg8[%c2, %c0_35, %c0_36] : memref<3x24x16xbf16, #tpu.memory_space<vmem>>, vector<1x24x16xbf16>
    %66 = vector.shape_cast %65 : vector<1x24x16xbf16> to vector<24x16xbf16>
    %cst_37 = arith.constant dense<0.000000e+00> : vector<128x16xf32>
    %67 = tpu.matmul %64, %66, %cst_37 {dimension_numbers = #tpu.dot_dimension_numbers<[1], [0], [0], [1], [0, 0, 1, 1], [], []>} : vector<128x24xbf16>, vector<24x16xbf16>, vector<128x16xf32> -> vector<128x16xf32>
    %68 = arith.addf %53, %67 : vector<128x16xf32>
    %c0_38 = arith.constant 0 : index
    %c0_39 = arith.constant 0 : index
    %69 = vector.load %arg9[%c0_38, %c0_39] : memref<1x16xf32, #tpu.memory_space<vmem>>, vector<1x16xf32>
    %70 = vector.broadcast %69 : vector<1x16xf32> to vector<128x16xf32>
    %71 = arith.addf %68, %70 : vector<128x16xf32>
    %cst_40 = arith.constant 0.000000e+00 : f32
    %72 = vector.broadcast %cst_40 : f32 to vector<128x16xf32>
    %73 = arith.maximumf %71, %72 : vector<128x16xf32>
    %cst_41 = arith.constant 0.000000e+00 : bf16
    %74 = vector.broadcast %cst_41 : bf16 to vector<2x8x1x8xbf16>
    %75 = vector.extract_strided_slice %27 {offsets = [0, 0, 0, 0], sizes = [2, 8, 7, 8], strides = [1, 1, 1, 1]} : vector<2x8x8x8xbf16> to vector<2x8x7x8xbf16>
    %76 = tpu.concatenate %74, %75 in 2 : vector<2x8x1x8xbf16>, vector<2x8x7x8xbf16> -> vector<2x8x8x8xbf16>
    %cst_42 = arith.constant 0.000000e+00 : bf16
    %77 = vector.broadcast %cst_42 : bf16 to vector<2x1x8x8xbf16>
    %78 = vector.extract_strided_slice %76 {offsets = [0, 0, 0, 0], sizes = [2, 7, 8, 8], strides = [1, 1, 1, 1]} : vector<2x8x8x8xbf16> to vector<2x7x8x8xbf16>
    %79 = tpu.concatenate %77, %78 in 1 : vector<2x1x8x8xbf16>, vector<2x7x8x8xbf16> -> vector<2x8x8x8xbf16>
    %cst_43 = arith.constant 0.000000e+00 : bf16
    %80 = vector.broadcast %cst_43 : bf16 to vector<2x1x8x8xbf16>
    %81 = vector.extract_strided_slice %76 {offsets = [0, 1, 0, 0], sizes = [2, 7, 8, 8], strides = [1, 1, 1, 1]} : vector<2x8x8x8xbf16> to vector<2x7x8x8xbf16>
    %82 = tpu.concatenate %81, %80 in 1 : vector<2x7x8x8xbf16>, vector<2x1x8x8xbf16> -> vector<2x8x8x8xbf16>
    %83 = tpu.concatenate %79, %76, %82 in 3 : vector<2x8x8x8xbf16>, vector<2x8x8x8xbf16>, vector<2x8x8x8xbf16> -> vector<2x8x8x24xbf16>
    %84 = vector.shape_cast %83 : vector<2x8x8x24xbf16> to vector<128x24xbf16>
    %c0_44 = arith.constant 0 : index
    %c0_45 = arith.constant 0 : index
    %c0_46 = arith.constant 0 : index
    %85 = vector.load %arg10[%c0_44, %c0_45, %c0_46] : memref<3x24x16xbf16, #tpu.memory_space<vmem>>, vector<1x24x16xbf16>
    %86 = vector.shape_cast %85 : vector<1x24x16xbf16> to vector<24x16xbf16>
    %cst_47 = arith.constant dense<0.000000e+00> : vector<128x16xf32>
    %87 = tpu.matmul %84, %86, %cst_47 {dimension_numbers = #tpu.dot_dimension_numbers<[1], [0], [0], [1], [0, 0, 1, 1], [], []>} : vector<128x24xbf16>, vector<24x16xbf16>, vector<128x16xf32> -> vector<128x16xf32>
    %cst_48 = arith.constant 0.000000e+00 : bf16
    %88 = vector.broadcast %cst_48 : bf16 to vector<2x1x8x8xbf16>
    %89 = vector.extract_strided_slice %27 {offsets = [0, 0, 0, 0], sizes = [2, 7, 8, 8], strides = [1, 1, 1, 1]} : vector<2x8x8x8xbf16> to vector<2x7x8x8xbf16>
    %90 = tpu.concatenate %88, %89 in 1 : vector<2x1x8x8xbf16>, vector<2x7x8x8xbf16> -> vector<2x8x8x8xbf16>
    %cst_49 = arith.constant 0.000000e+00 : bf16
    %91 = vector.broadcast %cst_49 : bf16 to vector<2x1x8x8xbf16>
    %92 = vector.extract_strided_slice %27 {offsets = [0, 1, 0, 0], sizes = [2, 7, 8, 8], strides = [1, 1, 1, 1]} : vector<2x8x8x8xbf16> to vector<2x7x8x8xbf16>
    %93 = tpu.concatenate %92, %91 in 1 : vector<2x7x8x8xbf16>, vector<2x1x8x8xbf16> -> vector<2x8x8x8xbf16>
    %94 = tpu.concatenate %90, %27, %93 in 3 : vector<2x8x8x8xbf16>, vector<2x8x8x8xbf16>, vector<2x8x8x8xbf16> -> vector<2x8x8x24xbf16>
    %95 = vector.shape_cast %94 : vector<2x8x8x24xbf16> to vector<128x24xbf16>
    %c1_50 = arith.constant 1 : index
    %c0_51 = arith.constant 0 : index
    %c0_52 = arith.constant 0 : index
    %96 = vector.load %arg10[%c1_50, %c0_51, %c0_52] : memref<3x24x16xbf16, #tpu.memory_space<vmem>>, vector<1x24x16xbf16>
    %97 = vector.shape_cast %96 : vector<1x24x16xbf16> to vector<24x16xbf16>
    %cst_53 = arith.constant dense<0.000000e+00> : vector<128x16xf32>
    %98 = tpu.matmul %95, %97, %cst_53 {dimension_numbers = #tpu.dot_dimension_numbers<[1], [0], [0], [1], [0, 0, 1, 1], [], []>} : vector<128x24xbf16>, vector<24x16xbf16>, vector<128x16xf32> -> vector<128x16xf32>
    %99 = arith.addf %87, %98 : vector<128x16xf32>
    %cst_54 = arith.constant 0.000000e+00 : bf16
    %100 = vector.broadcast %cst_54 : bf16 to vector<2x8x1x8xbf16>
    %101 = vector.extract_strided_slice %27 {offsets = [0, 0, 1, 0], sizes = [2, 8, 7, 8], strides = [1, 1, 1, 1]} : vector<2x8x8x8xbf16> to vector<2x8x7x8xbf16>
    %102 = tpu.concatenate %101, %100 in 2 : vector<2x8x7x8xbf16>, vector<2x8x1x8xbf16> -> vector<2x8x8x8xbf16>
    %cst_55 = arith.constant 0.000000e+00 : bf16
    %103 = vector.broadcast %cst_55 : bf16 to vector<2x1x8x8xbf16>
    %104 = vector.extract_strided_slice %102 {offsets = [0, 0, 0, 0], sizes = [2, 7, 8, 8], strides = [1, 1, 1, 1]} : vector<2x8x8x8xbf16> to vector<2x7x8x8xbf16>
    %105 = tpu.concatenate %103, %104 in 1 : vector<2x1x8x8xbf16>, vector<2x7x8x8xbf16> -> vector<2x8x8x8xbf16>
    %cst_56 = arith.constant 0.000000e+00 : bf16
    %106 = vector.broadcast %cst_56 : bf16 to vector<2x1x8x8xbf16>
    %107 = vector.extract_strided_slice %102 {offsets = [0, 1, 0, 0], sizes = [2, 7, 8, 8], strides = [1, 1, 1, 1]} : vector<2x8x8x8xbf16> to vector<2x7x8x8xbf16>
    %108 = tpu.concatenate %107, %106 in 1 : vector<2x7x8x8xbf16>, vector<2x1x8x8xbf16> -> vector<2x8x8x8xbf16>
    %109 = tpu.concatenate %105, %102, %108 in 3 : vector<2x8x8x8xbf16>, vector<2x8x8x8xbf16>, vector<2x8x8x8xbf16> -> vector<2x8x8x24xbf16>
    %110 = vector.shape_cast %109 : vector<2x8x8x24xbf16> to vector<128x24xbf16>
    %c2_57 = arith.constant 2 : index
    %c0_58 = arith.constant 0 : index
    %c0_59 = arith.constant 0 : index
    %111 = vector.load %arg10[%c2_57, %c0_58, %c0_59] : memref<3x24x16xbf16, #tpu.memory_space<vmem>>, vector<1x24x16xbf16>
    %112 = vector.shape_cast %111 : vector<1x24x16xbf16> to vector<24x16xbf16>
    %cst_60 = arith.constant dense<0.000000e+00> : vector<128x16xf32>
    %113 = tpu.matmul %110, %112, %cst_60 {dimension_numbers = #tpu.dot_dimension_numbers<[1], [0], [0], [1], [0, 0, 1, 1], [], []>} : vector<128x24xbf16>, vector<24x16xbf16>, vector<128x16xf32> -> vector<128x16xf32>
    %114 = arith.addf %99, %113 : vector<128x16xf32>
    %c0_61 = arith.constant 0 : index
    %c0_62 = arith.constant 0 : index
    %115 = vector.load %arg11[%c0_61, %c0_62] : memref<1x16xf32, #tpu.memory_space<vmem>>, vector<1x16xf32>
    %116 = vector.broadcast %115 : vector<1x16xf32> to vector<128x16xf32>
    %117 = arith.addf %114, %116 : vector<128x16xf32>
    %cst_63 = arith.constant 0.000000e+00 : f32
    %118 = vector.broadcast %cst_63 : f32 to vector<128x16xf32>
    %119 = arith.maximumf %117, %118 : vector<128x16xf32>
    %120 = vector.extract_strided_slice %0 {offsets = [0, 0, 0, 0], sizes = [2, 8, 1, 8], strides = [1, 1, 1, 1]} : vector<2x8x8x8xf32> to vector<2x8x1x8xf32>
    %121 = vector.extract_strided_slice %0 {offsets = [0, 0, 0, 0], sizes = [2, 8, 7, 8], strides = [1, 1, 1, 1]} : vector<2x8x8x8xf32> to vector<2x8x7x8xf32>
    %122 = tpu.concatenate %120, %121 in 2 : vector<2x8x1x8xf32>, vector<2x8x7x8xf32> -> vector<2x8x8x8xf32>
    %123 = vector.extract_strided_slice %0 {offsets = [0, 0, 1, 0], sizes = [2, 8, 7, 8], strides = [1, 1, 1, 1]} : vector<2x8x8x8xf32> to vector<2x8x7x8xf32>
    %124 = vector.extract_strided_slice %0 {offsets = [0, 0, 7, 0], sizes = [2, 8, 1, 8], strides = [1, 1, 1, 1]} : vector<2x8x8x8xf32> to vector<2x8x1x8xf32>
    %125 = tpu.concatenate %123, %124 in 2 : vector<2x8x7x8xf32>, vector<2x8x1x8xf32> -> vector<2x8x8x8xf32>
    %126 = arith.maximumf %122, %0 : vector<2x8x8x8xf32>
    %127 = arith.maximumf %126, %125 : vector<2x8x8x8xf32>
    %128 = vector.extract_strided_slice %127 {offsets = [0, 0, 0, 0], sizes = [2, 1, 8, 8], strides = [1, 1, 1, 1]} : vector<2x8x8x8xf32> to vector<2x1x8x8xf32>
    %129 = vector.extract_strided_slice %127 {offsets = [0, 0, 0, 0], sizes = [2, 7, 8, 8], strides = [1, 1, 1, 1]} : vector<2x8x8x8xf32> to vector<2x7x8x8xf32>
    %130 = tpu.concatenate %128, %129 in 1 : vector<2x1x8x8xf32>, vector<2x7x8x8xf32> -> vector<2x8x8x8xf32>
    %131 = vector.extract_strided_slice %127 {offsets = [0, 1, 0, 0], sizes = [2, 7, 8, 8], strides = [1, 1, 1, 1]} : vector<2x8x8x8xf32> to vector<2x7x8x8xf32>
    %132 = vector.extract_strided_slice %127 {offsets = [0, 7, 0, 0], sizes = [2, 1, 8, 8], strides = [1, 1, 1, 1]} : vector<2x8x8x8xf32> to vector<2x1x8x8xf32>
    %133 = tpu.concatenate %131, %132 in 1 : vector<2x7x8x8xf32>, vector<2x1x8x8xf32> -> vector<2x8x8x8xf32>
    %134 = arith.maximumf %130, %127 : vector<2x8x8x8xf32>
    %135 = arith.maximumf %134, %133 : vector<2x8x8x8xf32>
    %136 = arith.truncf %135 : vector<2x8x8x8xf32> to vector<2x8x8x8xbf16>
    %137 = vector.shape_cast %136 : vector<2x8x8x8xbf16> to vector<128x8xbf16>
    %c0_64 = arith.constant 0 : index
    %c0_65 = arith.constant 0 : index
    %138 = vector.load %arg12[%c0_64, %c0_65] : memref<8x80xbf16, #tpu.memory_space<vmem>>, vector<8x80xbf16>
    %cst_66 = arith.constant dense<0.000000e+00> : vector<128x80xf32>
    %139 = tpu.matmul %137, %138, %cst_66 {dimension_numbers = #tpu.dot_dimension_numbers<[1], [0], [0], [1], [0, 0, 1, 1], [], []>} : vector<128x8xbf16>, vector<8x80xbf16>, vector<128x80xf32> -> vector<128x80xf32>
    %c0_67 = arith.constant 0 : index
    %c0_68 = arith.constant 0 : index
    %140 = vector.load %arg13[%c0_67, %c0_68] : memref<1x80xf32, #tpu.memory_space<vmem>>, vector<1x80xf32>
    %141 = vector.broadcast %140 : vector<1x80xf32> to vector<128x80xf32>
    %142 = arith.addf %139, %141 : vector<128x80xf32>
    %cst_69 = arith.constant 0.000000e+00 : f32
    %143 = vector.broadcast %cst_69 : f32 to vector<128x80xf32>
    %144 = arith.maximumf %142, %143 : vector<128x80xf32>
    %145 = tpu.concatenate %9, %73, %119, %144 in 1 : vector<128x16xf32>, vector<128x16xf32>, vector<128x16xf32>, vector<128x80xf32> -> vector<128x128xf32>
    %146 = vector.shape_cast %145 : vector<128x128xf32> to vector<2x8x8x128xf32>
    %c0_70 = arith.constant 0 : index
    %c0_71 = arith.constant 0 : index
    %c0_72 = arith.constant 0 : index
    %c0_73 = arith.constant 0 : index
    %147 = vector.load %arg14[%c0_70, %c0_71, %c0_72, %c0_73] : memref<2x8x8x128xf32, #tpu.memory_space<vmem>>, vector<2x8x8x128xf32>
    tpu.vector_store %arg14[%c0_70, %c0_71, %c0_72, %c0_73], %146 {strides = array<i32>} : memref<2x8x8x128xf32, #tpu.memory_space<vmem>>, vector<2x8x8x128xf32>,
    return
  }
  func.func @transform_0(%arg0: i32) -> (i32, i32, i32, i32) {
    %c0_i32 = arith.constant 0 : i32
    %c0_i32_0 = arith.constant 0 : i32
    %c0_i32_1 = arith.constant 0 : i32
    %c0_i32_2 = arith.constant 0 : i32
    return %arg0, %c0_i32, %c0_i32_0, %c0_i32_1 : i32, i32, i32, i32
  }
  func.func @transform_1(%arg0: i32) -> (i32, i32) {
    %c0_i32 = arith.constant 0 : i32
    %c0_i32_0 = arith.constant 0 : i32
    %c0_i32_1 = arith.constant 0 : i32
    return %c0_i32, %c0_i32_0 : i32, i32
  }
  func.func @transform_2(%arg0: i32) -> (i32, i32) {
    %c0_i32 = arith.constant 0 : i32
    %c0_i32_0 = arith.constant 0 : i32
    %c0_i32_1 = arith.constant 0 : i32
    return %c0_i32, %c0_i32_0 : i32, i32
  }
  func.func @transform_3(%arg0: i32) -> (i32, i32) {
    %c0_i32 = arith.constant 0 : i32
    %c0_i32_0 = arith.constant 0 : i32
    %c0_i32_1 = arith.constant 0 : i32
    return %c0_i32, %c0_i32_0 : i32, i32
  }
  func.func @transform_4(%arg0: i32) -> (i32, i32) {
    %c0_i32 = arith.constant 0 : i32
    %c0_i32_0 = arith.constant 0 : i32
    %c0_i32_1 = arith.constant 0 : i32
    return %c0_i32, %c0_i32_0 : i32, i32
  }
  func.func @transform_5(%arg0: i32) -> (i32, i32) {
    %c0_i32 = arith.constant 0 : i32
    %c0_i32_0 = arith.constant 0 : i32
    %c0_i32_1 = arith.constant 0 : i32
    return %c0_i32, %c0_i32_0 : i32, i32
  }
  func.func @transform_6(%arg0: i32) -> (i32, i32) {
    %c0_i32 = arith.constant 0 : i32
    %c0_i32_0 = arith.constant 0 : i32
    %c0_i32_1 = arith.constant 0 : i32
    return %c0_i32, %c0_i32_0 : i32, i32
  }
  func.func @transform_7(%arg0: i32) -> (i32, i32, i32) {
    %c0_i32 = arith.constant 0 : i32
    %c0_i32_0 = arith.constant 0 : i32
    %c0_i32_1 = arith.constant 0 : i32
    %c0_i32_2 = arith.constant 0 : i32
    return %c0_i32, %c0_i32_0, %c0_i32_1 : i32, i32, i32
  }
  func.func @transform_8(%arg0: i32) -> (i32, i32) {
    %c0_i32 = arith.constant 0 : i32
    %c0_i32_0 = arith.constant 0 : i32
    %c0_i32_1 = arith.constant 0 : i32
    return %c0_i32, %c0_i32_0 : i32, i32
  }
  func.func @transform_9(%arg0: i32) -> (i32, i32, i32) {
    %c0_i32 = arith.constant 0 : i32
    %c0_i32_0 = arith.constant 0 : i32
    %c0_i32_1 = arith.constant 0 : i32
    %c0_i32_2 = arith.constant 0 : i32
    return %c0_i32, %c0_i32_0, %c0_i32_1 : i32, i32, i32
  }
  func.func @transform_10(%arg0: i32) -> (i32, i32) {
    %c0_i32 = arith.constant 0 : i32
    %c0_i32_0 = arith.constant 0 : i32
    %c0_i32_1 = arith.constant 0 : i32
    return %c0_i32, %c0_i32_0 : i32, i32
  }
  func.func @transform_11(%arg0: i32) -> (i32, i32) {
    %c0_i32 = arith.constant 0 : i32
    %c0_i32_0 = arith.constant 0 : i32
    %c0_i32_1 = arith.constant 0 : i32
    return %c0_i32, %c0_i32_0 : i32, i32
  }
  func.func @transform_12(%arg0: i32) -> (i32, i32) {
    %c0_i32 = arith.constant 0 : i32
    %c0_i32_0 = arith.constant 0 : i32
    %c0_i32_1 = arith.constant 0 : i32
    return %c0_i32, %c0_i32_0 : i32, i32
  }
  func.func @transform_13(%arg0: i32) -> (i32, i32, i32, i32) {
    %c0_i32 = arith.constant 0 : i32
    %c0_i32_0 = arith.constant 0 : i32
    %c0_i32_1 = arith.constant 0 : i32
    %c0_i32_2 = arith.constant 0 : i32
    return %arg0, %c0_i32, %c0_i32_0, %c0_i32_1 : i32, i32, i32, i32
  }
}

</mosaic_0001>

<bundles_post_ra>
// kernel: inception_pallas.1
= control target key start
LH: loop header
LB: loop body
LE: loop exit
PB: predicated region body
PF: predicated region fallthrough
CT: control target
= control target key end

     0   :  { %s4927_s25 = smov 0   ;;  %s7130_s0 = inlined_call_operand.vmem [shape: f32[4,8,8,8], index: 0, kind: input, shape index: {}]   ;;  %s7131_s1 = inlined_call_operand.vmem [shape: bf16[8,16], index: 1, kind: input, shape index: {}]   ;;  %s7132_s2 = inlined_call_operand.vmem [shape: f32[1,16], index: 2, kind: input, shape index: {}]   ;;  %s7133_s3 = inlined_call_operand.vmem [shape: bf16[8,8], index: 3, kind: input, shape index: {}]   ;;  %s7134_s4 = inlined_call_operand.vmem [shape: f32[1,8], index: 4, kind: input, shape index: {}]   ;;  %s7135_s5 = inlined_call_operand.vmem [shape: bf16[8,8], index: 5, kind: input, shape index: {}]   ;;  %s7136_s6 = inlined_call_operand.vmem [shape: f32[1,8], index: 6, kind: input, shape index: {}]   ;;  %s7137_s7 = inlined_call_operand.vmem [shape: bf16[3,24,16], index: 7, kind: input, shape index: {}]   ;;  %s7138_s8 = inlined_call_operand.vmem [shape: f32[1,16], index: 8, kind: input, shape index: {}]   ;;  %s7139_s9 = inlined_call_operand.vmem [shape: bf16[3,24,16], index: 9, kind: input, shape index: {}]   ;;  %s7140_s10 = inlined_call_operand.vmem [shape: f32[1,16], index: 10, kind: input, shape index: {}]   ;;  %s7141_s11 = inlined_call_operand.vmem [shape: bf16[8,80], index: 11, kind: input, shape index: {}]   ;;  %s7142_s12 = inlined_call_operand.vmem [shape: f32[1,80], index: 12, kind: input, shape index: {}]   ;;  %s7143_s13 = inlined_call_operand.vmem [shape: f32[4,8,8,128], index: 13, kind: output, shape index: {}]  }
   0x1 LB: > { %s4166_s26 = sadd.s32 4294967295, %s4850_s25   ;;  %p4170_p0 = scmp.ge.s32.totalorder %s4850_s25, 1  ;;  %s4850_s25 = sphi %s4927_s25, %s23_s25  }
   0x2   : > { %p389_p1 = scmp.lt.s32.totalorder %s4850_s25, 3 }
   0x4   : > { %p390_p2 = pnand %p4170_p0, %p389_p1 }
   0x6   : > { %393 = sbr.rel (%p390_p2) target bundleno = 1073 (0x431), region = 72 }
   0xd   : > { %vm555_vm0 = vcmask 1043456   ;;  %v672_v0 = vld [vmem:[%s7133_s3] sm:$0xf]  ;;  %s4171_s29 = sshll.u32 %s4166_s26, 1  ;;  %vm530_vm1 = vcmask 64512   ;;  %v4852_v30 = vmov 0  }
   0xe   : > { %4789 = vmatprep.subr.msk.bf16.mxu1 %vm555_vm0, %v672_v0  ;;  %v681_v1 = vsel %vm555_vm0, %v672_v0, 0  ;;  %p436_p3 = scmp.lt.s32.totalorder %s4171_s29, 3  ;;  %v482_v2 = vld [vmem:[%s7131_s1] sm:$0xf]  ;;  %v4242_v31 = vcombine.low %v4852_v30, %v4852_v30  ;;  %s4853_s21 = smov 16   ;;  %vm1142_vm2 = vcmask 1040384  }
   0xf   : > { %4551 = vmatpush3.bf16.msra.mxu1 %v681_v1  ;;  %v796_v3 = vld [vmem:[%s7135_s5] sm:$0xf]  ;;  %4788 = vmatprep.subr.msk.bf16.mxu0 %vm555_vm0, %v482_v2  ;;  %v557_v4 = vsel %vm555_vm0, %v482_v2, 0  ;;  %s4854_s24 = smov 8   ;;  %vm1143_vm3 = vsmask.f32 256 }
  0x10   : > { %s7476_s29 = smov (!%p436_p3, %s4171_s29), 3  ;;  %4533 = vmatpush3.bf16.msra.mxu0 %v557_v4  ;;  %v805_v14 = vsel %vm555_vm0, %v796_v3, 0  ;;  %v4811_v32 = vpack.i.bf16 %v4852_v30, %v4242_v31  ;;  %v5004_v33 = vld [vmem:[%s7134_s4] ss:$0 sm:$0xff]  ;;  %vm5049_vm4 = vmand %vm1142_vm2, %vm1143_vm3  ;;  %vm1849_vm5 = vsmask.f32 3328 }
  0x11   : > { %s4386_s17 = sshll.u32 %s7476_s29, 6  ;;  %4790 = vmatprep.subr.msk.bf16.mxu0 %vm555_vm0, %v796_v3  ;;  %vm5076_vm6 = vmand %vm555_vm0, %vm1849_vm5  ;;  %vm1287_vm7 = vcmask 130048   ;;  %vm1502_vm8 = vcmask 195584   ;;  %vm3569_vm9 = vcmask 1046528   ;;  %s4856_s23 = smov 48   ;;  %vm4058_vm10 = vcmask 261120  }
  0x12   : > { %s4957_s20 = scalar_lea.vmem %s7130_s0, %s4386_s17  ;;  %4812 = vrot.lane.b32.xlu1 %v4811_v32, %s4853_s21  ;;  %vm4075_vm11 = vcmask 392192  }
  0x13   : > { %v450_v5 = vld [vmem:[%s4957_s20] sm:$0xff]  ;;  %v451_v6 = vld [vmem:[%s4957_s20 + $0x8] sm:$0xff]  ;;  %v452_v7 = vld [vmem:[%s4957_s20 + $0x10] sm:$0xff] }
  0x14   : > { %v4388_v8 = vpack.c.bf16 %v451_v6, %v450_v5  ;;  %v453_v9 = vld [vmem:[%s4957_s20 + $0x18] sm:$0xff]  ;;  %v454_v10 = vld [vmem:[%s4957_s20 + $0x20] sm:$0xff]  ;;  %v455_v11 = vld [vmem:[%s4957_s20 + $0x28] sm:$0xff] }
  0x15   : > { %v4389_v12 = vpack.c.bf16 %v453_v9, %v452_v7  ;;  %v4390_v13 = vpack.c.bf16 %v455_v11, %v454_v10  ;;  %v456_v15 = vld [vmem:[%s4957_s20 + $0x30] sm:$0xff]  ;;  %v457_v16 = vld [vmem:[%s4957_s20 + $0x38] sm:$0xff]  ;;  %v458_v17 = vld [vmem:[%s4957_s20 + $0x40] sm:$0xff] }
  0x16   : > { %4552 = vmatprep.mubr.msk.bf16.mxu1 %vm530_vm1, %v4388_v8  ;;  %4534 = vmatprep.mubr.msk.bf16.mxu0 %vm530_vm1, %v4388_v8  ;;  %v459_v18 = vld [vmem:[%s4957_s20 + $0x48] sm:$0xff]  ;;  %v4391_v19 = vpack.c.bf16 %v457_v16, %v456_v15  ;;  %v460_v21 = vld [vmem:[%s4957_s20 + $0x50] sm:$0xff]  ;;  %v461_v22 = vld [vmem:[%s4957_s20 + $0x58] sm:$0xff] }
  0x17   : > { %4553 = vmatmul.mubr.msk.bf16.vlgmr.msra.gmra.mrb[0].mxu1 %vm530_vm1, %v4389_v12  ;;  %4535 = vmatmul.mubr.msk.bf16.vlgmr.msra.gmra.mrb[0].mxu0 %vm530_vm1, %v4389_v12  ;;  %v4392_v20 = vpack.c.bf16 %v459_v18, %v458_v17  ;;  %v462_v23 = vld [vmem:[%s4957_s20 + $0x60] sm:$0xff]  ;;  %v463_v24 = vld [vmem:[%s4957_s20 + $0x68] sm:$0xff]  ;;  %v4393_v25 = vpack.c.bf16 %v461_v22, %v460_v21  ;;  %v464_v27 = vld [vmem:[%s4957_s20 + $0x70] sm:$0xff] }
  0x18   : > { %4556 = vmatprep.mubr.msk.bf16.mxu1 %vm530_vm1, %v4390_v13  ;;  %4569 = vmatpush3.bf16.msra.mxu0 %v805_v14  ;;  %v4394_v26 = vpack.c.bf16 %v463_v24, %v462_v23  ;;  %v465_v28 = vld [vmem:[%s4957_s20 + $0x78] sm:$0xff]  ;;  %v4816_v22 = vld [vmem:[%s7137_s7 + $0xc] sm:$0xff]  }
  0x19   : > { %4538 = vmatprep.mubr.msk.bf16.mxu0 %vm530_vm1, %v4390_v13  ;;  %v4395_v29 = vpack.c.bf16 %v465_v28, %v464_v27  ;;  %4586 = vmatprep.subr.bf16.mxu1 %v4816_v22 }
  0x1a   : > { %4587 = vmatpush3.bf16.msra.mxu1 %v4816_v22 }
  0x1f   : > { %4557 = vmatmul.mubr.msk.bf16.gmra.mrb[4].mxu1 %vm530_vm1, %v4391_v19  ;;  %4539 = vmatmul.mubr.msk.bf16.gmra.mrb[4].mxu0 %vm530_vm1, %v4391_v19 }
  0x20   : > { %4560 = vmatprep.mubr.msk.bf16.mxu1 %vm530_vm1, %v4392_v20  ;;  %4542 = vmatprep.mubr.msk.bf16.mxu0 %vm530_vm1, %v4392_v20 }
  0x27   : > { %4561 = vmatmul.mubr.msk.bf16.gmra.mrb[8].mxu1 %vm530_vm1, %v4393_v25  ;;  %4543 = vmatmul.mubr.msk.bf16.gmra.mrb[8].mxu0 %vm530_vm1, %v4393_v25 }
  0x28   : > { %4564 = vmatprep.mubr.msk.bf16.mxu1 %vm530_vm1, %v4394_v26  ;;  %4546 = vmatprep.mubr.msk.bf16.mxu0 %vm530_vm1, %v4394_v26 }
  0x2f   : > { %4565 = vmatmul.mubr.msk.bf16.gmra.mrb[12].mxu1 %vm530_vm1, %v4395_v29  ;;  %4547 = vmatmul.mubr.msk.bf16.gmra.mrb[12].mxu0 %vm530_vm1, %v4395_v29 }
  0x30   : > { %4570 = vmatprep.mubr.msk.bf16.mxu0 %vm530_vm1, %v4388_v8 }
  0x37   : > { %4571 = vmatmul.mubr.msk.bf16.vlgmr.msra.gmra.mrb[16].mxu0 %vm530_vm1, %v4389_v12 }
  0x38   : > { %4574 = vmatprep.mubr.msk.bf16.mxu0 %vm530_vm1, %v4390_v13 }
  0x3f   : > { %4575 = vmatmul.mubr.msk.bf16.gmra.mrb[20].mxu0 %vm530_vm1, %v4391_v19 }
  0x40   : > { %4578 = vmatprep.mubr.msk.bf16.mxu0 %vm530_vm1, %v4392_v20 }
  0x47   : > { %4579 = vmatmul.mubr.msk.bf16.gmra.mrb[24].mxu0 %vm530_vm1, %v4393_v25 }
  0x48   : > { %4582 = vmatprep.mubr.msk.bf16.mxu0 %vm530_vm1, %v4394_v26 }
  0x4f   : > { %4583 = vmatmul.mubr.msk.bf16.gmra.mrb[28].mxu0 %vm530_vm1, %v4395_v29  ;;  %v4817_v29 = vld [vmem:[%s7137_s7 + $0x14] ss:$0 sps:$4 sm:$0xff]  }
  0x50   : > { %4791 = vmatprep.subr.msk.bf16.mxu1 %vm555_vm0, %v4817_v29 }
  0xea   : > { %v4554_v34 = vpop.f32.mrb[0].mxu1  ;;  %v5006_v35 = vpop.f32.mrb[0].mxu0 }
  0xeb   : > { %7223 = vst [vmem:[#allocation2_spill] sm:$0xff] %v5006_v35  ;;  %v726_v36 = vadd.f32 %v4554_v34, %v5004_v33  ;;  %v717_v37 = vpop.f32.mrb[1].mxu1  ;;  %v5009_v38 = vpop.f32.mrb[1].mxu0 }
  0xec   : > { %7224 = vst [vmem:[#allocation3_spill] sm:$0xff] %v5009_v38  ;;  %v718_v39 = vadd.f32 %v5004_v33, %v717_v37  ;;  %v4555_v40 = vpop.f32.mrb[2].mxu1  ;;  %v5012_v41 = vpop.f32.mrb[2].mxu0 }
  0xed   : > { %7225 = vst [vmem:[#allocation4_spill] sm:$0xff] %v5012_v41  ;;  %v782_v42 = vmax.f32 %v726_v36, 0.0  ;;  %v729_v43 = vadd.f32 %v4555_v40, %v5004_v33  ;;  %v720_v44 = vpop.f32.mrb[3].mxu1  ;;  %v5015_v45 = vpop.f32.mrb[3].mxu0 }
  0xee   : > { %7226 = vst [vmem:[#allocation5_spill] sm:$0xff] %v5015_v45  ;;  %v780_v46 = vmax.f32 %v718_v39, 0.0  ;;  %v721_v50 = vadd.f32 %v5004_v33, %v720_v44 }
  0xef   : > { %v5017_v47 = vpack.c.bf16 %v782_v42, %v782_v42  ;;  %v783_v49 = vmax.f32 %v729_v43, 0.0 }
  0xf0   : > { %v5019_v48 = vpack.c.bf16 %v780_v46, %v780_v46  ;;  %v781_v57 = vmax.f32 %v721_v50, 0.0 }
  0xf1   : > { %1326 = vrot.lane.b32.xlu1 %v5017_v47, %s4854_s24  ;;  %v1029_v51 = vshrl.u32 %v5017_v47, 16  ;;  %v5031_v56 = vpack.c.bf16 %v783_v49, %v783_v49  ;;  %v1032_v59 = vshll.u32 %v5017_v47, 16 }
  0xf2   : > { %1322 = vrot.lane.b32.xlu0 %v5019_v48, %s4854_s24  ;;  %v4558_v52 = vpop.f32.mrb[4].mxu1  ;;  %v5027_v53 = vpop.f32.mrb[4].mxu0  ;;  %v5046_v0 = vpack.c.bf16 %v781_v57, %v781_v57  ;;  %v1015_v12 = vshrl.u32 %v5019_v48, 16  ;;  %v1018_v25 = vshll.u32 %v5019_v48, 16 }
  0xf3   : > { %7227 = vst [vmem:[#allocation6_spill] sm:$0xff] %v5027_v53  ;;  %v733_v54 = vpop.f32.mrb[5].mxu1  ;;  %v5029_v55 = vpop.f32.mrb[5].mxu0  ;;  %v1031_v58 = vrot.slane %v1029_v51, 7  ;;  %v1804_v2 = vrot.slane %v1032_v59, 1  ;;  %v742_v4 = vadd.f32 %v4558_v52, %v5004_v33  ;;  %v1036_v43 = vshrl.u32 %v5031_v56, 16 }
  0xf4   : > { %7228 = vst [vmem:[#allocation7_spill] sm:$0xff] %v5029_v55  ;;  %v5034_v60 = vpop.f32.mrb[6].mxu1  ;;  %v5036_v61 = vpop.f32.mrb[6].mxu0  ;;  %v1017_v24 = vrot.slane %v1015_v12, 7  ;;  %v734_v30 = vadd.f32 %v5004_v33, %v733_v54  ;;  %v1800_v36 = vrot.slane %v1018_v25, 1  ;;  %v1039_v54 = vshll.u32 %v5031_v56, 16 }
  0xf5   : > { %7229 = vst [vmem:[#allocation8_spill] sm:$0xff] %v5036_v61  ;;  %1358 = vrot.lane.b32.xlu1 %v5017_v47, %s4853_s21  ;;  %v5040_v62 = vpop.f32.mrb[7].mxu1  ;;  %v5042_v63 = vpop.f32.mrb[7].mxu0  ;;  %v1034_v1 = vor.u32 %v1032_v59, %v1031_v58  ;;  %v1805_v11 = vor.u32 %v1804_v2, %v1029_v51  ;;  %v786_v17 = vmax.f32 %v742_v4, 0.0  ;;  %v1038_v52 = vrot.slane %v1036_v43, 7 }
  0xf6   : > { %7230 = vst [vmem:[#allocation9_spill] sm:$0xff] %v5042_v63  ;;  %1360 = vrot.lane.b32.xlu0 %v5031_v56, %s4853_s21  ;;  %v1020_v34 = vor.u32 %v1018_v25, %v1017_v24  ;;  %v784_v49 = vmax.f32 %v734_v30, 0.0  ;;  %v1801_v51 = vor.u32 %v1800_v36, %v1015_v12  ;;  %v1022_v22 = vshrl.u32 %v5046_v0, 16 }
  0xf7   : > { %v5067_v10 = vsel %vm5049_vm4, 0, %v1034_v1  ;;  %v5097_v23 = vsel %vm5076_vm6, %v1805_v11, 0  ;;  %v5100_v26 = vpack.c.bf16 %v786_v17, %v786_v17  ;;  %v1806_v11 = vrot.slane %v1039_v54, 1 }
  0xf8   : > { %7239 = vst [vmem:[#allocation14_spill] sm:$0xff] %v5097_v23  ;;  %v5132_v50 = vsel %vm5049_vm4, 0, %v1020_v34  ;;  %v5145_v2 = vpack.c.bf16 %v784_v49, %v784_v49  ;;  %v5149_v4 = vsel %vm5076_vm6, %v1801_v51, 0  ;;  %v1024_v25 = vrot.slane %v1022_v22, 7 }
  0xf9   : > { %1328 = vrot.lane.b32.xlu1 %v5031_v56, %s4854_s24  ;;  %7244 = vst [vmem:[#allocation19_spill] sm:$0xff] %v5149_v4  ;;  %v1528_v51 = vsel %vm555_vm0, %v4817_v29, 0  ;;  %v1060_v29 = vshll.u32 %v5100_v26, 16 }
  0xfa   : > { %1324 = vrot.lane.b32.xlu0 %v5046_v0, %s4854_s24  ;;  %v4562_v5 = vpop.f32.mrb[8].mxu1  ;;  %v5058_v6 = vpop.f32.mrb[8].mxu0  ;;  %4589 = vmatpush3.bf16.msra.mxu1 %v1528_v51 }
  0xfb   : > { %7233 = vst [vmem:[#allocation10_spill] sm:$0xff] %v5058_v6  ;;  %v5061_v7 = vadd.f32 %v4562_v5, %v5004_v33  ;;  %v749_v8 = vpop.f32.mrb[9].mxu1  ;;  %v5063_v9 = vpop.f32.mrb[9].mxu0 }
  0xfc   : > { %7234 = vst [vmem:[#allocation11_spill] sm:$0xff] %v5063_v9  ;;  %v5071_v13 = vadd.f32 %v5004_v33, %v749_v8  ;;  %v4563_v14 = vpop.f32.mrb[10].mxu1  ;;  %v5073_v15 = vpop.f32.mrb[10].mxu0  ;;  %v1041_v8 = vor.u32 %v1039_v54, %v1038_v52 }
  0xfd   : > { %7235 = vst [vmem:[#allocation12_spill] sm:$0xff] %v5073_v15  ;;  %1181 = vrot.lane.b32.xlu1 %v5067_v10, %s4854_s24  ;;  %v752_v18 = vpop.f32.mrb[11].mxu1  ;;  %v5082_v19 = vpop.f32.mrb[11].mxu0  ;;  %v5087_v20 = vadd.f32 %v4563_v14, %v5004_v33  ;;  %v745_v14 = vadd.f32 %v5034_v60, %v5004_v33 }
  0xfe   : > { %7238 = vst [vmem:[#allocation13_spill] sm:$0xff] %v5082_v19  ;;  %1356 = vrot.lane.b32.xlu0 %v5046_v0, %s4853_s21  ;;  %v5090_v21 = vadd.f32 %v5004_v33, %v752_v18  ;;  %v5161_v17 = vsel %vm5049_vm4, 0, %v1041_v8  ;;  %v1807_v18 = vor.u32 %v1806_v11, %v1036_v43  ;;  %v1057_v8 = vshrl.u32 %v5100_v26, 16 }
  0xff   : > { %v787_v24 = vmax.f32 %v745_v14, 0.0  ;;  %v788_v61 = vmax.f32 %v5071_v13, 0.0  ;;  %v791_v13 = vmax.f32 %v5087_v20, 0.0 }
 0x100   : > { %v5170_v60 = vsel %vm5076_vm6, %v1807_v18, 0  ;;  %v1059_v14 = vrot.slane %v1057_v8, 7 }
 0x101   : > { %1887 = vrot.lane.b32.xlu1 %v5097_v23, %s4854_s24  ;;  %7245 = vst [vmem:[#allocation20_spill] sm:$0xff] %v5170_v60  ;;  %v5175_v30 = vpack.c.bf16 %v787_v24, %v787_v24 }
 0x102   : > { %1212 = vrot.lane.b32.xlu0 %v5067_v10, %s4853_s21  ;;  %v4566_v27 = vpop.f32.mrb[12].mxu1  ;;  %v5106_v28 = vpop.f32.mrb[12].mxu0 }
 0x103   : > { %7240 = vst [vmem:[#allocation15_spill] sm:$0xff] %v5106_v28  ;;  %v765_v31 = vpop.f32.mrb[13].mxu1  ;;  %v5112_v32 = vpop.f32.mrb[13].mxu0  ;;  %v5115_v37 = vadd.f32 %v4566_v27, %v5004_v33  ;;  %v1025_v27 = vshll.u32 %v5046_v0, 16 }
 0x104   : > { %7241 = vst [vmem:[#allocation16_spill] sm:$0xff] %v5112_v32  ;;  %v5118_v39 = vadd.f32 %v5004_v33, %v765_v31  ;;  %v4567_v40 = vpop.f32.mrb[14].mxu1  ;;  %v5120_v42 = vpop.f32.mrb[14].mxu0  ;;  %v5180_v31 = vld [vmem:[%s7136_s6] ss:$0 sm:$0xff] }
 0x105   : > { %7242 = vst [vmem:[#allocation17_spill] sm:$0xff] %v5120_v42  ;;  %1366 = vrot.lane.b32.xlu1 %v5100_v26, %s4853_s21  ;;  %v768_v44 = vpop.f32.mrb[15].mxu1  ;;  %v5126_v46 = vpop.f32.mrb[15].mxu0  ;;  %v5138_v57 = vadd.f32 %v4567_v40, %v5004_v33  ;;  %v1027_v34 = vor.u32 %v1025_v27, %v1024_v25  ;;  %v1802_v36 = vrot.slane %v1025_v27, 1  ;;  %v1812_v25 = vrot.slane %v1060_v29, 1 }
 0x106   : > { %7243 = vst [vmem:[#allocation18_spill] sm:$0xff] %v5126_v46  ;;  %1917 = vrot.lane.b32.xlu0 %v5097_v23, %s4853_s21  ;;  %v5143_v58 = vadd.f32 %v5004_v33, %v768_v44  ;;  %v737_v44 = vadd.f32 %v5004_v33, %v5040_v62 }
 0x107   : > { %v5196_v52 = vsel %vm5049_vm4, 0, %v1027_v34  ;;  %v1803_v54 = vor.u32 %v1802_v36, %v1022_v22  ;;  %v1062_v36 = vor.u32 %v1060_v29, %v1059_v14  ;;  %v790_v29 = vmax.f32 %v5061_v7, 0.0 }
 0x109   : > { %1177 = vrot.lane.b32.xlu1 %v5132_v50, %s4854_s24  ;;  %v5207_v11 = vsel %vm5076_vm6, %v1803_v54, 0 }
 0x10a   : > { %1334 = vrot.lane.b32.xlu0 %v5100_v26, %s4854_s24  ;;  %v4572_v59 = vpop.f32.mrb[16].mxu0  ;;  %7246 = vst [vmem:[#allocation21_spill] sm:$0xff] %v5207_v11 }
 0x10b   : > { %v841_v1 = vpop.f32.mrb[17].mxu0  ;;  %v850_v40 = vadd.f32 %v4572_v59, %v5180_v31 }
 0x10c   : > { %v4573_v5 = vpop.f32.mrb[18].mxu0  ;;  %v842_v43 = vadd.f32 %v5180_v31, %v841_v1  ;;  %v785_v1 = vmax.f32 %v737_v44, 0.0 }
 0x10d   : > { %1883 = vrot.lane.b32.xlu1 %v5149_v4, %s4854_s24  ;;  %v844_v12 = vpop.f32.mrb[19].mxu0  ;;  %v853_v49 = vadd.f32 %v4573_v5, %v5180_v31  ;;  %v906_v33 = vmax.f32 %v850_v40, 0.0  ;;  %v1043_v40 = vshrl.u32 %v5145_v2, 16 }
 0x10e   : > { %1330 = vrot.lane.b32.xlu0 %v5145_v2, %s4854_s24  ;;  %v845_v59 = vadd.f32 %v5180_v31, %v844_v12  ;;  %v904_v62 = vmax.f32 %v842_v43, 0.0  ;;  %v5215_v24 = vpack.c.bf16 %v785_v1, %v785_v1 }
 0x10f   : > { %v907_v5 = vmax.f32 %v853_v49, 0.0  ;;  %v5211_v12 = vpack.c.bf16 %v906_v33, %v906_v33 }
 0x110   : > { %v905_v18 = vmax.f32 %v845_v59, 0.0  ;;  %v5213_v22 = vpack.c.bf16 %v904_v62, %v904_v62 }
 0x111   : > { %1362 = vrot.lane.b32.xlu1 %v5145_v2, %s4853_s21  ;;  %7247 = vst [vmem:[#allocation22_spill] sm:$0xff] %v5211_v12  ;;  %v5217_v27 = vpack.c.bf16 %v907_v5, %v907_v5  ;;  %v1813_v5 = vor.u32 %v1812_v25, %v1057_v8  ;;  %v7253_v32 = vshll.u32 %v5211_v12, 16 }
 0x112   : > { %1183 = vrot.lane.b32.xlu0 %v5161_v17, %s4854_s24  ;;  %7248 = vst [vmem:[#allocation23_spill] sm:$0xff] %v5213_v22  ;;  %v4576_v34 = vpop.f32.mrb[20].mxu0  ;;  %v5222_v43 = vpack.c.bf16 %v905_v18, %v905_v18  ;;  %v7144_v25 = vshrl.u32 %v5213_v22, 16 }
 0x113   : > { %7249 = vst [vmem:[#allocation24_spill] sm:$0xff] %v5217_v27  ;;  %v857_v44 = vpop.f32.mrb[21].mxu0  ;;  %v866_v49 = vadd.f32 %v4576_v34, %v5180_v31  ;;  %v5238_v34 = vsel %vm5049_vm4, 0, %v1062_v36  ;;  %v7252_v36 = vshll.u32 %v5213_v22, 16  ;;  %v3028_v19 = vrot.slane %v7253_v32, 1 }
 0x114   : > { %7250 = vst [vmem:[#allocation25_spill] sm:$0xff] %v5222_v43  ;;  %v4577_v51 = vpop.f32.mrb[22].mxu0  ;;  %v858_v54 = vadd.f32 %v5180_v31, %v857_v44  ;;  %7251 = vst [vmem:[#allocation26_spill] sm:$0xff] %v5238_v34  ;;  %v1045_v44 = vrot.slane %v1043_v40, 7  ;;  %v7145_v62 = vshrl.u32 %v5222_v43, 16  ;;  %v7254_v15 = vshll.u32 %v5222_v43, 16 }
 0x115   : > { %1214 = vrot.lane.b32.xlu1 %v5161_v17, %s4853_s21  ;;  %v869_v59 = vadd.f32 %v4577_v51, %v5180_v31  ;;  %v860_v33 = vpop.f32.mrb[23].mxu0  ;;  %v1046_v51 = vshll.u32 %v5145_v2, 16  ;;  %v910_v7 = vmax.f32 %v866_v49, 0.0  ;;  %v3024_v46 = vrot.slane %v7252_v36, 1 }
 0x116   : > { %1889 = vrot.lane.b32.xlu0 %v5170_v60, %s4854_s24  ;;  %v861_v14 = vadd.f32 %v5180_v31, %v860_v33  ;;  %v7146_v33 = vshrl.u32 %v5217_v27, 16  ;;  %v908_v18 = vmax.f32 %v858_v54, 0.0  ;;  %v3026_v49 = vrot.slane %v7254_v15, 1 }
 0x117   : > { %v911_v1 = vmax.f32 %v869_v59, 0.0  ;;  %v7255_v8 = vshll.u32 %v5217_v27, 16  ;;  %v5260_v54 = vsel %vm5076_vm6, %v1813_v5, 0  ;;  %v5264_v59 = vor.u32 %v3024_v46, %v7144_v25 }
 0x118   : > { %v909_v9 = vmax.f32 %v861_v14, 0.0  ;;  %7256 = vst [vmem:[#allocation27_spill] sm:$0xff] %v5260_v54  ;;  %v7258_v32 = vshrl.u32 %v5211_v12, 16  ;;  %v5274_v15 = vor.u32 %v3026_v49, %v7145_v62  ;;  %v5280_v5 = vpack.c.bf16 %v790_v29, %v790_v29 }
 0x119   : > { %1919 = vrot.lane.b32.xlu1 %v5170_v60, %s4853_s21  ;;  %v3030_v6 = vrot.slane %v7255_v8, 1  ;;  %7257 = vst [vmem:[#allocation28_spill] sm:$0xff] %v5264_v59  ;;  %v5282_v36 = vpack.c.bf16 %v910_v7, %v910_v7  ;;  %v5284_v46 = vpack.c.bf16 %v908_v18, %v908_v18  ;;  %v1048_v25 = vor.u32 %v1046_v51, %v1045_v44 }
 0x11a   : > { %1368 = vrot.lane.b32.xlu0 %v5175_v30, %s4853_s21  ;;  %v5268_v14 = vor.u32 %v3028_v19, %v7258_v32  ;;  %7260 = vst [vmem:[#allocation30_spill] sm:$0xff] %v5274_v15  ;;  %v1808_v19 = vrot.slane %v1046_v51, 1  ;;  %v5286_v32 = vpack.c.bf16 %v911_v1, %v911_v1  ;;  %v5288_v63 = vpack.c.bf16 %v909_v9, %v909_v9 }
 0x11b   : > { %v5278_v8 = vor.u32 %v3030_v6, %v7146_v33  ;;  %7262 = vst [vmem:[#allocation32_spill] sm:$0xff] %v5282_v36  ;;  %7263 = vst [vmem:[#allocation33_spill] sm:$0xff] %v5284_v46  ;;  %v1064_v6 = vshrl.u32 %v5175_v30, 16  ;;  %v7148_v29 = vshll.u32 %v5282_v36, 16  ;;  %v7147_v7 = vshll.u32 %v5284_v46, 16 }
 0x11c   : > { %7259 = vst [vmem:[#allocation29_spill] sm:$0xff] %v5268_v14  ;;  %7264 = vst [vmem:[#allocation34_spill] sm:$0xff] %v5288_v63  ;;  %v5299_v18 = vsel %vm5049_vm4, 0, %v1048_v25  ;;  %v1809_v1 = vor.u32 %v1808_v19, %v1043_v40  ;;  %v7151_v9 = vshll.u32 %v5286_v32, 16  ;;  %v7149_v44 = vshll.u32 %v5288_v63, 16 }
 0x11d   : > { %1336 = vrot.lane.b32.xlu1 %v5175_v30, %s4854_s24  ;;  %7261 = vst [vmem:[#allocation31_spill] sm:$0xff] %v5278_v8  ;;  %v7152_v49 = vshrl.u32 %v5284_v46, 16  ;;  %v3032_v62 = vrot.slane %v7147_v7, 1  ;;  %v3036_v33 = vrot.slane %v7148_v29, 1  ;;  %v7150_v25 = vshrl.u32 %v5288_v63, 16 }
 0x11e   : > { %1179 = vrot.lane.b32.xlu0 %v5196_v52, %s4854_s24  ;;  %v3034_v19 = vrot.slane %v7149_v44, 1  ;;  %v3038_v51 = vrot.slane %v7151_v9, 1  ;;  %v7266_v7 = vshrl.u32 %v5282_v36, 16  ;;  %v1050_v40 = vshrl.u32 %v5215_v24, 16 }
 0x11f   : > { %v5321_v55 = vor.u32 %v3032_v62, %v7152_v49  ;;  %v7269_v44 = vshrl.u32 %v5286_v32, 16  ;;  %v5341_v62 = vsel %vm5076_vm6, %v1809_v1, 0  ;;  %v5354_v1 = vpack.c.bf16 %v791_v13, %v791_v13  ;;  %v4580_v13 = vpop.f32.mrb[24].mxu0 }
 0x120   : > { %v5325_v29 = vor.u32 %v3036_v33, %v7266_v7  ;;  %v5331_v53 = vor.u32 %v3034_v19, %v7150_v25  ;;  %7271 = vst [vmem:[#allocation39_spill] sm:$0xff] %v5341_v62  ;;  %v1066_v33 = vrot.slane %v1064_v6, 7  ;;  %v1067_v7 = vshll.u32 %v5175_v30, 16 }
 0x121   : > { %1210 = vrot.lane.b32.xlu1 %v5196_v52, %s4853_s21  ;;  %7265 = vst [vmem:[#allocation35_spill] sm:$0xff] %v5321_v55  ;;  %v5335_v45 = vor.u32 %v3038_v51, %v7269_v44  ;;  %v5347_v19 = vpack.c.bf16 %v788_v61, %v788_v61  ;;  %v1052_v25 = vrot.slane %v1050_v40, 7  ;;  %v1053_v44 = vshll.u32 %v5215_v24, 16 }
 0x122   : > { %1885 = vrot.lane.b32.xlu0 %v5207_v11, %s4854_s24  ;;  %7267 = vst [vmem:[#allocation36_spill] sm:$0xff] %v5325_v29  ;;  %7268 = vst [vmem:[#allocation37_spill] sm:$0xff] %v5331_v53  ;;  %v1069_v51 = vor.u32 %v1067_v7, %v1066_v33  ;;  %v1814_v20 = vrot.slane %v1067_v7, 1  ;;  %v1085_v38 = vshrl.u32 %v5280_v5, 16  ;;  %v789_v7 = vmax.f32 %v5090_v21, 0.0 }
 0x123   : > { %7270 = vst [vmem:[#allocation38_spill] sm:$0xff] %v5335_v45  ;;  %v1055_v9 = vor.u32 %v1053_v44, %v1052_v25  ;;  %v1810_v49 = vrot.slane %v1053_v44, 1  ;;  %v873_v44 = vpop.f32.mrb[25].mxu0  ;;  %v1088_v42 = vshll.u32 %v5280_v5, 16 }
 0x124   : > { %v1152_v61 = vsel %vm5049_vm4, 0, %v1069_v51  ;;  %v1815_v25 = vor.u32 %v1814_v20, %v1064_v6  ;;  %v4581_v41 = vpop.f32.mrb[26].mxu0  ;;  %v882_v51 = vadd.f32 %v4580_v13, %v5180_v31  ;;  %v874_v35 = vadd.f32 %v5180_v31, %v873_v44 }
 0x125   : > { %1915 = vrot.lane.b32.xlu1 %v5207_v11, %s4853_s21  ;;  %v5363_v30 = vsel %vm5049_vm4, 0, %v1055_v9  ;;  %v1811_v33 = vor.u32 %v1810_v49, %v1050_v40  ;;  %v5372_v9 = vpop.f32.mrb[27].mxu0  ;;  %v1087_v40 = vrot.slane %v1085_v38, 7  ;;  %v885_v6 = vadd.f32 %v4581_v41, %v5180_v31 }
 0x126   : > { %1364 = vrot.lane.b32.xlu0 %v5215_v24, %s4853_s21  ;;  %7272 = vst [vmem:[#allocation40_spill] sm:$0xff] %v5363_v30  ;;  %v1858_v21 = vsel %vm5076_vm6, %v1815_v25, 0  ;;  %v914_v20 = vmax.f32 %v882_v51, 0.0  ;;  %v912_v13 = vmax.f32 %v874_v35, 0.0  ;;  %v794_v41 = vmax.f32 %v5115_v37, 0.0 }
 0x127   : > { %v5376_v49 = vsel %vm5076_vm6, %v1811_v33, 0  ;;  %v1090_v44 = vor.u32 %v1088_v42, %v1087_v40  ;;  %v1820_v33 = vrot.slane %v1088_v42, 1  ;;  %v915_v28 = vmax.f32 %v885_v6, 0.0 }
 0x128   : > { %7273 = vst [vmem:[#allocation41_spill] sm:$0xff] %v5376_v49  ;;  %v5391_v45 = vpack.c.bf16 %v914_v20, %v914_v20  ;;  %v5393_v53 = vpack.c.bf16 %v912_v13, %v912_v13  ;;  %v1071_v35 = vshrl.u32 %v5347_v19, 16  ;;  %v5406_v37 = vpack.c.bf16 %v794_v41, %v794_v41 }
 0x129   : > { %1332 = vrot.lane.b32.xlu1 %v5215_v24, %s4854_s24  ;;  %v5397_v25 = vsel %vm5049_vm4, 0, %v1090_v44  ;;  %v5400_v42 = vpack.c.bf16 %v915_v28, %v915_v28  ;;  %v1074_v28 = vshll.u32 %v5347_v19, 16 }
 0x12a   : > { %1220 = vrot.lane.b32.xlu0 %v5238_v34, %s4853_s21  ;;  %7274 = vst [vmem:[#allocation42_spill] sm:$0xff] %v5391_v45  ;;  %7275 = vst [vmem:[#allocation43_spill] sm:$0xff] %v5393_v53  ;;  %v7155_v51 = vshll.u32 %v5391_v45, 16  ;;  %v7154_v40 = vshll.u32 %v5393_v53, 16  ;;  %v7159_v20 = vshrl.u32 %v5391_v45, 16  ;;  %v7158_v13 = vshrl.u32 %v5393_v53, 16 }
 0x12b   : > { %7276 = vst [vmem:[#allocation44_spill] sm:$0xff] %v5397_v25  ;;  %7277 = vst [vmem:[#allocation45_spill] sm:$0xff] %v5400_v42  ;;  %v7157_v41 = vshrl.u32 %v5400_v42, 16  ;;  %v1816_v55 = vrot.slane %v1074_v28, 1 }
 0x12c   : > { %v3040_v44 = vrot.slane %v7154_v40, 1 }
 0x12d   : > { %1189 = vrot.lane.b32.xlu1 %v5238_v34, %s4854_s24 }
 0x12e   : > { %1925 = vrot.lane.b32.xlu0 %v5260_v54, %s4853_s21  ;;  %v5431_v29 = vor.u32 %v3040_v44, %v7158_v13 }
 0x130   : > { %7279 = vst [vmem:[#allocation47_spill] sm:$0xff] %v5431_v29 }
 0x131   : > { %1895 = vrot.lane.b32.xlu1 %v5260_v54, %s4854_s24 }
 0x132   : > { %1342 = vrot.lane.b32.xlu0 %v5280_v5, %s4854_s24 }
 0x135   : > { %1374 = vrot.lane.b32.xlu1 %v5280_v5, %s4853_s21 }
 0x136   : > { %1216 = vrot.lane.b32.xlu0 %v5299_v18, %s4853_s21 }
 0x139   : > { %1185 = vrot.lane.b32.xlu1 %v5299_v18, %s4854_s24 }
 0x13a   : > { %1921 = vrot.lane.b32.xlu0 %v5341_v62, %s4853_s21 }
 0x13d   : > { %1891 = vrot.lane.b32.xlu1 %v5341_v62, %s4854_s24 }
 0x13e   : > { %1338 = vrot.lane.b32.xlu0 %v5347_v19, %s4854_s24 }
 0x141   : > { %1344 = vrot.lane.b32.xlu1 %v5354_v1, %s4854_s24 }
 0x142   : > { %1191 = vrot.lane.b32.xlu0 %v1152_v61, %s4854_s24 }
 0x145   : > { %1218 = vrot.lane.b32.xlu1 %v5363_v30, %s4853_s21 }
 0x146   : > { %1222 = vrot.lane.b32.xlu0 %v1152_v61, %s4853_s21  ;;  %v5385_v61 = vpack.c.bf16 %v789_v7, %v789_v7  ;;  %v1821_v7 = vor.u32 %v1820_v33, %v1085_v38  ;;  %v1073_v38 = vrot.slane %v1071_v35, 7  ;;  %v3044_v33 = vrot.slane %v7155_v51, 1 }
 0x148   : > { %v5412_v6 = vsel %vm5076_vm6, %v1821_v7, 0  ;;  %v5435_v54 = vor.u32 %v3044_v33, %v7159_v20  ;;  %v1076_v40 = vor.u32 %v1074_v28, %v1073_v38  ;;  %v1092_v33 = vshrl.u32 %v5354_v1, 16  ;;  %v5452_v38 = vpop.permute.xlu1 %4812 }
 0x149   : > { %1923 = vrot.lane.b32.xlu1 %v5376_v49, %s4853_s21  ;;  %7278 = vst [vmem:[#allocation46_spill] sm:$0xff] %v5412_v6  ;;  %v792_v28 = vmax.f32 %v5118_v39, 0.0  ;;  %v1078_v60 = vshrl.u32 %v5385_v61, 16 }
 0x14a   : > { %1897 = vrot.lane.b32.xlu0 %v1858_v21, %s4854_s24  ;;  %7280 = vst [vmem:[#allocation48_spill] sm:$0xff] %v5435_v54  ;;  %v5447_v44 = vsel %vm5049_vm4, 0, %v1076_v40  ;;  %v1095_v40 = vshll.u32 %v5354_v1, 16  ;;  %v4584_v54 = vpop.f32.mrb[28].mxu0 }
 0x14c   : > { %v1822_v39 = vrot.slane %v1095_v40, 1 }
 0x14d   : > { %1340 = vrot.lane.b32.xlu1 %v5385_v61, %s4854_s24 }
 0x14e   : > { %1927 = vrot.lane.b32.xlu0 %v1858_v21, %s4853_s21  ;;  %v7156_v21 = vshll.u32 %v5400_v42, 16 }
 0x150   : > { %v3046_v7 = vrot.slane %v7156_v21, 1  ;;  %v1817_v21 = vor.u32 %v1816_v55, %v1071_v35  ;;  %v5466_v55 = vpack.c.bf16 %v792_v28, %v792_v28  ;;  %v898_v28 = vadd.f32 %v4584_v54, %v5180_v31 }
 0x151   : > { %1197 = vrot.lane.b32.xlu1 %v5397_v25, %s4854_s24 }
 0x152   : > { %1376 = vrot.lane.b32.xlu0 %v5354_v1, %s4853_s21  ;;  %v5439_v51 = vor.u32 %v3046_v7, %v7157_v41  ;;  %v5459_v7 = vsel %vm5076_vm6, %v1817_v21, 0  ;;  %v1094_v41 = vrot.slane %v1092_v33, 7  ;;  %v5472_v21 = vpop.f32.mrb[29].mxu0  ;;  %v918_v11 = vmax.f32 %v898_v28, 0.0 }
 0x153   : > { %7282 = vst [vmem:[#allocation50_spill] sm:$0xff] %v5459_v7  ;;  %v5476_v29 = vpop.f32.mrb[30].mxu0 }
 0x154   : > { %7281 = vst [vmem:[#allocation49_spill] sm:$0xff] %v5439_v51  ;;  %v1097_v20 = vor.u32 %v1095_v40, %v1094_v41  ;;  %v1823_v40 = vor.u32 %v1822_v39, %v1092_v33  ;;  %v1081_v33 = vshll.u32 %v5385_v61, 16  ;;  %v5508_v62 = vpack.c.bf16 %v918_v11, %v918_v11 }
 0x155   : > { %1903 = vrot.lane.b32.xlu1 %v5412_v6, %s4854_s24 }
 0x156   : > { %1187 = vrot.lane.b32.xlu0 %v5363_v30, %s4854_s24  ;;  %v5485_v41 = vsel %vm5049_vm4, 0, %v1097_v20  ;;  %v5495_v23 = vsel %vm5076_vm6, %v1823_v40, 0  ;;  %v1080_v20 = vrot.slane %v1078_v60, 7  ;;  %v1818_v14 = vrot.slane %v1081_v33, 1 }
 0x157   : > { %7283 = vst [vmem:[#allocation51_spill] sm:$0xff] %v5485_v41  ;;  %7284 = vst [vmem:[#allocation52_spill] sm:$0xff] %v5495_v23 }
 0x158   : > { %v1083_v4 = vor.u32 %v1081_v33, %v1080_v20  ;;  %v793_v20 = vmax.f32 %v5143_v58, 0.0 }
 0x159   : > { %1382 = vrot.lane.b32.xlu1 %v5406_v37, %s4853_s21 }
 0x15a   : > { %1893 = vrot.lane.b32.xlu0 %v5376_v49, %s4854_s24  ;;  %v5479_v49 = vpop.f32.mrb[31].mxu0  ;;  %v5553_v58 = vpack.c.bf16 %v793_v20, %v793_v20 }
 0x15d   : > { %1193 = vrot.lane.b32.xlu1 %v5447_v44, %s4854_s24 }
 0x15e   : > { %1372 = vrot.lane.b32.xlu0 %v5385_v61, %s4853_s21 }
 0x161   : > { %1899 = vrot.lane.b32.xlu1 %v5459_v7, %s4854_s24 }
 0x162   : > { %1228 = vrot.lane.b32.xlu0 %v5397_v25, %s4853_s21 }
 0x163   : > { %v5468_v35 = vpop.permute.xlu1 %1326 }
 0x164   : > { %v1323_v13 = vpop.permute.xlu0 %1322 }
 0x165   : > { %1378 = vrot.lane.b32.xlu1 %v5466_v55, %s4853_s21  ;;  %v1387_v40 = vsel %vm530_vm1, 0, %v1323_v13  ;;  %v1113_v13 = vshrl.u32 %v5406_v37, 16 }
 0x166   : > { %1931 = vrot.lane.b32.xlu0 %v5412_v6, %s4853_s21  ;;  %v795_v6 = vmax.f32 %v5138_v57, 0.0 }
 0x167   : > { %v1359_v51 = vpop.permute.xlu1 %1358 }
 0x168   : > { %v5481_v7 = vpop.permute.xlu0 %1360  ;;  %v5504_v57 = vpack.c.bf16 %v795_v6, %v795_v6 }
 0x169   : > { %1230 = vrot.lane.b32.xlu1 %v5485_v41, %s4853_s21 }
 0x16a   : > { %1350 = vrot.lane.b32.xlu0 %v5406_v37, %s4854_s24 }
 0x16b   : > { %v1329_v54 = vpop.permute.xlu1 %1328 }
 0x16c   : > { %v1325_v8 = vpop.permute.xlu0 %1324 }
 0x16d   : > { %1933 = vrot.lane.b32.xlu1 %v5495_v23, %s4853_s21  ;;  %v1389_v39 = vsel %vm530_vm1, %v5019_v48, %v1325_v8  ;;  %v7169_v8 = vshll.u32 %v5508_v62, 16 }
 0x16e   : > { %1346 = vrot.lane.b32.xlu0 %v5466_v55, %s4854_s24  ;;  %v1421_v59 = vsel %vm1287_vm7, %v1389_v39, %v1359_v51  ;;  %v5525_v51 = vsel %vm5049_vm4, 0, %v1083_v4  ;;  %v1116_v39 = vshll.u32 %v5406_v37, 16 }
 0x16f   : > { %v5506_v28 = vpop.permute.xlu1 %1181  ;;  %7286 = vst [vmem:[#allocation54_spill] sm:$0xff] %v5525_v51 }
 0x170   : > { %v1357_v15 = vpop.permute.xlu0 %1356 }
 0x171   : > { %v1419_v25 = vsel %vm1287_vm7, %v1387_v40, %v1357_v15  ;;  %1352 = vrot.lane.b32.xlu1 %v5504_v57, %s4854_s24  ;;  %v1819_v15 = vor.u32 %v1818_v14, %v1078_v60  ;;  %v1115_v14 = vrot.slane %v1113_v13, 7 }
 0x172   : > { %v4246_v48 = vcombine.low %v1419_v25, %v1421_v59  ;;  %1199 = vrot.lane.b32.xlu0 %v5485_v41, %s4854_s24  ;;  %v7171_v59 = vshrl.u32 %v5508_v62, 16  ;;  %v3052_v25 = vrot.slane %v7169_v8, 1 }
 0x173   : > { %v5517_v11 = vpop.permute.xlu1 %1887  ;;  %v5542_v60 = vsel %vm5076_vm6, %v1819_v15, 0  ;;  %v1118_v15 = vor.u32 %v1116_v39, %v1115_v14 }
 0x174   : > { %7285 = vst [vmem:[#allocation53_spill] sm:$0xff] %v5517_v11  ;;  %4590 = vmatprep.mubr.msk.bf16.mxu1 %vm1502_vm8, %v4246_v48  ;;  %v5521_v6 = vpop.permute.xlu0 %1212  ;;  %7288 = vst [vmem:[#allocation56_spill] sm:$0xff] %v5542_v60  ;;  %v5547_v40 = vor.u32 %v3052_v25, %v7171_v59  ;;  %v4818_v25 = vld [vmem:[%s7137_s7] sm:$0xff]   ;;  %v1391_v11 = vsel %vm530_vm1, %v5046_v0, %v5468_v35 }
 0x175   : > { %1226 = vrot.lane.b32.xlu1 %v5525_v51, %s4853_s21  ;;  %4606 = vmatprep.subr.bf16.mxu1 %v4818_v25 }
 0x176   : > { %1905 = vrot.lane.b32.xlu0 %v5495_v23, %s4854_s24  ;;  %7289 = vst [vmem:[#allocation57_spill] sm:$0xff] %v5547_v40  ;;  %v1828_v23 = vrot.slane %v1116_v39, 1  ;;  %v5572_v40 = vsel %vm5049_vm4, 0, %v1118_v15  ;;  %v1099_v39 = vshrl.u32 %v5466_v55, 16  ;;  %v1102_v15 = vshll.u32 %v5466_v55, 16 }
 0x177   : > { %v5536_v33 = vpop.permute.xlu1 %1366  ;;  %7291 = vst [vmem:[#allocation59_spill] sm:$0xff] %v5572_v40 }
 0x178   : > { %v5538_v4 = vpop.permute.xlu0 %1917  ;;  %v1829_v14 = vor.u32 %v1828_v23, %v1113_v13  ;;  %v1423_v23 = vsel %vm1287_vm7, %v1391_v11, %v5481_v7 }
 0x179   : > { %7287 = vst [vmem:[#allocation55_spill] sm:$0xff] %v5538_v4  ;;  %1929 = vrot.lane.b32.xlu1 %v5542_v60, %s4853_s21  ;;  %v1393_v4 = vsel %vm530_vm1, %v5017_v47, %v1329_v54  ;;  %v4819_v47 = vld [vmem:[%s7137_s7 + $0x8] ss:$0 sps:$4 sm:$0xff]  }
 0x17a   : > { %1384 = vrot.lane.b32.xlu0 %v5504_v57, %s4853_s21  ;;  %v1701_v54 = vsel %vm555_vm0, %v4819_v47, 0 }
 0x17b   : > { %v5555_v48 = vpop.permute.xlu1 %1177 }
 0x17c   : > { %v5557_v8 = vpop.permute.xlu0 %1334 }
 0x17d   : > { %1348 = vrot.lane.b32.xlu1 %v5553_v58, %s4854_s24 }
 0x17e   : > { %1195 = vrot.lane.b32.xlu0 %v5525_v51, %s4854_s24  ;;  %v1101_v51 = vrot.slane %v1099_v39, 7 }
 0x17f   : > { %v5566_v59 = vpop.permute.xlu1 %1883 }
 0x180   : > { %7290 = vst [vmem:[#allocation58_spill] sm:$0xff] %v5566_v59  ;;  %v5568_v20 = vpop.permute.xlu0 %1330  ;;  %v1104_v35 = vor.u32 %v1102_v15, %v1101_v51 }
 0x181   : > { %1205 = vrot.lane.b32.xlu1 %v5572_v40, %s4854_s24 }
 0x182   : > { %1901 = vrot.lane.b32.xlu0 %v5542_v60, %s4854_s24  ;;  %v5592_v60 = vsel %vm5076_vm6, %v1829_v14, 0 }
 0x183   : > { %v1363_v41 = vpop.permute.xlu1 %1362  ;;  %7292 = vst [vmem:[#allocation60_spill] sm:$0xff] %v5592_v60 }
 0x184   : > { %v1425_v13 = vsel %vm1287_vm7, %v1393_v4, %v1363_v41  ;;  %v5588_v59 = vpop.permute.xlu0 %1183  ;;  %v1824_v41 = vrot.slane %v1102_v15, 1  ;;  %v5616_v4 = vsel %vm5049_vm4, 0, %v1104_v35  ;;  %v1123_v35 = vshll.u32 %v5504_v57, 16 }
 0x185   : > { %v4247_v34 = vcombine.low %v1423_v23, %v1425_v13  ;;  %1911 = vrot.lane.b32.xlu1 %v5592_v60, %s4854_s24  ;;  %7295 = vst [vmem:[#allocation63_spill] sm:$0xff] %v5616_v4  ;;  %v1106_v13 = vshrl.u32 %v5553_v58, 16 }
 0x186   : > { %1380 = vrot.lane.b32.xlu0 %v5553_v58, %s4853_s21  ;;  %v1825_v51 = vor.u32 %v1824_v41, %v1099_v39  ;;  %v1109_v41 = vshll.u32 %v5553_v58, 16  ;;  %v1830_v30 = vrot.slane %v1123_v35, 1 }
 0x187   : > { %4591 = vmatmul.mubr.msk.bf16.vlgmr.msra.gmra.mrb[16].mxu1 %vm1502_vm8, %v4247_v34  ;;  %v5602_v0 = vpop.permute.xlu1 %1214 }
 0x188   : > { %v5604_v7 = vpop.permute.xlu0 %1889  ;;  %4607 = vmatpush3.bf16.msra.mxu1 %v4818_v25  ;;  %v1120_v25 = vshrl.u32 %v5504_v57, 16  ;;  %v5627_v23 = vsel %vm5076_vm6, %v1825_v51, 0 }
 0x189   : > { %7293 = vst [vmem:[#allocation61_spill] sm:$0xff] %v5604_v7  ;;  %2556 = vrot.lane.b32.xlu1 %v5211_v12, %s4854_s24  ;;  %4792 = vmatprep.subr.msk.bf16.mxu1 %vm555_vm0, %v4819_v47  ;;  %7296 = vst [vmem:[#allocation64_spill] sm:$0xff] %v5627_v23 }
 0x18a   : > { %1236 = vrot.lane.b32.xlu0 %v5572_v40, %s4853_s21  ;;  %v1122_v39 = vrot.slane %v1120_v25, 7  ;;  %v1826_v40 = vrot.slane %v1109_v41, 1 }
 0x18b   : > { %v5612_v11 = vpop.permute.xlu1 %1919 }
 0x18c   : > { %7294 = vst [vmem:[#allocation62_spill] sm:$0xff] %v5612_v11  ;;  %v1369_v34 = vpop.permute.xlu0 %1368  ;;  %4609 = vmatpush3.bf16.msra.mxu1 %v1701_v54  ;;  %v1108_v11 = vrot.slane %v1106_v13, 7  ;;  %v1125_v51 = vor.u32 %v1123_v35, %v1122_v39  ;;  %v5653_v39 = vunpack.i.l.bf16 %v5452_v38 }
 0x18d   : > { %1201 = vrot.lane.b32.xlu1 %v5616_v4, %s4854_s24 }
 0x18e   : > { %2586 = vrot.lane.b32.xlu0 %v5211_v12, %s4853_s21  ;;  %v1111_v60 = vor.u32 %v1109_v41, %v1108_v11  ;;  %v1395_v11 = vsel %vm530_vm1, %v5031_v56, %v5568_v20  ;;  %v1831_v20 = vor.u32 %v1830_v30, %v1120_v25  ;;  %v7304_v25 = vshll.u32 %v5211_v12, 16 }
 0x18f   : > { %v1337_v14 = vpop.permute.xlu1 %1336 }
 0x190   : > { %v5623_v15 = vpop.permute.xlu0 %1179  ;;  %v1401_v57 = vsel %vm530_vm1, %v5100_v26, %v1337_v14  ;;  %v5667_v35 = vsel %vm5049_vm4, 0, %v1111_v60  ;;  %v5695_v30 = vsel %vm5076_vm6, %v1831_v20, 0 }
 0x191   : > { %1907 = vrot.lane.b32.xlu1 %v5627_v23, %s4854_s24  ;;  %v1433_v26 = vsel %vm1287_vm7, %v1401_v57, %v5653_v39  ;;  %7302 = vst [vmem:[#allocation69_spill] sm:$0xff] %v5695_v30 }
 0x192   : > { %1232 = vrot.lane.b32.xlu0 %v5616_v4, %s4853_s21 }
 0x193   : > { %v5634_v47 = vpop.permute.xlu1 %1210 }
 0x194   : > { %v5638_v54 = vpop.permute.xlu0 %1885 }
 0x195   : > { %7297 = vst [vmem:[#allocation65_spill] sm:$0xff] %v5638_v54  ;;  %2552 = vrot.lane.b32.xlu1 %v5213_v22, %s4854_s24  ;;  %v1160_v54 = vsel %vm5049_vm4, 0, %v1125_v51 }
 0x196   : > { %1935 = vrot.lane.b32.xlu0 %v5627_v23, %s4853_s21 }
 0x197   : > { %v5644_v7 = vpop.permute.xlu1 %1915 }
 0x198   : > { %7298 = vst [vmem:[#allocation66_spill] sm:$0xff] %v5644_v7  ;;  %v1365_v4 = vpop.permute.xlu0 %1364  ;;  %v1827_v7 = vor.u32 %v1826_v40, %v1106_v13  ;;  %v1399_v40 = vsel %vm530_vm1, %v5215_v24, %v5557_v8  ;;  %v7301_v8 = vshrl.u32 %v5211_v12, 16 }
 0x199   : > { %2588 = vrot.lane.b32.xlu1 %v5217_v27, %s4853_s21  ;;  %v1427_v13 = vsel %vm1287_vm7, %v1395_v11, %v1365_v4 }
 0x19a   : > { %1207 = vrot.lane.b32.xlu0 %v1160_v54, %s4854_s24  ;;  %v5686_v24 = vsel %vm5076_vm6, %v1827_v7, 0 }
 0x19b   : > { %v1333_v23 = vpop.permute.xlu1 %1332  ;;  %7300 = vst [vmem:[#allocation68_spill] sm:$0xff] %v5686_v24 }
 0x19c   : > { %v1397_v14 = vsel %vm530_vm1, %v5145_v2, %v1333_v23  ;;  %v5663_v41 = vpop.permute.xlu0 %1220  ;;  %v1431_v2 = vsel %vm1287_vm7, %v1399_v40, %v1369_v34  ;;  %v5700_v34 = vld [vmem:[%s7137_s7 + $0x18] sm:$0xff]   ;;  %v7306_v40 = vshrl.u32 %v5213_v22, 16 }
 0x19d   : > { %v1429_v56 = vsel %vm1287_vm7, %v1397_v14, %v5536_v33  ;;  %1234 = vrot.lane.b32.xlu1 %v5667_v35, %s4853_s21  ;;  %v4249_v60 = vcombine.low %v1431_v2, %v1433_v26  ;;  %v2270_v33 = vrot.slane %v7301_v8, 7  ;;  %4626 = vmatprep.subr.bf16.mxu1 %v5700_v34  ;;  %v7308_v2 = vshll.u32 %v5213_v22, 16 }
 0x19e   : > { %v4248_v23 = vcombine.low %v1427_v13, %v1429_v56  ;;  %1238 = vrot.lane.b32.xlu0 %v1160_v54, %s4853_s21  ;;  %v2256_v13 = vrot.slane %v7306_v40, 7 }
 0x19f   : > { %v5679_v51 = vpop.permute.xlu1 %1189  ;;  %v2273_v54 = vor.u32 %v7304_v25, %v2270_v33 }
 0x1a0   : > { %v5681_v57 = vpop.permute.xlu0 %1925  ;;  %4594 = vmatprep.mubr.msk.bf16.mxu1 %vm1502_vm8, %v4248_v23  ;;  %v2259_v23 = vor.u32 %v7308_v2, %v2256_v13  ;;  %v4823_v13 = vld [vmem:[%s7139_s9 + $0x14] ss:$0 sps:$4 sm:$0xff]  }
 0x1a1   : > { %7299 = vst [vmem:[#allocation67_spill] sm:$0xff] %v5681_v57  ;;  %4595 = vmatmul.mubr.msk.bf16.gmra.mrb[20].mxu1 %vm1502_vm8, %v4249_v60  ;;  %1937 = vrot.lane.b32.xlu1 %v5686_v24, %s4853_s21  ;;  %v5721_v14 = vsel %vm5049_vm4, 0, %v2273_v54  ;;  %v4822_v60 = vld [vmem:[%s7139_s9 + $0xc] sm:$0xff]   ;;  %v7311_v54 = vshrl.u32 %v5217_v27, 16  ;;  %v2752_v2 = vsel %vm555_vm0, %v4823_v13, 0 }
 0x1a2   : > { %1913 = vrot.lane.b32.xlu0 %v5695_v30, %s4854_s24  ;;  %7305 = vst [vmem:[#allocation71_spill] sm:$0xff] %v5721_v14  ;;  %4646 = vmatprep.subr.bf16.mxu0 %v4822_v60  ;;  %v5746_v25 = vsel %vm5049_vm4, 0, %v2259_v23 }
 0x1a3   : > { %v5704_v7 = vpop.permute.xlu1 %1895  ;;  %4647 = vmatpush3.bf16.msra.mxu0 %v4822_v60  ;;  %7310 = vst [vmem:[#allocation74_spill] sm:$0xff] %v5746_v25  ;;  %v2277_v40 = vrot.slane %v7311_v54, 7  ;;  %v7312_v54 = vshll.u32 %v5217_v27, 16 }
 0x1a4   : > { %7303 = vst [vmem:[#allocation70_spill] sm:$0xff] %v5704_v7  ;;  %v5707_v4 = vpop.permute.xlu0 %1342  ;;  %4794 = vmatprep.subr.msk.bf16.mxu0 %vm555_vm0, %v4823_v13 }
 0x1a5   : > { %2584 = vrot.lane.b32.xlu1 %v5222_v43, %s4853_s21 }
 0x1a6   : > { %2558 = vrot.lane.b32.xlu0 %v5217_v27, %s4854_s24 }
 0x1a7   : > { %v5715_v11 = vpop.permute.xlu1 %1374  ;;  %4649 = vmatpush3.bf16.msra.mxu0 %v2752_v2  ;;  %v7314_v2 = vshrl.u32 %v5222_v43, 16 }
 0x1a8   : > { %v5717_v26 = vpop.permute.xlu0 %1216 }
 0x1a9   : > { %2417 = vrot.lane.b32.xlu1 %v5721_v14, %s4854_s24  ;;  %v2263_v7 = vrot.slane %v7314_v2, 7 }
 0x1aa   : > { %1203 = vrot.lane.b32.xlu0 %v5667_v35, %s4854_s24 }
 0x1ab   : > { %v5729_v56 = vpop.permute.xlu1 %1185 }
 0x1ac   : > { %v5731_v20 = vpop.permute.xlu0 %1921 }
 0x1ad   : > { %7307 = vst [vmem:[#allocation72_spill] sm:$0xff] %v5731_v20  ;;  %2564 = vrot.lane.b32.xlu1 %v5282_v36, %s4854_s24 }
 0x1ae   : > { %1909 = vrot.lane.b32.xlu0 %v5686_v24, %s4854_s24  ;;  %v2280_v24 = vor.u32 %v7312_v54, %v2277_v40 }
 0x1af   : > { %v5742_v8 = vpop.permute.xlu1 %1891 }
 0x1b0   : > { %7309 = vst [vmem:[#allocation73_spill] sm:$0xff] %v5742_v8  ;;  %v1339_v33 = vpop.permute.xlu0 %1338  ;;  %v5773_v13 = vsel %vm5049_vm4, 0, %v2280_v24 }
 0x1b1   : > { %2413 = vrot.lane.b32.xlu1 %v5746_v25, %s4854_s24  ;;  %7313 = vst [vmem:[#allocation75_spill] sm:$0xff] %v5773_v13 }
 0x1b2   : > { %2554 = vrot.lane.b32.xlu0 %v5222_v43, %s4854_s24 }
 0x1b3   : > { %v1345_v60 = vpop.permute.xlu1 %1344 }
 0x1b4   : > { %v5759_v23 = vpop.permute.xlu0 %1191 }
 0x1b5   : > { %2560 = vrot.lane.b32.xlu1 %v5284_v46, %s4854_s24 }
 0x1b6   : > { %2447 = vrot.lane.b32.xlu0 %v5721_v14, %s4853_s21  ;;  %v7317_v14 = vshll.u32 %v5222_v43, 16  ;;  %v7321_v43 = vshll.u32 %v5282_v36, 16 }
 0x1b7   : > { %v5767_v25 = vpop.permute.xlu1 %1218 }
 0x1b8   : > { %v5769_v12 = vpop.permute.xlu0 %1222  ;;  %v2266_v27 = vor.u32 %v7317_v14, %v2263_v7 }
 0x1b9   : > { %2449 = vrot.lane.b32.xlu1 %v5773_v13, %s4853_s21 }
 0x1ba   : > { %2594 = vrot.lane.b32.xlu0 %v5282_v36, %s4853_s21  ;;  %v5795_v8 = vsel %vm5049_vm4, 0, %v2266_v27 }
 0x1bb   : > { %v5781_v40 = vpop.permute.xlu1 %1923  ;;  %7319 = vst [vmem:[#allocation79_spill] sm:$0xff] %v5795_v8 }
 0x1bc   : > { %7315 = vst [vmem:[#allocation76_spill] sm:$0xff] %v5781_v40  ;;  %v5783_v54 = vpop.permute.xlu0 %1897  ;;  %v7320_v40 = vshrl.u32 %v5282_v36, 16  ;;  %v7326_v36 = vshll.u32 %v5284_v46, 16 }
 0x1bd   : > { %7316 = vst [vmem:[#allocation77_spill] sm:$0xff] %v5783_v54  ;;  %2596 = vrot.lane.b32.xlu1 %v5286_v32, %s4853_s21 }
 0x1be   : > { %2590 = vrot.lane.b32.xlu0 %v5284_v46, %s4853_s21  ;;  %v2298_v57 = vrot.slane %v7320_v40, 7 }
 0x1bf   : > { %v1341_v24 = vpop.permute.xlu1 %1340 }
 0x1c0   : > { %v5791_v2 = vpop.permute.xlu0 %1927  ;;  %v2301_v54 = vor.u32 %v7321_v43, %v2298_v57 }
 0x1c1   : > { %7318 = vst [vmem:[#allocation78_spill] sm:$0xff] %v5791_v2  ;;  %2445 = vrot.lane.b32.xlu1 %v5795_v8, %s4853_s21 }
 0x1c2   : > { %2419 = vrot.lane.b32.xlu0 %v5773_v13, %s4854_s24  ;;  %v5817_v2 = vsel %vm5049_vm4, 0, %v2301_v54  ;;  %v7324_v13 = vshrl.u32 %v5284_v46, 16  ;;  %v1405_v54 = vsel %vm530_vm1, %v5347_v19, %v1341_v24 }
 0x1c3   : > { %v5803_v7 = vpop.permute.xlu1 %1197  ;;  %7323 = vst [vmem:[#allocation81_spill] sm:$0xff] %v5817_v2  ;;  %v1437_v19 = vsel %vm1287_vm7, %v1405_v54, %v5715_v11  ;;  %v1409_v11 = vsel %vm530_vm1, %v5280_v5, %v1345_v60  ;;  %v877_v5 = vadd.f32 %v5180_v31, %v5372_v9  ;;  %v7331_v60 = vshll.u32 %v5288_v63, 16 }
 0x1c4   : > { %v1377_v14 = vpop.permute.xlu0 %1376  ;;  %v2284_v22 = vrot.slane %v7324_v13, 7 }
 0x1c5   : > { %2592 = vrot.lane.b32.xlu1 %v5288_v63, %s4853_s21 }
 0x1c6   : > { %2566 = vrot.lane.b32.xlu0 %v5286_v32, %s4854_s24 }
 0x1c7   : > { %v5811_v27 = vpop.permute.xlu1 %1903 }
 0x1c8   : > { %7322 = vst [vmem:[#allocation80_spill] sm:$0xff] %v5811_v27  ;;  %v5813_v40 = vpop.permute.xlu0 %1187  ;;  %v2287_v27 = vor.u32 %v7326_v36, %v2284_v22  ;;  %v7328_v22 = vshrl.u32 %v5286_v32, 16 }
 0x1c9   : > { %2425 = vrot.lane.b32.xlu1 %v5817_v2, %s4854_s24 }
 0x1ca   : > { %2415 = vrot.lane.b32.xlu0 %v5795_v8, %s4854_s24  ;;  %v1403_v8 = vsel %vm530_vm1, 0, %v1339_v33  ;;  %v2305_v36 = vrot.slane %v7328_v22, 7 }
 0x1cb   : > { %v5825_v43 = vpop.permute.xlu1 %1382 }
 0x1cc   : > { %v5827_v57 = vpop.permute.xlu0 %1893 }
 0x1cd   : > { %7325 = vst [vmem:[#allocation82_spill] sm:$0xff] %v5827_v57  ;;  %2572 = vrot.lane.b32.xlu1 %v5391_v45, %s4854_s24  ;;  %v5842_v57 = vsel %vm5049_vm4, 0, %v2287_v27  ;;  %v7329_v27 = vshll.u32 %v5286_v32, 16 }
 0x1ce   : > { %2562 = vrot.lane.b32.xlu0 %v5288_v63, %s4854_s24  ;;  %7327 = vst [vmem:[#allocation83_spill] sm:$0xff] %v5842_v57 }
 0x1cf   : > { %v5837_v13 = vpop.permute.xlu1 %1193  ;;  %v2308_v22 = vor.u32 %v7329_v27, %v2305_v36 }
 0x1d0   : > { %v1373_v20 = vpop.permute.xlu0 %1372 }
 0x1d1   : > { %v1435_v46 = vsel %vm1287_vm7, %v1403_v8, %v1373_v20  ;;  %2421 = vrot.lane.b32.xlu1 %v5842_v57, %s4854_s24  ;;  %v2388_v36 = vsel %vm5049_vm4, 0, %v2308_v22  ;;  %v913_v22 = vmax.f32 %v877_v5, 0.0  ;;  %v5911_v5 = vld [vmem:[%s7139_s9] sm:$0xff]  }
 0x1d2   : > { %v4250_v24 = vcombine.low %v1435_v46, %v1437_v19  ;;  %2455 = vrot.lane.b32.xlu0 %v5817_v2, %s4853_s21  ;;  %v1407_v46 = vsel %vm530_vm1, %v5385_v61, %v5707_v4  ;;  %v7330_v19 = vshrl.u32 %v5288_v63, 16  ;;  %7336 = vst [vmem:[#allocation86_spill] sm:$0xff] %v5911_v5  ;;  %4666 = vmatprep.subr.bf16.mxu0 %v5911_v5 }
 0x1d3   : > { %v5853_v33 = vpop.permute.xlu1 %1899  ;;  %v1439_v8 = vsel %vm1287_vm7, %v1407_v46, %v1377_v14 }
 0x1d4   : > { %v5855_v30 = vpop.permute.xlu0 %1228  ;;  %4598 = vmatprep.mubr.msk.bf16.mxu1 %vm1502_vm8, %v4250_v24  ;;  %v2291_v24 = vrot.slane %v7330_v19, 7 }
 0x1d5   : > { %2568 = vrot.lane.b32.xlu1 %v5393_v53, %s4854_s24 }
 0x1d6   : > { %2600 = vrot.lane.b32.xlu0 %v5391_v45, %s4853_s21  ;;  %v2294_v14 = vor.u32 %v7331_v60, %v2291_v24  ;;  %v7335_v24 = vshll.u32 %v5391_v45, 16 }
 0x1d7   : > { %v1379_v20 = vpop.permute.xlu1 %1378 }
 0x1d8   : > { %v1441_v54 = vsel %vm1287_vm7, %v1409_v11, %v1379_v20  ;;  %v5871_v32 = vpop.permute.xlu0 %1931  ;;  %v5894_v9 = vsel %vm5049_vm4, 0, %v2294_v14  ;;  %v7334_v20 = vshrl.u32 %v5391_v45, 16 }
 0x1d9   : > { %v4251_v27 = vcombine.low %v1439_v8, %v1441_v54  ;;  %2457 = vrot.lane.b32.xlu1 %v2388_v36, %s4853_s21  ;;  %7333 = vst [vmem:[#allocation85_spill] sm:$0xff] %v5894_v9  ;;  %v5902_v54 = vpack.c.bf16 %v913_v22, %v913_v22 }
 0x1da   : > { %2451 = vrot.lane.b32.xlu0 %v5842_v57, %s4853_s21  ;;  %v2326_v8 = vrot.slane %v7334_v20, 7  ;;  %v7339_v20 = vshrl.u32 %v5393_v53, 16  ;;  %v7340_v57 = vshll.u32 %v5393_v53, 16 }
 0x1db   : > { %4599 = vmatmul.mubr.msk.bf16.gmra.mrb[24].mxu1 %vm1502_vm8, %v4251_v27  ;;  %v5883_v61 = vpop.permute.xlu1 %1230 }
 0x1dc   : > { %v1351_v4 = vpop.permute.xlu0 %1350  ;;  %v2329_v27 = vor.u32 %v7335_v24, %v2326_v8  ;;  %v2312_v8 = vrot.slane %v7339_v20, 7  ;;  %v890_v24 = vadd.f32 %v5180_v31, %v5472_v21 }
 0x1dd   : > { %2602 = vrot.lane.b32.xlu1 %v5400_v42, %s4853_s21 }
 0x1de   : > { %2427 = vrot.lane.b32.xlu0 %v2388_v36, %s4854_s24  ;;  %v5924_v22 = vsel %vm5049_vm4, 0, %v2329_v27  ;;  %v2315_v45 = vor.u32 %v7340_v57, %v2312_v8  ;;  %v7341_v27 = vshrl.u32 %v5400_v42, 16  ;;  %v916_v63 = vmax.f32 %v890_v24, 0.0 }
 0x1df   : > { %v5890_v46 = vpop.permute.xlu1 %1933  ;;  %7338 = vst [vmem:[#allocation88_spill] sm:$0xff] %v5924_v22  ;;  %v7343_v57 = vshll.u32 %v5400_v42, 16  ;;  %v901_v24 = vadd.f32 %v5476_v29, %v5180_v31 }
 0x1e0   : > { %7332 = vst [vmem:[#allocation84_spill] sm:$0xff] %v5890_v46  ;;  %v1347_v11 = vpop.permute.xlu0 %1346  ;;  %v2333_v20 = vrot.slane %v7341_v27, 7  ;;  %v5948_v21 = vsel %vm5049_vm4, 0, %v2315_v45  ;;  %v5957_v27 = vpack.c.bf16 %v916_v63, %v916_v63 }
 0x1e1   : > { %2453 = vrot.lane.b32.xlu1 %v5894_v9, %s4853_s21  ;;  %7342 = vst [vmem:[#allocation89_spill] sm:$0xff] %v5948_v21 }
 0x1e2   : > { %2574 = vrot.lane.b32.xlu0 %v5400_v42, %s4854_s24  ;;  %v2336_v8 = vor.u32 %v7343_v57, %v2333_v20  ;;  %v1415_v20 = vsel %vm530_vm1, %v5553_v58, %v1351_v4  ;;  %v919_v42 = vmax.f32 %v901_v24, 0.0 }
 0x1e3   : > { %v1353_v36 = vpop.permute.xlu1 %1352 }
 0x1e4   : > { %v5904_v19 = vpop.permute.xlu0 %1199  ;;  %v5973_v63 = vsel %vm5049_vm4, 0, %v2336_v8  ;;  %v1417_v57 = vsel %vm530_vm1, %v5406_v37, %v1353_v36  ;;  %v1245_v8 = vsel %vm530_vm1, %v5132_v50, %v5623_v15 }
 0x1e5   : > { %2598 = vrot.lane.b32.xlu1 %v5902_v54, %s4853_s21  ;;  %7344 = vst [vmem:[#allocation90_spill] sm:$0xff] %v5973_v63  ;;  %v1448_v50 = vsel %vm1287_vm7, %v1417_v57, %v5653_v39  ;;  %v1291_v15 = vsel %vm1287_vm7, %v1245_v8, %v5521_v6  ;;  %v1251_v6 = vsel %vm530_vm1, %v5067_v10, %v5588_v59 }
 0x1e6   : > { %2423 = vrot.lane.b32.xlu0 %v5894_v9, %s4854_s24  ;;  %v1248_v10 = vsel %vm530_vm1, %v5196_v52, %v5506_v28  ;;  %v1254_v8 = vsel %vm530_vm1, %v5161_v17, %v5729_v56  ;;  %v4821_v17 = vld [vmem:[%s7137_s7 + $0x20] ss:$0 sps:$4 sm:$0xff]  }
 0x1e7   : > { %v5918_v60 = vpop.permute.xlu1 %1226  ;;  %v1297_v52 = vsel %vm1287_vm7, %v1254_v8, %v5767_v25 }
 0x1e8   : > { %v5920_v14 = vpop.permute.xlu0 %1905 }
 0x1e9   : > { %7337 = vst [vmem:[#allocation87_spill] sm:$0xff] %v5920_v14  ;;  %2433 = vrot.lane.b32.xlu1 %v5924_v22, %s4854_s24  ;;  %v1242_v14 = vsel %vm530_vm1, 0, %v5555_v48 }
 0x1ea   : > { %2570 = vrot.lane.b32.xlu0 %v5902_v54, %s4854_s24  ;;  %v1289_v37 = vsel %vm1287_vm7, %v1242_v14, %v5634_v47  ;;  %v6007_v47 = vpack.c.bf16 %v919_v42, %v919_v42  ;;  %v1257_v42 = vsel %vm530_vm1, %v5299_v18, %v5813_v40  ;;  %v7346_v40 = vshrl.u32 %v5508_v62, 16 }
 0x1eb   : > { %v5934_v9 = vpop.permute.xlu1 %1929  ;;  %v4264_v36 = vcombine.low %v1289_v37, %v1291_v15  ;;  %v1299_v59 = vsel %vm1287_vm7, %v1257_v42, %v5663_v41  ;;  %v7348_v15 = vld [vmem:[#allocation40_spill] sm:$0xff] }
 0x1ec   : > { %v1385_v2 = vpop.permute.xlu0 %1384  ;;  %v2354_v57 = vrot.slane %v7346_v40, 7  ;;  %v2359_v56 = vshrl.u32 %v6007_v47, 16 }
 0x1ed   : > { %2580 = vrot.lane.b32.xlu1 %v5508_v62, %s4854_s24  ;;  %v1447_v58 = vsel %vm1287_vm7, %v1415_v20, %v1385_v2 }
 0x1ee   : > { %2461 = vrot.lane.b32.xlu0 %v5924_v22, %s4853_s21  ;;  %v7204_v22 = vshrl.u32 %v5902_v54, 16 }
 0x1ef   : > { %v1349_v46 = vpop.permute.xlu1 %1348 }
 0x1f0   : > { %v5944_v5 = vpop.permute.xlu0 %1195  ;;  %v2319_v29 = vrot.slane %v7204_v22, 7  ;;  %v1411_v22 = vsel %vm530_vm1, %v5354_v1, %v1347_v11  ;;  %v2320_v1 = vshll.u32 %v5902_v54, 16  ;;  %v4253_v11 = vcombine.low %v1447_v58, %v1448_v50 }
 0x1f1   : > { %2429 = vrot.lane.b32.xlu1 %v5948_v21, %s4854_s24  ;;  %v1413_v21 = vsel %vm530_vm1, %v5466_v55, %v1349_v46  ;;  %v893_v55 = vadd.f32 %v5180_v31, %v5479_v49  ;;  %v1268_v25 = vsel %vm530_vm1, %v5447_v44, %v5944_v5  ;;  %v2341_v50 = vshll.u32 %v5957_v27, 16 }
 0x1f2   : > { %2608 = vrot.lane.b32.xlu0 %v5508_v62, %s4853_s21  ;;  %v1445_v49 = vsel %vm1287_vm7, %v1413_v21, %v5825_v43 }
 0x1f3   : > { %v5961_v53 = vpop.permute.xlu1 %1205  ;;  %v917_v2 = vmax.f32 %v893_v55, 0.0  ;;  %v2338_v55 = vshrl.u32 %v5957_v27, 16 }
 0x1f4   : > { %v5963_v45 = vpop.permute.xlu0 %1901 }
 0x1f5   : > { %2576 = vrot.lane.b32.xlu1 %v5957_v27, %s4854_s24  ;;  %v6028_v21 = vpack.c.bf16 %v917_v2, %v917_v2  ;;  %v1260_v2 = vsel %vm530_vm1, %v7348_v15, %v5679_v51  ;;  %v7353_v15 = vld [vmem:[#allocation54_spill] sm:$0xff] }
 0x1f6   : > { %2604 = vrot.lane.b32.xlu0 %v5957_v27, %s4853_s21  ;;  %v1301_v5 = vsel %vm1287_vm7, %v1260_v2, %v5769_v12  ;;  %v2361_v12 = vrot.slane %v2359_v56, 7  ;;  %v1271_v2 = vsel %vm530_vm1, %v7353_v15, %v5803_v7 }
 0x1f7   : > { %v5983_v46 = vpop.permute.xlu1 %1911  ;;  %v2345_v41 = vshrl.u32 %v6028_v21, 16  ;;  %v2348_v40 = vshll.u32 %v6028_v21, 16 }
 0x1f8   : > { %v1381_v4 = vpop.permute.xlu0 %1380 }
 0x1f9   : > { %v1443_v31 = vsel %vm1287_vm7, %v1411_v22, %v1381_v4  ;;  %2463 = vrot.lane.b32.xlu1 %v5973_v63, %s4853_s21  ;;  %v2322_v22 = vor.u32 %v2320_v1, %v2319_v29  ;;  %v1295_v29 = vsel %vm1287_vm7, %v1251_v6, %v5717_v26  ;;  %v1293_v26 = vsel %vm1287_vm7, %v1248_v10, %v5602_v0 }
 0x1fa   : > { %v4252_v48 = vcombine.low %v1443_v31, %v1445_v49  ;;  %2435 = vrot.lane.b32.xlu0 %v5973_v63, %s4854_s24  ;;  %v4265_v58 = vcombine.low %v1293_v26, %v1295_v29  ;;  %v4266_v4 = vcombine.low %v1297_v52, %v1299_v59  ;;  %v7347_v31 = vshll.u32 %v5508_v62, 16  ;;  %v6127_v26 = vld [vmem:[%s7141_s11] sm:$0xf] }
 0x1fb   : > { %v6009_v43 = vpop.permute.xlu1 %2556  ;;  %v6038_v18 = vsel %vm5049_vm4, 0, %v2322_v22  ;;  %v2340_v49 = vrot.slane %v2338_v55, 7  ;;  %v2347_v44 = vrot.slane %v2345_v41, 7  ;;  %v1307_v6 = vsel %vm1287_vm7, %v1268_v25, %v5855_v30 }
 0x1fc   : > { %v6011_v14 = vpop.permute.xlu0 %1236  ;;  %4602 = vmatprep.mubr.msk.bf16.mxu1 %vm1502_vm8, %v4252_v48  ;;  %7345 = vst [vmem:[#allocation91_spill] sm:$0xff] %v6038_v18  ;;  %v2357_v0 = vor.u32 %v7347_v31, %v2354_v57  ;;  %v6081_v48 = vunpack.i.h.bf16 %v5452_v38  ;;  %v1265_v29 = vsel %vm530_vm1, 0, %v5837_v13  ;;  %v2362_v59 = vshll.u32 %v6007_v47, 16 }
 0x1fd   : > { %4603 = vmatmul.mubr.msk.bf16.gmra.mrb[28].mxu1 %vm1502_vm8, %v4253_v11  ;;  %2610 = vrot.lane.b32.xlu1 %v6007_v47, %s4853_s21  ;;  %v7349_v11 = vld [vmem:[#allocation26_spill] sm:$0xff]  ;;  %v2343_v51 = vor.u32 %v2341_v50, %v2340_v49  ;;  %v1305_v30 = vsel %vm1287_vm7, %v1265_v29, %v5918_v60  ;;  %v2350_v52 = vor.u32 %v2348_v40, %v2347_v44  ;;  %v7358_v29 = vld [vmem:[#allocation59_spill] sm:$0xff] }
 0x1fe   : > { %4610 = vmatprep.mubr.msk.bf16.mxu1 %vm1502_vm8, %v4264_v36  ;;  %2582 = vrot.lane.b32.xlu0 %v6007_v47, %s4854_s24  ;;  %v1263_v36 = vsel %vm530_vm1, %v7349_v11, %v5759_v23  ;;  %v6100_v42 = vsel %vm5049_vm4, 0, %v2357_v0  ;;  %v2097_v23 = vsel %vm555_vm0, %v4821_v17, 0  ;;  %v4268_v13 = vcombine.low %v1305_v30, %v1307_v6  ;;  %v7357_v6 = vld [vmem:[#allocation58_spill] sm:$0xff] }
 0x1ff   : > { %v6030_v24 = vpop.permute.xlu1 %1201  ;;  %7350 = vst [vmem:[#allocation40_spill] sm:$0xff] %v6100_v42  ;;  %v2364_v60 = vor.u32 %v2362_v59, %v2361_v12  ;;  %v6151_v25 = vsel %vm5049_vm4, 0, %v2350_v52  ;;  %v1944_v12 = vsel %vm530_vm1, 0, %v7357_v6 }
 0x200   : > { %v6034_v20 = vpop.permute.xlu0 %2586  ;;  %7352 = vst [vmem:[#allocation26_spill] sm:$0xff] %v6151_v25 }
 0x201   : > { %2459 = vrot.lane.b32.xlu1 %v6038_v18, %s4853_s21  ;;  %v2396_v11 = vsel %vm5049_vm4, 0, %v2364_v60  ;;  %v7361_v60 = vld [vmem:[#allocation65_spill] sm:$0xff] }
 0x202   : > { %2431 = vrot.lane.b32.xlu0 %v6038_v18, %s4854_s24 }
 0x203   : > { %v6059_v28 = vpop.permute.xlu1 %1907 }
 0x204   : > { %v1233_v37 = vpop.permute.xlu0 %1232 }
 0x205   : > { %4611 = vmatmul.mubr.msk.bf16.vlgmr.msra.gmra.mrb[16].mxu1 %vm1502_vm8, %v4265_v58  ;;  %2606 = vrot.lane.b32.xlu1 %v6028_v21, %s4853_s21  ;;  %v6131_v58 = vsel %vm5049_vm4, 0, %v2343_v51  ;;  %v7356_v51 = vld [vmem:[#allocation60_spill] sm:$0xff] }
 0x206   : > { %4614 = vmatprep.mubr.msk.bf16.mxu1 %vm1502_vm8, %v4266_v4  ;;  %2578 = vrot.lane.b32.xlu0 %v6028_v21, %s4854_s24  ;;  %v7351_v4 = vld [vmem:[#allocation44_spill] sm:$0xff] }
 0x207   : > { %v6089_v22 = vpop.permute.xlu1 %2552  ;;  %4627 = vmatpush3.bf16.msra.mxu1 %v5700_v34  ;;  %v1303_v34 = vsel %vm1287_vm7, %v1263_v36, %v6081_v48  ;;  %v1274_v31 = vsel %vm530_vm1, %v7351_v4, %v5904_v19  ;;  %v1309_v19 = vsel %vm1287_vm7, %v1271_v2, %v5883_v61  ;;  %v7362_v4 = vld [vmem:[#allocation19_spill] sm:$0xff] }
 0x208   : > { %v6096_v38 = vpop.permute.xlu0 %1935  ;;  %4793 = vmatprep.subr.msk.bf16.mxu1 %vm555_vm0, %v4821_v17  ;;  %v4267_v57 = vcombine.low %v1301_v5, %v1303_v34  ;;  %v1311_v49 = vsel %vm1287_vm7, %v1274_v31, %v1233_v37  ;;  %v7354_v5 = vld [vmem:[#allocation28_spill] sm:$0xff]  ;;  %v1283_v34 = vsel %vm530_vm1, %v5667_v35, %v5961_v53  ;;  %v1947_v31 = vsel %vm530_vm1, %v7362_v4, %v7361_v60  ;;  %v7364_v53 = vld [vmem:[#allocation63_spill] sm:$0xff] }
 0x209   : > { %2441 = vrot.lane.b32.xlu1 %v6100_v42, %s4854_s24  ;;  %v4269_v37 = vcombine.low %v1309_v19, %v1311_v49  ;;  %v6176_v61 = vsel %vm5076_vm6, %v7354_v5, 0  ;;  %v7363_v49 = vld [vmem:[#allocation51_spill] sm:$0xff]  ;;  %v7366_v5 = vld [vmem:[#allocation69_spill] sm:$0xff] }
 0x20a   : > { %2469 = vrot.lane.b32.xlu0 %v6100_v42, %s4853_s21  ;;  %7355 = vst [vmem:[#allocation44_spill] sm:$0xff] %v6176_v61  ;;  %v1277_v15 = vsel %vm530_vm1, %v7363_v49, %v6030_v24  ;;  %v7371_v60 = vld [vmem:[#allocation39_spill] sm:$0xff]  ;;  %v7372_v49 = vld [vmem:[#allocation61_spill] sm:$0xff] }
 0x20b   : > { %v6121_v10 = vpop.permute.xlu1 %2588  ;;  %4629 = vmatpush3.bf16.msra.mxu1 %v2097_v23 }
 0x20c   : > { %v1208_v8 = vpop.permute.xlu0 %1207  ;;  %4797 = vmatprep.subr.msk.bf16.mxu1 %vm555_vm0, %v6127_v26 }
 0x20d   : > { %4615 = vmatmul.mubr.msk.bf16.gmra.mrb[20].mxu1 %vm1502_vm8, %v4267_v57  ;;  %2437 = vrot.lane.b32.xlu1 %v6131_v58, %s4854_s24  ;;  %v1286_v57 = vsel %vm530_vm1, %v7358_v29, %v1208_v8  ;;  %v7365_v8 = vld [vmem:[#allocation66_spill] sm:$0xff] }
 0x20e   : > { %4618 = vmatprep.mubr.msk.bf16.mxu1 %vm1502_vm8, %v4268_v13  ;;  %2465 = vrot.lane.b32.xlu0 %v6131_v58, %s4853_s21  ;;  %v7359_v13 = vld [vmem:[#allocation29_spill] sm:$0xff]  ;;  %v1318_v24 = vsel %vm1287_vm7, %v1286_v57, %v6081_v48  ;;  %v7370_v57 = vld [vmem:[#allocation82_spill] sm:$0xff] }
 0x20f   : > { %v1235_v0 = vpop.permute.xlu1 %1234  ;;  %v6194_v52 = vsel %vm5076_vm6, %v7359_v13, 0  ;;  %v1959_v4 = vsel %vm530_vm1, %v7371_v60, %v7370_v57 }
 0x210   : > { %v1239_v17 = vpop.permute.xlu0 %1238  ;;  %7360 = vst [vmem:[#allocation54_spill] sm:$0xff] %v6194_v52  ;;  %v1313_v19 = vsel %vm1287_vm7, %v1277_v15, %v1235_v0  ;;  %v7373_v15 = vld [vmem:[#allocation14_spill] sm:$0xff] }
 0x211   : > { %2467 = vrot.lane.b32.xlu1 %v6151_v25, %s4853_s21  ;;  %v1317_v2 = vsel %vm1287_vm7, %v1283_v34, %v1239_v17  ;;  %v7367_v34 = vld [vmem:[#allocation55_spill] sm:$0xff] }
 0x212   : > { %2443 = vrot.lane.b32.xlu0 %v2396_v11, %s4854_s24  ;;  %v1992_v29 = vsel %vm1287_vm7, %v1947_v31, %v7367_v34  ;;  %v7379_v34 = vld [vmem:[#allocation21_spill] sm:$0xff] }
 0x213   : > { %v6163_v36 = vpop.permute.xlu1 %1937 }
 0x214   : > { %v6165_v44 = vpop.permute.xlu0 %1913 }
 0x215   : > { %4619 = vmatmul.mubr.msk.bf16.gmra.mrb[24].mxu1 %vm1502_vm8, %v4269_v37  ;;  %2471 = vrot.lane.b32.xlu1 %v2396_v11, %s4853_s21  ;;  %v1990_v11 = vsel %vm1287_vm7, %v1944_v12, %v7365_v8  ;;  %v7368_v12 = vld [vmem:[#allocation30_spill] sm:$0xff] }
 0x216   : > { %2439 = vrot.lane.b32.xlu0 %v6151_v25, %s4854_s24  ;;  %v6225_v0 = vsel %vm5076_vm6, %v7368_v12, 0 }
 0x217   : > { %v2585_v7 = vpop.permute.xlu1 %2584  ;;  %7369 = vst [vmem:[#allocation28_spill] sm:$0xff] %v6225_v0 }
 0x218   : > { %v6171_v3 = vpop.permute.xlu0 %2558 }
 0x219   : > { %3104 = vrot.lane.b32.xlu1 %v6176_v61, %s4854_s24 }
 0x21a   : > { %1939 = vrot.lane.b32.xlu0 %v7356_v51, %s4853_s21 }
 0x21b   : > { %v6182_v23 = vpop.permute.xlu1 %2417 }
 0x21c   : > { %v1204_v30 = vpop.permute.xlu0 %1203 }
 0x21d   : > { %v1280_v35 = vsel %vm530_vm1, %v7364_v53, %v1204_v30  ;;  %3108 = vrot.lane.b32.xlu1 %v6194_v52, %s4854_s24  ;;  %v4271_v30 = vcombine.low %v1317_v2, %v1318_v24  ;;  %v1953_v2 = vsel %vm530_vm1, %v7373_v15, %v7372_v49  ;;  %v7382_v49 = vld [vmem:[#allocation73_spill] sm:$0xff]  ;;  %v7383_v15 = vld [vmem:[#allocation20_spill] sm:$0xff] }
 0x21e   : > { %v1315_v37 = vsel %vm1287_vm7, %v1280_v35, %v6011_v14  ;;  %1941 = vrot.lane.b32.xlu0 %v7366_v5, %s4853_s21  ;;  %v4285_v14 = vcombine.low %v1990_v11, %v1992_v29  ;;  %v7374_v35 = vld [vmem:[#allocation31_spill] sm:$0xff]  ;;  %v7376_v11 = vld [vmem:[#allocation72_spill] sm:$0xff] }
 0x21f   : > { %v4270_v17 = vcombine.low %v1313_v19, %v1315_v37  ;;  %v6216_v6 = vpop.permute.xlu1 %2564  ;;  %v6245_v8 = vsel %vm5076_vm6, %v7374_v35, 0  ;;  %v1996_v19 = vsel %vm1287_vm7, %v1953_v2, %v7376_v11  ;;  %v2613_v37 = vsel %vm530_vm1, 0, %v6089_v22  ;;  %v7377_v5 = vld [vmem:[#allocation23_spill] sm:$0xff]  ;;  %v7381_v22 = vld [vmem:[#allocation62_spill] sm:$0xff] }
 0x220   : > { %v6220_v13 = vpop.permute.xlu0 %1909  ;;  %7375 = vst [vmem:[#allocation60_spill] sm:$0xff] %v6245_v8  ;;  %v1956_v2 = vsel %vm530_vm1, %v7383_v15, %v7382_v49  ;;  %v7392_v49 = vld [vmem:[#allocation36_spill] sm:$0xff] }
 0x221   : > { %4622 = vmatprep.mubr.msk.bf16.mxu1 %vm1502_vm8, %v4270_v17  ;;  %3136 = vrot.lane.b32.xlu1 %v6225_v0, %s4853_s21  ;;  %v7378_v17 = vld [vmem:[#allocation53_spill] sm:$0xff]  ;;  %v6306_v15 = vsel %vm5076_vm6, %v7392_v49, 0 }
 0x222   : > { %3106 = vrot.lane.b32.xlu0 %v6225_v0, %s4854_s24  ;;  %4623 = vmatmul.mubr.msk.bf16.gmra.mrb[28].mxu1 %vm1502_vm8, %v4271_v30  ;;  %v1950_v29 = vsel %vm530_vm1, %v7379_v34, %v7378_v17  ;;  %v7380_v30 = vld [vmem:[#allocation67_spill] sm:$0xff]  ;;  %7393 = vst [vmem:[#allocation59_spill] sm:$0xff] %v6306_v15 }
 0x223   : > { %4630 = vmatprep.mubr.msk.bf16.mxu1 %vm1502_vm8, %v4285_v14  ;;  %v6237_v31 = vpop.permute.xlu1 %2413  ;;  %v2000_v12 = vsel %vm1287_vm7, %v1959_v4, %v7380_v30  ;;  %v2645_v14 = vsel %vm1287_vm7, %v2613_v37, %v2585_v7  ;;  %v1994_v60 = vsel %vm1287_vm7, %v1950_v29, %v7381_v22  ;;  %v7384_v4 = vld [vmem:[#allocation76_spill] sm:$0xff]  ;;  %v7389_v30 = vld [vmem:[#allocation41_spill] sm:$0xff] }
 0x224   : > { %v2555_v53 = vpop.permute.xlu0 %2554  ;;  %v4286_v11 = vcombine.low %v1994_v60, %v1996_v19  ;;  %v1998_v7 = vsel %vm1287_vm7, %v1956_v2, %v7384_v4  ;;  %v7387_v19 = vld [vmem:[#allocation50_spill] sm:$0xff]  ;;  %v1967_v4 = vsel %vm530_vm1, 0, %v5853_v33 }
 0x225   : > { %v2615_v24 = vsel %vm530_vm1, %v7377_v5, %v2555_v53  ;;  %3140 = vrot.lane.b32.xlu1 %v6245_v8, %s4853_s21  ;;  %v4287_v17 = vcombine.low %v1998_v7, %v2000_v12  ;;  %v1970_v34 = vsel %vm530_vm1, %v7387_v19, %v5963_v45  ;;  %v7394_v45 = vld [vmem:[#allocation78_spill] sm:$0xff]  ;;  %v2005_v19 = vsel %vm1287_vm7, %v1967_v4, %v5934_v9  ;;  %v4825_v9 = vld [vmem:[%s7139_s9 + $0x8] ss:$0 sps:$4 sm:$0xff]  }
 0x226   : > { %v2647_v57 = vsel %vm1287_vm7, %v2615_v24, %v6034_v20  ;;  %3110 = vrot.lane.b32.xlu0 %v6245_v8, %s4854_s24  ;;  %v7385_v20 = vld [vmem:[#allocation35_spill] sm:$0xff]  ;;  %v3735_v24 = vsel %vm555_vm0, %v6127_v26, 0  ;;  %v7388_v26 = vld [vmem:[#allocation70_spill] sm:$0xff] }
 0x227   : > { %v4309_v53 = vcombine.low %v2645_v14, %v2647_v57  ;;  %v6270_v35 = vpop.permute.xlu1 %2560  ;;  %v6279_v5 = vsel %vm5076_vm6, %v7385_v20, 0  ;;  %v1962_v12 = vsel %vm530_vm1, %v7389_v30, %v7388_v26  ;;  %v7390_v14 = vld [vmem:[#allocation77_spill] sm:$0xff]  ;;  %v7391_v57 = vld [vmem:[#allocation27_spill] sm:$0xff]  ;;  %v7398_v33 = vld [vmem:[#allocation22_spill] sm:$0xff] }
 0x228   : > { %v6274_v37 = vpop.permute.xlu0 %2447  ;;  %7386 = vst [vmem:[#allocation58_spill] sm:$0xff] %v6279_v5  ;;  %v1965_v22 = vsel %vm530_vm1, %v7391_v57, %v7390_v14  ;;  %v2002_v2 = vsel %vm1287_vm7, %v1962_v12, %v7394_v45  ;;  %v7395_v20 = vld [vmem:[#allocation37_spill] sm:$0xff]  ;;  %v2619_v30 = vsel %vm530_vm1, %v7398_v33, %v6171_v3  ;;  %v7400_v3 = vld [vmem:[#allocation46_spill] sm:$0xff]  ;;  %v2925_v33 = vsel %vm555_vm0, %v4825_v9, 0 }
 0x229   : > { %4650 = vmatprep.mubr.msk.bf16.mxu0 %vm1502_vm8, %v4309_v53  ;;  %3112 = vrot.lane.b32.xlu1 %v6279_v5, %s4854_s24  ;;  %v2007_v53 = vsel %vm1287_vm7, %v1970_v34, %v5871_v32  ;;  %v7397_v34 = vld [vmem:[#allocation25_spill] sm:$0xff] }
 0x22a   : > { %3138 = vrot.lane.b32.xlu0 %v6194_v52, %s4853_s21  ;;  %4631 = vmatmul.mubr.msk.bf16.vlgmr.msra.gmra.mrb[16].mxu1 %vm1502_vm8, %v4286_v11  ;;  %v2003_v11 = vsel %vm1287_vm7, %v1965_v22, %v6081_v48  ;;  %v2617_v26 = vsel %vm530_vm1, %v7397_v34, %v6009_v43  ;;  %v4289_v14 = vcombine.low %v2005_v19, %v2007_v53  ;;  %v7404_v19 = vld [vmem:[#allocation80_spill] sm:$0xff] }
 0x22b   : > { %4634 = vmatprep.mubr.msk.bf16.mxu1 %vm1502_vm8, %v4287_v17  ;;  %v6293_v29 = vpop.permute.xlu1 %2449  ;;  %4707 = vmatpush3.bf16.msra.mxu1 %v3735_v24  ;;  %v6325_v24 = vsel %vm5076_vm6, %v7395_v20, 0  ;;  %v3042_v17 = vrot.slane %v2320_v1, 1  ;;  %v4288_v32 = vcombine.low %v2002_v2, %v2003_v11  ;;  %v2649_v57 = vsel %vm1287_vm7, %v2617_v26, %v6121_v10  ;;  %v7399_v10 = vld [vmem:[#allocation87_spill] sm:$0xff]  ;;  %v7401_v2 = vld [vmem:[#allocation38_spill] sm:$0xff]  ;;  %v7405_v34 = vld [vmem:[#allocation56_spill] sm:$0xff] }
 0x22c   : > { %v6301_v60 = vpop.permute.xlu0 %2594  ;;  %7396 = vst [vmem:[#allocation29_spill] sm:$0xff] %v6325_v24  ;;  %v1976_v49 = vsel %vm530_vm1, %v7400_v3, %v7399_v10  ;;  %v3079_v53 = vsel %vm5076_vm6, %v7401_v2, 0  ;;  %v7402_v11 = vshrl.u32 %v5902_v54, 16  ;;  %v1973_v26 = vsel %vm530_vm1, %v7405_v34, %v7404_v19  ;;  %v7408_v10 = vld [vmem:[#allocation49_spill] sm:$0xff]  ;;  %v7410_v2 = vld [vmem:[#allocation47_spill] sm:$0xff]  ;;  %v7413_v19 = vld [vmem:[#allocation48_spill] sm:$0xff] }
 0x22d   : > { %3116 = vrot.lane.b32.xlu1 %v6306_v15, %s4854_s24  ;;  %v2011_v20 = vsel %vm1287_vm7, %v1976_v49, %v6096_v38  ;;  %v6377_v38 = vld [vmem:[%s7139_s9 + $0x18] sm:$0xff]   ;;  %v6396_v3 = vsel %vm5076_vm6, %v7408_v10, 0  ;;  %v3048_v49 = vrot.slane %v2341_v50, 1  ;;  %v6414_v50 = vsel %vm5076_vm6, %v7413_v19, 0  ;;  %v7417_v10 = vld [vmem:[#allocation34_spill] sm:$0xff] }
 0x22e   : > { %3142 = vrot.lane.b32.xlu0 %v6279_v5, %s4853_s21  ;;  %v3043_v4 = vor.u32 %v3042_v17, %v7402_v11  ;;  %7409 = vst [vmem:[#allocation19_spill] sm:$0xff] %v6396_v3  ;;  %v7412_v11 = vld [vmem:[#allocation32_spill] sm:$0xff]  ;;  %7414 = vst [vmem:[#allocation63_spill] sm:$0xff] %v6414_v50 }
 0x22f   : > { %v6320_v7 = vpop.permute.xlu1 %2596  ;;  %v3049_v34 = vor.u32 %v3048_v49, %v2338_v55  ;;  %v2625_v55 = vsel %vm530_vm1, %v7417_v10, %v6216_v6 }
 0x230   : > { %v2591_v12 = vpop.permute.xlu0 %2590 }
 0x231   : > { %v2651_v22 = vsel %vm1287_vm7, %v2619_v30, %v2591_v12  ;;  %3144 = vrot.lane.b32.xlu1 %v6325_v24, %s4853_s21  ;;  %v7406_v30 = vld [vmem:[#allocation84_spill] sm:$0xff]  ;;  %v6445_v6 = vsel %vm5076_vm6, %v3049_v34, 0 }
 0x232   : > { %v4310_v1 = vcombine.low %v2649_v57, %v2651_v22  ;;  %3114 = vrot.lane.b32.xlu0 %v6325_v24, %s4854_s24  ;;  %4635 = vmatmul.mubr.msk.bf16.gmra.mrb[20].mxu1 %vm1502_vm8, %v4288_v32  ;;  %v7403_v32 = vld [vmem:[#allocation86_spill] sm:$0xff]  ;;  %v2009_v17 = vsel %vm1287_vm7, %v1973_v26, %v7406_v30  ;;  %v6381_v22 = vsel %vm5076_vm6, %v3043_v4, 0  ;;  %v3050_v26 = vrot.slane %v2348_v40, 1  ;;  %7418 = vst [vmem:[#allocation66_spill] sm:$0xff] %v6445_v6 }
 0x233   : > { %4638 = vmatprep.mubr.msk.bf16.mxu1 %vm1502_vm8, %v4289_v14  ;;  %v6349_v43 = vpop.permute.xlu1 %2445  ;;  %v4290_v14 = vcombine.low %v2009_v17, %v2011_v20  ;;  %7407 = vst [vmem:[#allocation65_spill] sm:$0xff] %v6381_v22 }
 0x234   : > { %v6354_v45 = vpop.permute.xlu0 %2419  ;;  %4651 = vmatmul.mubr.msk.bf16.vlgmr.msra.gmra.mrb[32].mxu0 %vm1502_vm8, %v4310_v1 }
 0x235   : > { %3148 = vrot.lane.b32.xlu1 %v3079_v53, %s4853_s21  ;;  %4667 = vmatpush3.bf16.msra.mxu0 %v7403_v32 }
 0x236   : > { %3118 = vrot.lane.b32.xlu0 %v3079_v53, %s4854_s24  ;;  %4795 = vmatprep.subr.msk.bf16.mxu0 %vm555_vm0, %v4825_v9  ;;  %v6405_v53 = vsel %vm5076_vm6, %v7410_v2, 0 }
 0x237   : > { %v2593_v12 = vpop.permute.xlu1 %2592  ;;  %7411 = vst [vmem:[#allocation51_spill] sm:$0xff] %v6405_v53 }
 0x238   : > { %v2567_v57 = vpop.permute.xlu0 %2566 }
 0x239   : > { %3122 = vrot.lane.b32.xlu1 %v6381_v22, %s4854_s24  ;;  %4669 = vmatpush3.bf16.msra.mxu0 %v2925_v33  ;;  %v2627_v4 = vsel %vm530_vm1, %v7412_v11, %v2567_v57  ;;  %v7415_v33 = vld [vmem:[#allocation24_spill] sm:$0xff] }
 0x23a   : > { %3146 = vrot.lane.b32.xlu0 %v6306_v15, %s4853_s21  ;;  %4639 = vmatmul.mubr.msk.bf16.gmra.mrb[24].mxu1 %vm1502_vm8, %v4290_v14  ;;  %v2621_v30 = vsel %vm530_vm1, %v7415_v33, %v6270_v35  ;;  %v2658_v17 = vsel %vm1287_vm7, %v2627_v4, %v5653_v39  ;;  %v7416_v14 = vld [vmem:[#allocation33_spill] sm:$0xff]  ;;  %v2657_v35 = vsel %vm1287_vm7, %v2625_v55, %v6320_v7 }
 0x23b   : > { %v6388_v1 = vpop.permute.xlu1 %2425  ;;  %4686 = vmatprep.subr.bf16.mxu0 %v6377_v38  ;;  %v2653_v49 = vsel %vm1287_vm7, %v2621_v30, %v2593_v12  ;;  %v4312_v4 = vcombine.low %v2657_v35, %v2658_v17  ;;  %v3051_v12 = vor.u32 %v3050_v26, %v2345_v41  ;;  %v7420_v30 = vld [vmem:[#allocation57_spill] sm:$0xff]  ;;  %v7423_v35 = vld [vmem:[#allocation43_spill] sm:$0xff] }
 0x23c   : > { %v6391_v9 = vpop.permute.xlu0 %2415  ;;  %v6481_v17 = vsel %vm5076_vm6, %v7420_v30, 0 }
 0x23d   : > { %3126 = vrot.lane.b32.xlu1 %v6396_v3, %s4854_s24  ;;  %v6459_v34 = vsel %vm5076_vm6, %v3051_v12, 0  ;;  %7421 = vst [vmem:[#allocation55_spill] sm:$0xff] %v6481_v17 }
 0x23e   : > { %3120 = vrot.lane.b32.xlu0 %v6405_v53, %s4854_s24  ;;  %7419 = vst [vmem:[#allocation69_spill] sm:$0xff] %v6459_v34 }
 0x23f   : > { %v2573_v20 = vpop.permute.xlu1 %2572 }
 0x240   : > { %v2563_v32 = vpop.permute.xlu0 %2562 }
 0x241   : > { %v2623_v57 = vsel %vm530_vm1, %v7416_v14, %v2563_v32  ;;  %3152 = vrot.lane.b32.xlu1 %v6414_v50, %s4853_s21 }
 0x242   : > { %v2655_v40 = vsel %vm1287_vm7, %v2623_v57, %v6301_v60  ;;  %3124 = vrot.lane.b32.xlu0 %v6414_v50, %s4854_s24  ;;  %v3054_v60 = vrot.slane %v2362_v59, 1 }
 0x243   : > { %v4311_v2 = vcombine.low %v2653_v49, %v2655_v40  ;;  %v6439_v11 = vpop.permute.xlu1 %2421 }
 0x244   : > { %v6441_v32 = vpop.permute.xlu0 %2455  ;;  %v3055_v41 = vor.u32 %v3054_v60, %v2359_v56 }
 0x245   : > { %3156 = vrot.lane.b32.xlu1 %v6445_v6, %s4853_s21  ;;  %4654 = vmatprep.mubr.msk.bf16.mxu0 %vm1502_vm8, %v4311_v2 }
 0x246   : > { %3150 = vrot.lane.b32.xlu0 %v6381_v22, %s4853_s21  ;;  %4655 = vmatmul.mubr.msk.bf16.gmra.mrb[36].mxu0 %vm1502_vm8, %v4312_v4  ;;  %v3087_v33 = vsel %vm5076_vm6, %v3055_v41, 0  ;;  %v4831_v22 = vld [vmem:[%s4957_s20 + $0x10] sm:$0xff] }
 0x247   : > { %v2569_v7 = vpop.permute.xlu1 %2568  ;;  %v3539_v0 = vrot.slane %v4831_v22, 1 }
 0x248   : > { %v2601_v19 = vpop.permute.xlu0 %2600  ;;  %v2629_v40 = vsel %vm530_vm1, 0, %v2569_v7 }
 0x249   : > { %3130 = vrot.lane.b32.xlu1 %v6459_v34, %s4854_s24 }
 0x24a   : > { %3154 = vrot.lane.b32.xlu0 %v6396_v3, %s4853_s21 }
 0x24b   : > { %v6467_v59 = vpop.permute.xlu1 %2457 }
 0x24c   : > { %v6469_v26 = vpop.permute.xlu0 %2451 }
 0x24d   : > { %3134 = vrot.lane.b32.xlu1 %v3087_v33, %s4854_s24 }
 0x24e   : > { %3128 = vrot.lane.b32.xlu0 %v6445_v6, %s4854_s24  ;;  %v6520_v6 = vld [vmem:[%s4957_s20 + $0x20] sm:$0xff] }
 0x24f   : > { %v2603_v47 = vpop.permute.xlu1 %2602 }
 0x250   : > { %v6476_v56 = vpop.permute.xlu0 %2427 }
 0x251   : > { %3160 = vrot.lane.b32.xlu1 %v6481_v17, %s4853_s21 }
 0x252   : > { %3132 = vrot.lane.b32.xlu0 %v6481_v17, %s4854_s24  ;;  %v4828_v17 = vld [vmem:[%s4957_s20] sm:$0xff]  ;;  %s7029_s24 = scalar_lea.vmem %s7143_s13, %s4386_s17 }
 0x253   : > { %v6487_v14 = vpop.permute.xlu1 %2453  ;;  %v3488_v3 = vrot.slane %v4828_v17, 7 }
 0x254   : > { %v2575_v57 = vpop.permute.xlu0 %2574 }
 0x256   : > { %3158 = vrot.lane.b32.xlu0 %v6459_v34, %s4853_s21 }
 0x257   : > { %v2599_v10 = vpop.permute.xlu1 %2598 }
 0x258   : > { %v6491_v55 = vpop.permute.xlu0 %2423  ;;  %v2660_v4 = vsel %vm1287_vm7, %v2629_v40, %v2599_v10 }
 0x25a   : > { %3162 = vrot.lane.b32.xlu0 %v3087_v33, %s4853_s21 }
 0x25b   : > { %v6494_v16 = vpop.permute.xlu1 %2433 }
 0x25c   : > { %7422 = vst [vmem:[#allocation30_spill] sm:$0xff] %v6494_v16  ;;  %v2571_v49 = vpop.permute.xlu0 %2570 }
 0x25d   : > { %v2631_v2 = vsel %vm530_vm1, %v7423_v35, %v2571_v49  ;;  %v2633_v49 = vsel %vm530_vm1, %v5902_v54, %v2573_v20  ;;  %v7424_v35 = vld [vmem:[#allocation42_spill] sm:$0xff]  ;;  %v4829_v54 = vld [vmem:[%s4957_s20 + $0x8] sm:$0xff] }
 0x25e   : > { %v2662_v12 = vsel %vm1287_vm7, %v2631_v2, %v2601_v19  ;;  %v2635_v19 = vsel %vm530_vm1, %v7424_v35, %v2575_v57  ;;  %v2664_v40 = vsel %vm1287_vm7, %v2633_v49, %v2603_v47  ;;  %v3489_v20 = vrot.slane %v4829_v54, 7  ;;  %v4832_v49 = vld [vmem:[%s4957_s20 + $0x18] sm:$0xff] }
 0x25f   : > { %v4313_v60 = vcombine.low %v2660_v4, %v2662_v12  ;;  %v2581_v41 = vpop.permute.xlu1 %2580  ;;  %v3492_v57 = vrot.slane %v6520_v6, 7  ;;  %v3490_v47 = vrot.slane %v4831_v22, 7  ;;  %v3540_v52 = vrot.slane %v4832_v49, 1 }
 0x260   : > { %v6501_v30 = vpop.permute.xlu0 %2461  ;;  %v3522_v50 = vsel %vm1142_vm2, %v4829_v54, %v3489_v20  ;;  %v3541_v20 = vrot.slane %v6520_v6, 1 }
 0x261   : > { %4658 = vmatprep.mubr.msk.bf16.mxu0 %vm1502_vm8, %v4313_v60  ;;  %v3525_v53 = vsel %vm1142_vm2, %v6520_v6, %v3492_v57  ;;  %v3523_v5 = vsel %vm1142_vm2, %v4831_v22, %v3490_v47  ;;  %v3587_v42 = vmax.f32 %v3522_v50, %v4829_v54  ;;  %v7426_v47 = vld [vmem:[#allocation74_spill] sm:$0xff] }
 0x262   : > { %v3590_v63 = vmax.f32 %v3525_v53, %v6520_v6  ;;  %v3588_v18 = vmax.f32 %v3523_v5, %v4831_v22 }
 0x263   : > { %v6504_v33 = vpop.permute.xlu1 %2429 }
 0x264   : > { %v2609_v34 = vpop.permute.xlu0 %2608 }
 0x267   : > { %v2577_v7 = vpop.permute.xlu1 %2576 }
 0x268   : > { %v2605_v10 = vpop.permute.xlu0 %2604 }
 0x269   : > { %v2666_v2 = vsel %vm1287_vm7, %v2635_v19, %v2605_v10  ;;  %v3491_v19 = vrot.slane %v4832_v49, 7 }
 0x26a   : > { %v4314_v4 = vcombine.low %v2664_v40, %v2666_v2  ;;  %v3521_v40 = vsel %vm1142_vm2, %v4828_v17, %v3488_v3  ;;  %v3537_v2 = vrot.slane %v4828_v17, 1 }
 0x26b   : > { %v6512_v12 = vpop.permute.xlu1 %2463  ;;  %v3524_v15 = vsel %vm1142_vm2, %v4832_v49, %v3491_v19  ;;  %v3586_v61 = vmax.f32 %v3521_v40, %v4828_v17  ;;  %v3572_v40 = vsel %vm3569_vm9, %v3539_v0, %v4831_v22  ;;  %v2641_v0 = vsel %vm530_vm1, %v6028_v21, %v2581_v41 }
 0x26c   : > { %7425 = vst [vmem:[#allocation82_spill] sm:$0xff] %v6512_v12  ;;  %v6514_v60 = vpop.permute.xlu0 %2435  ;;  %4659 = vmatmul.mubr.msk.bf16.gmra.mrb[40].mxu0 %vm1502_vm8, %v4314_v4  ;;  %v3538_v4 = vrot.slane %v4829_v54, 1  ;;  %v3570_v3 = vsel %vm3569_vm9, %v3537_v2, %v4828_v17  ;;  %v2477_v12 = vsel %vm530_vm1, %v7426_v47, %v6391_v9  ;;  %v3589_v16 = vmax.f32 %v3524_v15, %v4832_v49 }
 0x26d   : > { %v2474_v17 = vsel %vm530_vm1, 0, %v6237_v31  ;;  %v3573_v2 = vsel %vm3569_vm9, %v3540_v52, %v4832_v49  ;;  %v2522_v15 = vsel %vm1287_vm7, %v2477_v12, %v6274_v37  ;;  %v3574_v21 = vsel %vm3569_vm9, %v3541_v20, %v6520_v6 }
 0x26e   : > { %v3571_v57 = vsel %vm3569_vm9, %v3538_v4, %v4829_v54  ;;  %v4834_v4 = vld [vmem:[%s4957_s20 + $0x30] sm:$0xff] }
 0x26f   : > { %v2611_v35 = vpop.permute.xlu1 %2610  ;;  %v3603_v5 = vmax.f32 %v3587_v42, %v3571_v57  ;;  %v2520_v42 = vsel %vm1287_vm7, %v2474_v17, %v6349_v43  ;;  %v7429_v43 = vld [vmem:[#allocation52_spill] sm:$0xff] }
 0x270   : > { %v2583_v10 = vpop.permute.xlu0 %2582  ;;  %v2672_v31 = vsel %vm1287_vm7, %v2641_v0, %v2611_v35  ;;  %v4327_v41 = vcombine.low %v2520_v42, %v2522_v15  ;;  %v1979_v49 = vsel %vm530_vm1, %v7429_v43, %v6059_v28  ;;  %v6597_v28 = vmax.f32 %v3590_v63, %v3574_v21  ;;  %v7433_v15 = vld [vmem:[#allocation75_spill] sm:$0xff] }
 0x271   : > { %v2643_v25 = vsel %vm530_vm1, %v5508_v62, %v2583_v10  ;;  %v3602_v62 = vmax.f32 %v3586_v61, %v3570_v3  ;;  %v7427_v10 = vld [vmem:[#allocation45_spill] sm:$0xff]  ;;  %v6601_v47 = vsel %vm1287_vm7, %v1979_v49, %v6163_v36  ;;  %v2486_v0 = vsel %vm530_vm1, %v7433_v15, %v6439_v11  ;;  %v4837_v43 = vld [vmem:[%s4957_s20 + $0x48] sm:$0xff] }
 0x272   : > { %v2637_v54 = vsel %vm530_vm1, %v7427_v10, %v2577_v7  ;;  %v2673_v53 = vsel %vm1287_vm7, %v2643_v25, %v5653_v39  ;;  %v6563_v39 = vmax.f32 %v3588_v18, %v3572_v40  ;;  %v4833_v18 = vld [vmem:[%s4957_s20 + $0x28] sm:$0xff]  ;;  %v6619_v10 = vld [vmem:[%s4957_s20 + $0x38] sm:$0xff]  ;;  %v3497_v49 = vrot.slane %v4837_v43, 7 }
 0x273   : > { %v6529_v24 = vpop.permute.xlu1 %2459  ;;  %v4316_v25 = vcombine.low %v2672_v31, %v2673_v53  ;;  %v3493_v12 = vrot.slane %v4833_v18, 7  ;;  %v3618_v6 = vmax.f32 %v3602_v62, %v3603_v5  ;;  %v3542_v40 = vrot.slane %v4833_v18, 1  ;;  %v4827_v53 = vld [vmem:[%s7139_s9 + $0x20] ss:$0 sps:$4 sm:$0xff]  }
 0x274   : > { %v6532_v8 = vpop.permute.xlu0 %2431 }
 0x275   : > { %v3526_v36 = vsel %vm1142_vm2, %v4833_v18, %v3493_v12  ;;  %v7434_v12 = vld [vmem:[#allocation81_spill] sm:$0xff] }
 0x276   : > { %v3591_v42 = vmax.f32 %v3526_v36, %v4833_v18 }
 0x277   : > { %v2607_v19 = vpop.permute.xlu1 %2606 }
 0x278   : > { %v2579_v50 = vpop.permute.xlu0 %2578  ;;  %v2668_v52 = vsel %vm1287_vm7, %v2637_v54, %v2607_v19  ;;  %v7431_v19 = vld [vmem:[#allocation71_spill] sm:$0xff] }
 0x279   : > { %v2639_v9 = vsel %vm530_vm1, %v5957_v27, %v2579_v50  ;;  %v6565_v27 = vmax.f32 %v3589_v16, %v3573_v2  ;;  %v7428_v16 = vld [vmem:[#allocation68_spill] sm:$0xff]  ;;  %v2483_v17 = vsel %vm530_vm1, %v7431_v19, %v6354_v45  ;;  %v7432_v2 = vld [vmem:[#allocation79_spill] sm:$0xff]  ;;  %v3495_v45 = vrot.slane %v6619_v10, 7 }
 0x27a   : > { %v2670_v61 = vsel %vm1287_vm7, %v2639_v9, %v2609_v34  ;;  %v1988_v34 = vsel %vm530_vm1, %v7356_v51, %v6165_v44  ;;  %v6581_v35 = vsel %vm530_vm1, %v7428_v16, %v5983_v46  ;;  %v3494_v44 = vrot.slane %v4834_v4, 7  ;;  %v7430_v51 = vld [vmem:[#allocation83_spill] sm:$0xff] }
 0x27b   : > { %v4315_v22 = vcombine.low %v2668_v52, %v2670_v61  ;;  %v6561_v7 = vpop.permute.xlu1 %2441  ;;  %v2489_v3 = vsel %vm530_vm1, %v7430_v51, %v6491_v55  ;;  %v3619_v46 = vmax.f32 %v3603_v5, %v6563_v39  ;;  %v3620_v57 = vmax.f32 %v6563_v39, %v6565_v27 }
 0x27c   : > { %v6569_v37 = vpop.permute.xlu0 %2469  ;;  %v6610_v50 = vsel %vm1287_vm7, %v1988_v34, %v6081_v48  ;;  %v2480_v63 = vsel %vm530_vm1, %v7432_v2, %v6182_v23  ;;  %v2526_v62 = vsel %vm1287_vm7, %v2483_v17, %v6469_v26  ;;  %v2530_v54 = vsel %vm1287_vm7, %v2489_v3, %v6441_v32  ;;  %v6650_v34 = vld [vmem:[%s4957_s20 + $0x40] sm:$0xff]  ;;  %v7436_v3 = vld [vmem:[#allocation89_spill] sm:$0xff] }
 0x27d   : > { %4662 = vmatprep.mubr.msk.bf16.mxu0 %vm1502_vm8, %v4315_v22  ;;  %v3632_v9 = vmax.f32 %v3618_v6, %v6563_v39  ;;  %v3527_v23 = vsel %vm1142_vm2, %v4834_v4, %v3494_v44  ;;  %v3543_v5 = vrot.slane %v4834_v4, 1  ;;  %v2524_v26 = vsel %vm1287_vm7, %v2480_v63, %v6293_v29  ;;  %v7435_v44 = vld [vmem:[#allocation64_spill] sm:$0xff]  ;;  %v7437_v2 = vld [vmem:[#allocation85_spill] sm:$0xff] }
 0x27e   : > { %4663 = vmatmul.mubr.msk.bf16.gmra.mrb[44].mxu0 %vm1502_vm8, %v4316_v25  ;;  %v6637_v32 = vmax.f32 %v3619_v46, %v6565_v27  ;;  %v6640_v61 = vmax.f32 %v3620_v57, %v6597_v28  ;;  %v4328_v31 = vcombine.low %v2524_v26, %v2526_v62  ;;  %v2528_v22 = vsel %vm1287_vm7, %v2486_v0, %v6487_v14 }
 0x27f   : > { %v6591_v20 = vpop.permute.xlu1 %2437  ;;  %4670 = vmatprep.mubr.msk.bf16.mxu0 %vm1502_vm8, %v4327_v41  ;;  %v3575_v29 = vsel %vm3569_vm9, %v3542_v40, %v4833_v18  ;;  %v4329_v25 = vcombine.low %v2528_v22, %v2530_v54  ;;  %v3592_v11 = vmax.f32 %v3527_v23, %v4834_v4  ;;  %v3528_v21 = vsel %vm1142_vm2, %v6619_v10, %v3495_v45  ;;  %v6680_v40 = vld [vmem:[%s4957_s20 + $0x50] sm:$0xff] }
 0x280   : > { %v6606_v55 = vpop.permute.xlu0 %2465  ;;  %v3496_v41 = vrot.slane %v6650_v34, 7  ;;  %v2495_v16 = vsel %vm530_vm1, %v7434_v12, %v6476_v56  ;;  %v3318_v14 = vsel %vm555_vm0, %v4827_v53, 0  ;;  %v3576_v18 = vsel %vm3569_vm9, %v3543_v5, %v4834_v4 }
 0x281   : > { %v1982_v51 = vsel %vm530_vm1, %v7435_v44, %v6220_v13  ;;  %v2500_v46 = vsel %vm530_vm1, %v7436_v3, %v6532_v8  ;;  %v6670_v57 = vpack.c.bf16 %v3632_v9, %v3618_v6  ;;  %v3544_v4 = vrot.slane %v6619_v10, 1 }
 0x282   : > { %v4429_v13 = vpack.c.bf16 %v6640_v61, %v6637_v32  ;;  %v6676_v17 = vmax.f32 %v3591_v42, %v3575_v29  ;;  %v3593_v8 = vmax.f32 %v3528_v21, %v6619_v10  ;;  %v2492_v6 = vsel %vm530_vm1, %v7437_v2, %v6388_v1  ;;  %v7441_v2 = vld [vmem:[#allocation82_spill] sm:$0xff] }
 0x283   : > { %v6634_v52 = vpop.permute.xlu1 %2467  ;;  %v2533_v63 = vsel %vm1287_vm7, %v2495_v16, %v6081_v48  ;;  %v6688_v62 = vmax.f32 %v3592_v11, %v3576_v18  ;;  %v3529_v36 = vsel %vm1142_vm2, %v6650_v34, %v3496_v41  ;;  %v2537_v45 = vsel %vm1287_vm7, %v2500_v46, %v6501_v30  ;;  %v7438_v16 = vld [vmem:[#allocation88_spill] sm:$0xff] }
 0x284   : > { %v6644_v39 = vpop.permute.xlu0 %2443  ;;  %v3530_v54 = vsel %vm1142_vm2, %v4837_v43, %v3497_v49  ;;  %v3546_v9 = vrot.slane %v4837_v43, 1  ;;  %v2532_v23 = vsel %vm1287_vm7, %v2492_v6, %v6467_v59  ;;  %v2497_v1 = vsel %vm530_vm1, 0, %v6504_v33 }
 0x285   : > { %v3621_v26 = vmax.f32 %v6565_v27, %v6597_v28  ;;  %v3577_v30 = vsel %vm3569_vm9, %v3544_v4, %v6619_v10  ;;  %v4330_v15 = vcombine.low %v2532_v23, %v2533_v63  ;;  %v2535_v0 = vsel %vm1287_vm7, %v2497_v1, %v6529_v24  ;;  %v7440_v4 = vld [vmem:[#allocation91_spill] sm:$0xff]  ;;  %v6762_v23 = vld [vmem:[%s4957_s20 + $0x70] sm:$0xff] }
 0x286   : > { %4671 = vmatmul.mubr.msk.bf16.vlgmr.msra.gmra.mrb[32].mxu0 %vm1502_vm8, %v4328_v31  ;;  %v3547_v22 = vrot.slane %v6680_v40, 1  ;;  %v4331_v33 = vcombine.low %v2535_v0, %v2537_v45  ;;  %v3594_v42 = vmax.f32 %v3529_v36, %v6650_v34  ;;  %v3622_v24 = vmax.f32 %v6597_v28, %v6676_v17  ;;  %v4841_v36 = vld [vmem:[%s4957_s20 + $0x60] sm:$0xff] }
 0x287   : > { %4687 = vmatpush3.bf16.msra.mxu0 %v6377_v38  ;;  %v6667_v56 = vpop.permute.xlu1 %2471  ;;  %4674 = vmatprep.mubr.msk.bf16.mxu0 %vm1502_vm8, %v4329_v25  ;;  %v3498_v38 = vrot.slane %v6680_v40, 7  ;;  %v3595_v25 = vmax.f32 %v3530_v54, %v4837_v43  ;;  %v3579_v11 = vsel %vm3569_vm9, %v3546_v9, %v4837_v43  ;;  %v3609_v12 = vmax.f32 %v3593_v8, %v3577_v30  ;;  %v4839_v43 = vld [vmem:[%s4957_s20 + $0x58] sm:$0xff] }
 0x288   : > { %v2440_v19 = vpop.permute.xlu0 %2439  ;;  %4796 = vmatprep.subr.msk.bf16.mxu0 %vm555_vm0, %v4827_v53  ;;  %v3545_v53 = vrot.slane %v6650_v34, 1  ;;  %v3623_v28 = vmax.f32 %v6676_v17, %v6688_v62  ;;  %v3499_v49 = vrot.slane %v4839_v43, 7  ;;  %v3500_v45 = vrot.slane %v4841_v36, 7 }
 0x289   : > { %v3531_v59 = vsel %vm1142_vm2, %v6680_v40, %v3498_v38  ;;  %v2512_v21 = vsel %vm530_vm1, %v6131_v58, %v2440_v19  ;;  %v3580_v58 = vsel %vm3569_vm9, %v3547_v22, %v6680_v40  ;;  %v6742_v46 = vmax.f32 %v3595_v25, %v3579_v11 }
 0x28a   : > { %v3578_v10 = vsel %vm3569_vm9, %v3545_v53, %v6650_v34  ;;  %v2506_v34 = vsel %vm530_vm1, %v7438_v16, %v6514_v60  ;;  %v3596_v18 = vmax.f32 %v3531_v59, %v6680_v40  ;;  %v7439_v60 = vld [vmem:[#allocation30_spill] sm:$0xff]  ;;  %v4840_v40 = vld [vmem:[%s4957_s20 + $0x68] sm:$0xff]  ;;  %v3548_v54 = vrot.slane %v4839_v43, 1 }
 0x28b   : > { %v6700_v5 = vpop.permute.xlu1 %3104  ;;  %4689 = vmatpush3.bf16.msra.mxu0 %v3318_v14  ;;  %v2541_v44 = vsel %vm1287_vm7, %v2506_v34, %v6606_v55  ;;  %v3610_v3 = vmax.f32 %v3594_v42, %v3578_v10  ;;  %v2503_v19 = vsel %vm530_vm1, %v7440_v4, %v7439_v60  ;;  %v3501_v38 = vrot.slane %v4840_v40, 7  ;;  %v7443_v42 = vld [vmem:[#allocation26_spill] sm:$0xff] }
 0x28c   : > { %v1940_v31 = vpop.permute.xlu0 %1939  ;;  %v2539_v55 = vsel %vm1287_vm7, %v2503_v19, %v7441_v2  ;;  %v3502_v1 = vrot.slane %v6762_v23, 7  ;;  %v3624_v30 = vmax.f32 %v6688_v62, %v3609_v12  ;;  %v3549_v0 = vrot.slane %v4841_v36, 1 }
 0x28d   : > { %v2015_v29 = vsel %vm1287_vm7, %v1982_v51, %v1940_v31  ;;  %v4332_v53 = vcombine.low %v2539_v55, %v2541_v44  ;;  %v3534_v31 = vsel %vm1142_vm2, %v4840_v40, %v3501_v38  ;;  %v3550_v59 = vrot.slane %v4840_v40, 1 }
 0x28e   : > { %v4291_v27 = vcombine.low %v6601_v47, %v2015_v29  ;;  %4675 = vmatmul.mubr.msk.bf16.gmra.mrb[36].mxu0 %vm1502_vm8, %v4330_v15  ;;  %v6726_v47 = vmax.f32 %v3621_v26, %v6676_v17  ;;  %v2545_v17 = vsel %vm1287_vm7, %v2512_v21, %v6569_v37  ;;  %v6769_v15 = vmax.f32 %v3623_v28, %v3609_v12  ;;  %v4843_v21 = vld [vmem:[%s4957_s20 + $0x78] sm:$0xff] }
 0x28f   : > { %v6722_v41 = vpop.permute.xlu1 %3108  ;;  %4678 = vmatprep.mubr.msk.bf16.mxu0 %vm1502_vm8, %v4331_v33  ;;  %v3533_v33 = vsel %vm1142_vm2, %v4841_v36, %v3500_v45  ;;  %v2515_v25 = vsel %vm530_vm1, %v7443_v42, %v6561_v7  ;;  %v3535_v11 = vsel %vm1142_vm2, %v6762_v23, %v3502_v1  ;;  %v3503_v28 = vrot.slane %v4843_v21, 7 }
 0x290   : > { %v1942_v14 = vpop.permute.xlu0 %1941  ;;  %4642 = vmatprep.mubr.msk.bf16.mxu1 %vm1502_vm8, %v4291_v27  ;;  %v7444_v27 = vld [vmem:[#allocation40_spill] sm:$0xff]  ;;  %v2547_v16 = vsel %vm1287_vm7, %v2515_v25, %v6667_v56  ;;  %v3598_v7 = vmax.f32 %v3533_v33, %v4841_v36  ;;  %v3600_v56 = vmax.f32 %v3535_v11, %v6762_v23  ;;  %v3552_v2 = vrot.slane %v4843_v21, 1 }
 0x291   : > { %v2017_v51 = vsel %vm1287_vm7, %v6581_v35, %v1942_v14  ;;  %v7442_v35 = vld [vmem:[#allocation90_spill] sm:$0xff]  ;;  %v3638_v14 = vmax.f32 %v3624_v30, %v3609_v12  ;;  %v7445_v12 = vld [vmem:[#allocation44_spill] sm:$0xff] }
 0x292   : > { %v4292_v8 = vcombine.low %v2017_v51, %v6610_v50  ;;  %v2509_v6 = vsel %vm530_vm1, %v7442_v35, %v6591_v20  ;;  %v3532_v50 = vsel %vm1142_vm2, %v4839_v43, %v3499_v49  ;;  %v3636_v20 = vmax.f32 %v3622_v24, %v6688_v62 }
 0x293   : > { %v3137_v63 = vpop.permute.xlu1 %3136  ;;  %v2543_v9 = vsel %vm1287_vm7, %v2509_v6, %v6634_v52  ;;  %v6772_v52 = vmax.f32 %v3596_v18, %v3580_v58  ;;  %v3581_v62 = vsel %vm3569_vm9, %v3548_v54, %v4839_v43  ;;  %v3597_v29 = vmax.f32 %v3532_v50, %v4839_v43 }
 0x294   : > { %v3107_v37 = vpop.permute.xlu0 %3106  ;;  %4643 = vmatmul.mubr.msk.bf16.gmra.mrb[28].mxu1 %vm1502_vm8, %v4292_v8  ;;  %v4333_v26 = vcombine.low %v2543_v9, %v2545_v17  ;;  %v2518_v24 = vsel %vm530_vm1, %v7444_v27, %v6644_v39  ;;  %v4430_v34 = vpack.c.bf16 %v3636_v20, %v6726_v47  ;;  %v3599_v58 = vmax.f32 %v3534_v31, %v4840_v40 }
 0x295   : > { %4708 = vmatprep.mubr.msk.bf16.mxu1 %vm530_vm1, %v6670_v57  ;;  %v3625_v57 = vmax.f32 %v3610_v3, %v6742_v46  ;;  %v3582_v18 = vsel %vm3569_vm9, %v3549_v0, %v4841_v36  ;;  %v3551_v43 = vrot.slane %v6762_v23, 1  ;;  %v3583_v39 = vsel %vm3569_vm9, %v3550_v59, %v4840_v40 }
 0x296   : > { %4679 = vmatmul.mubr.msk.bf16.gmra.mrb[40].mxu0 %vm1502_vm8, %v4332_v53  ;;  %v2548_v49 = vsel %vm1287_vm7, %v2518_v24, %v6081_v48  ;;  %v3613_v3 = vmax.f32 %v3597_v29, %v3581_v62  ;;  %v3165_v47 = vsel %vm530_vm1, 0, %v6700_v5  ;;  %v3168_v4 = vsel %vm530_vm1, %v7445_v12, %v3107_v37 }
 0x297   : > { %v3141_v22 = vpop.permute.xlu1 %3140  ;;  %4682 = vmatprep.mubr.msk.bf16.mxu0 %vm1502_vm8, %v4333_v26  ;;  %v3639_v51 = vmax.f32 %v3625_v57, %v6772_v52  ;;  %v4334_v60 = vcombine.low %v2547_v16, %v2548_v49  ;;  %v3536_v17 = vsel %vm1142_vm2, %v4843_v21, %v3503_v28  ;;  %v3211_v8 = vsel %vm1287_vm7, %v3165_v47, %v3137_v63  ;;  %v7446_v63 = vld [vmem:[#allocation54_spill] sm:$0xff]  ;;  %v7447_v26 = vld [vmem:[#allocation28_spill] sm:$0xff] }
 0x298   : > { %v3111_v10 = vpop.permute.xlu0 %3110  ;;  %v3615_v38 = vmax.f32 %v3599_v58, %v3583_v39  ;;  %v3614_v55 = vmax.f32 %v3598_v7, %v3582_v18  ;;  %v3584_v35 = vsel %vm3569_vm9, %v3551_v43, %v6762_v23  ;;  %v4431_v61 = vpack.c.bf16 %v3638_v14, %v6769_v15  ;;  %v7450_v16 = vld [vmem:[#allocation58_spill] sm:$0xff]  ;;  %v7451_v7 = vld [vmem:[#allocation29_spill] sm:$0xff] }
 0x299   : > { %v3626_v6 = vmax.f32 %v6742_v46, %v6772_v52  ;;  %v3174_v36 = vsel %vm530_vm1, %v7446_v63, %v3111_v10  ;;  %v3627_v54 = vmax.f32 %v6772_v52, %v3613_v3  ;;  %v3601_v9 = vmax.f32 %v3536_v17, %v4843_v21  ;;  %v7452_v17 = vld [vmem:[#allocation51_spill] sm:$0xff] }
 0x29a   : > { %v3628_v53 = vmax.f32 %v3613_v3, %v3614_v55  ;;  %v3616_v50 = vmax.f32 %v3600_v56, %v3584_v35  ;;  %v3629_v23 = vmax.f32 %v3614_v55, %v3615_v38  ;;  %v3585_v1 = vsel %vm3569_vm9, %v3552_v2, %v4843_v21  ;;  %v7449_v21 = vld [vmem:[#allocation60_spill] sm:$0xff] }
 0x29b   : > { %v3113_v44 = vpop.permute.xlu1 %3112  ;;  %v3171_v46 = vsel %vm530_vm1, %v7447_v26, %v6722_v41  ;;  %v3640_v52 = vmax.f32 %v3626_v6, %v3613_v3  ;;  %v3641_v31 = vmax.f32 %v3627_v54, %v3614_v55  ;;  %v3617_v59 = vmax.f32 %v3601_v9, %v3585_v1  ;;  %v7456_v26 = vld [vmem:[#allocation19_spill] sm:$0xff] }
 0x29c   : > { %v3139_v19 = vpop.permute.xlu0 %3138  ;;  %4709 = vmatmul.mubr.msk.bf16.vlgmr.msra.gmra.mrb[32].mxu1 %vm530_vm1, %v4429_v13  ;;  %v4432_v13 = vpack.c.bf16 %v3639_v51, %v3625_v57  ;;  %v3215_v20 = vsel %vm1287_vm7, %v3171_v46, %v3141_v22  ;;  %v3642_v57 = vmax.f32 %v3628_v53, %v3615_v38  ;;  %v3643_v33 = vmax.f32 %v3629_v23, %v3616_v50  ;;  %v7448_v22 = vld [vmem:[#allocation59_spill] sm:$0xff]  ;;  %v7455_v23 = vld [vmem:[#allocation66_spill] sm:$0xff] }
 0x29d   : > { %v3213_v40 = vsel %vm1287_vm7, %v3168_v4, %v3139_v19  ;;  %4712 = vmatprep.mubr.msk.bf16.mxu1 %vm530_vm1, %v4430_v34  ;;  %v3630_v29 = vmax.f32 %v3615_v38, %v3616_v50  ;;  %v4433_v41 = vpack.c.bf16 %v3641_v31, %v3640_v52  ;;  %v3631_v25 = vmax.f32 %v3616_v50, %v3617_v59 }
 0x29e   : > { %v4348_v5 = vcombine.low %v3211_v8, %v3213_v40  ;;  %4683 = vmatmul.mubr.msk.bf16.gmra.mrb[44].mxu0 %vm1502_vm8, %v4334_v60  ;;  %v4434_v24 = vpack.c.bf16 %v3643_v33, %v3642_v57  ;;  %v3177_v28 = vsel %vm530_vm1, %v7449_v21, %v3113_v44 }
 0x29f   : > { %v3117_v32 = vpop.permute.xlu1 %3116  ;;  %v3644_v11 = vmax.f32 %v3630_v29, %v3617_v59  ;;  %v3645_v18 = vmax.f32 %v3631_v25, %v3617_v59  ;;  %v7458_v59 = vld [vmem:[#allocation69_spill] sm:$0xff] }
 0x2a0   : > { %v3143_v45 = vpop.permute.xlu0 %3142  ;;  %4690 = vmatprep.mubr.msk.bf16.mxu0 %vm1502_vm8, %v4348_v5  ;;  %v3183_v43 = vsel %vm530_vm1, %v7451_v7, %v3117_v32  ;;  %v7453_v32 = vld [vmem:[#allocation63_spill] sm:$0xff] }
 0x2a1   : > { %v3217_v37 = vsel %vm1287_vm7, %v3174_v36, %v3143_v45  ;;  %v4435_v47 = vpack.c.bf16 %v3645_v18, %v3644_v11 }
 0x2a2   : > { %v4349_v15 = vcombine.low %v3215_v20, %v3217_v37 }
 0x2a3   : > { %v3145_v30 = vpop.permute.xlu1 %3144 }
 0x2a4   : > { %v3115_v0 = vpop.permute.xlu0 %3114  ;;  %4713 = vmatmul.mubr.msk.bf16.gmra.mrb[36].mxu1 %vm530_vm1, %v4431_v61  ;;  %v3219_v39 = vsel %vm1287_vm7, %v3177_v28, %v3145_v30 }
 0x2a5   : > { %4716 = vmatprep.mubr.msk.bf16.mxu1 %vm530_vm1, %v4432_v13  ;;  %v3180_v34 = vsel %vm530_vm1, %v7450_v16, %v3115_v0  ;;  %v7454_v13 = vld [vmem:[#allocation65_spill] sm:$0xff]  ;;  %v7457_v0 = vld [vmem:[#allocation55_spill] sm:$0xff] }
 0x2a6   : > { %4691 = vmatmul.mubr.msk.bf16.vlgmr.msra.gmra.mrb[32].mxu0 %vm1502_vm8, %v4349_v15 }
 0x2a7   : > { %v3149_v62 = vpop.permute.xlu1 %3148 }
 0x2a8   : > { %v3119_v42 = vpop.permute.xlu0 %3118  ;;  %v3223_v44 = vsel %vm1287_vm7, %v3183_v43, %v3149_v62 }
 0x2a9   : > { %v3186_v27 = vsel %vm530_vm1, %v7448_v22, %v3119_v42 }
 0x2aa   : > { %v3224_v14 = vsel %vm1287_vm7, %v3186_v27, %v6081_v48 }
 0x2ab   : > { %v3123_v10 = vpop.permute.xlu1 %3122  ;;  %v4351_v3 = vcombine.low %v3223_v44, %v3224_v14 }
 0x2ac   : > { %v3147_v58 = vpop.permute.xlu0 %3146  ;;  %4717 = vmatmul.mubr.msk.bf16.gmra.mrb[40].mxu1 %vm530_vm1, %v4433_v41  ;;  %v3191_v8 = vsel %vm530_vm1, %v7452_v17, %v3123_v10  ;;  %v4303_v41 = vld [vmem:[%s7138_s8] ss:$0 sm:$0xff] }
 0x2ad   : > { %v3221_v49 = vsel %vm1287_vm7, %v3180_v34, %v3147_v58  ;;  %4720 = vmatprep.mubr.msk.bf16.mxu1 %vm530_vm1, %v4434_v24 }
 0x2ae   : > { %v4350_v51 = vcombine.low %v3219_v39, %v3221_v49 }
 0x2af   : > { %v3127_v56 = vpop.permute.xlu1 %3126 }
 0x2b0   : > { %v3121_v60 = vpop.permute.xlu0 %3120  ;;  %4694 = vmatprep.mubr.msk.bf16.mxu0 %vm1502_vm8, %v4350_v51  ;;  %v3197_v61 = vsel %vm530_vm1, %v7453_v32, %v3127_v56 }
 0x2b1   : > { %4695 = vmatmul.mubr.msk.bf16.gmra.mrb[36].mxu0 %vm1502_vm8, %v4351_v3  ;;  %v3188_v40 = vsel %vm530_vm1, 0, %v3121_v60 }
 0x2b3   : > { %v3153_v12 = vpop.permute.xlu1 %3152 }
 0x2b4   : > { %v3125_v4 = vpop.permute.xlu0 %3124  ;;  %4721 = vmatmul.mubr.msk.bf16.gmra.mrb[44].mxu1 %vm530_vm1, %v4435_v47  ;;  %v3228_v2 = vsel %vm1287_vm7, %v3191_v8, %v3153_v12 }
 0x2b5   : > { %v3194_v6 = vsel %vm530_vm1, %v7454_v13, %v3125_v4 }
 0x2b7   : > { %v3157_v19 = vpop.permute.xlu1 %3156 }
 0x2b8   : > { %v3151_v38 = vpop.permute.xlu0 %3150  ;;  %v3232_v36 = vsel %vm1287_vm7, %v3197_v61, %v3157_v19 }
 0x2b9   : > { %v3226_v5 = vsel %vm1287_vm7, %v3188_v40, %v3151_v38 }
 0x2ba   : > { %v4352_v55 = vcombine.low %v3226_v5, %v3228_v2 }
 0x2bb   : > { %v3131_v35 = vpop.permute.xlu1 %3130 }
 0x2bc   : > { %v3155_v63 = vpop.permute.xlu0 %3154  ;;  %4698 = vmatprep.mubr.msk.bf16.mxu0 %vm1502_vm8, %v4352_v55  ;;  %v3203_v1 = vsel %vm530_vm1, %v7455_v23, %v3131_v35 }
 0x2bd   : > { %v3230_v45 = vsel %vm1287_vm7, %v3194_v6, %v3155_v63 }
 0x2be   : > { %v4353_v54 = vcombine.low %v3230_v45, %v3232_v36 }
 0x2bf   : > { %v3135_v53 = vpop.permute.xlu1 %3134 }
 0x2c0   : > { %v3129_v9 = vpop.permute.xlu0 %3128  ;;  %4699 = vmatmul.mubr.msk.bf16.gmra.mrb[40].mxu0 %vm1502_vm8, %v4353_v54  ;;  %v3209_v52 = vsel %vm530_vm1, %v7457_v0, %v3135_v53 }
 0x2c1   : > { %v3200_v46 = vsel %vm530_vm1, %v7456_v26, %v3129_v9  ;;  %v3239_v29 = vsel %vm1287_vm7, %v3209_v52, %v6081_v48 }
 0x2c3   : > { %v3161_v50 = vpop.permute.xlu1 %3160 }
 0x2c4   : > { %v3133_v37 = vpop.permute.xlu0 %3132  ;;  %v3236_v30 = vsel %vm1287_vm7, %v3203_v1, %v3161_v50 }
 0x2c5   : > { %v3206_v57 = vsel %vm530_vm1, %v7458_v59, %v3133_v37 }
 0x2c8   : > { %v3159_v20 = vpop.permute.xlu0 %3158 }
 0x2c9   : > { %v3234_v15 = vsel %vm1287_vm7, %v3200_v46, %v3159_v20 }
 0x2ca   : > { %v4354_v31 = vcombine.low %v3234_v15, %v3236_v30  ;;  %v6897_v30 = vld [vmem:[%s7140_s10] ss:$0 sm:$0xff] }
 0x2cb   : > { %v6902_v15 = vld [vmem:[%s7142_s12] ss:$0 sm:$0xff] }
 0x2cc   : > { %v3163_v33 = vpop.permute.xlu0 %3162  ;;  %4702 = vmatprep.mubr.msk.bf16.mxu0 %vm1502_vm8, %v4354_v31 }
 0x2cd   : > { %v3238_v62 = vsel %vm1287_vm7, %v3206_v57, %v3163_v33 }
 0x2ce   : > { %v4355_v42 = vcombine.low %v3238_v62, %v3239_v29 }
 0x2d0   : > { %4703 = vmatmul.mubr.msk.bf16.gmra.mrb[44].mxu0 %vm1502_vm8, %v4355_v42 }
 0x2fd   : > { %v4632_v25 = vpop.f32.mrb[16].mxu1 }
 0x2fe   : > { %v2221_v22 = vadd.f32 %v4632_v25, %v4303_v41  ;;  %v2133_v27 = vpop.f32.mrb[17].mxu1 }
 0x2ff   : > { %v4633_v24 = vpop.f32.mrb[18].mxu1  ;;  %v2219_v11 = vadd.f32 %v4303_v41, %v2133_v27 }
 0x300   : > { %v2237_v10 = vmax.f32 %v2221_v22, 0.0  ;;  %v2222_v21 = vadd.f32 %v4633_v24, %v4303_v41  ;;  %v2136_v28 = vpop.f32.mrb[19].mxu1 }
 0x301   : > { %v2220_v34 = vadd.f32 %v4303_v41, %v2136_v28  ;;  %v2235_v48 = vmax.f32 %v2219_v11, 0.0 }
 0x302   : > { %v2238_v16 = vmax.f32 %v2222_v21, 0.0  ;;  %3870 = vrot.lane.b32.xlu1 %v2237_v10, %s4853_s21 }
 0x303   : > { %v2236_v58 = vmax.f32 %v2220_v34, 0.0 }
 0x304   : > { %3872 = vrot.lane.b32.xlu0 %v2238_v16, %s4853_s21 }
 0x305   : > { %v4636_v14 = vpop.f32.mrb[20].mxu1 }
 0x306   : > { %v2225_v18 = vadd.f32 %v4636_v14, %v4303_v41  ;;  %v2149_v7 = vpop.f32.mrb[21].mxu1  ;;  %3866 = vrot.lane.b32.xlu1 %v2235_v48, %s4853_s21 }
 0x307   : > { %v4637_v43 = vpop.f32.mrb[22].mxu1  ;;  %v2223_v49 = vadd.f32 %v4303_v41, %v2149_v7 }
 0x308   : > { %v2241_v39 = vmax.f32 %v2225_v18, 0.0  ;;  %v2226_v44 = vadd.f32 %v4637_v43, %v4303_v41  ;;  %3868 = vrot.lane.b32.xlu0 %v2236_v58, %s4853_s21  ;;  %v2152_v51 = vpop.f32.mrb[23].mxu1 }
 0x309   : > { %v2224_v56 = vadd.f32 %v4303_v41, %v2152_v51  ;;  %v2239_v60 = vmax.f32 %v2223_v49, 0.0 }
 0x30a   : > { %v2242_v3 = vmax.f32 %v2226_v44, 0.0  ;;  %3878 = vrot.lane.b32.xlu1 %v2241_v39, %s4853_s21 }
 0x30b   : > { %v2240_v12 = vmax.f32 %v2224_v56, 0.0 }
 0x30c   : > { %3880 = vrot.lane.b32.xlu0 %v2242_v3, %s4853_s21 }
 0x30d   : > { %v4640_v47 = vpop.f32.mrb[24].mxu1 }
 0x30e   : > { %v2229_v4 = vadd.f32 %v4640_v47, %v4303_v41  ;;  %v2165_v19 = vpop.f32.mrb[25].mxu1  ;;  %3874 = vrot.lane.b32.xlu1 %v2239_v60, %s4853_s21 }
 0x30f   : > { %v4641_v17 = vpop.f32.mrb[26].mxu1  ;;  %v2227_v40 = vadd.f32 %v4303_v41, %v2165_v19 }
 0x310   : > { %v2245_v8 = vmax.f32 %v2229_v4, 0.0  ;;  %v2230_v38 = vadd.f32 %v4641_v17, %v4303_v41  ;;  %3876 = vrot.lane.b32.xlu0 %v2240_v12, %s4853_s21  ;;  %v2168_v2 = vpop.f32.mrb[27].mxu1 }
 0x311   : > { %v2228_v55 = vadd.f32 %v4303_v41, %v2168_v2  ;;  %v2243_v35 = vmax.f32 %v2227_v40, 0.0 }
 0x312   : > { %v2246_v5 = vmax.f32 %v2230_v38, 0.0  ;;  %3886 = vrot.lane.b32.xlu1 %v2245_v8, %s4853_s21 }
 0x313   : > { %v2244_v32 = vmax.f32 %v2228_v55, 0.0 }
 0x314   : > { %3888 = vrot.lane.b32.xlu0 %v2246_v5, %s4853_s21 }
 0x316   : > { %3882 = vrot.lane.b32.xlu1 %v2243_v35, %s4853_s21 }
 0x318   : > { %3884 = vrot.lane.b32.xlu0 %v2244_v32, %s4853_s21 }
 0x367   : > { %v4644_v61 = vpop.f32.mrb[28].mxu1 }
 0x368   : > { %v2233_v13 = vadd.f32 %v4644_v61, %v4303_v41  ;;  %v2181_v6 = vpop.f32.mrb[29].mxu1 }
 0x369   : > { %v4645_v63 = vpop.f32.mrb[30].mxu1  ;;  %v2231_v45 = vadd.f32 %v4303_v41, %v2181_v6 }
 0x36a   : > { %v2249_v36 = vmax.f32 %v2233_v13, 0.0  ;;  %v2234_v54 = vadd.f32 %v4645_v63, %v4303_v41  ;;  %v2184_v53 = vpop.f32.mrb[31].mxu1 }
 0x36b   : > { %v2232_v37 = vadd.f32 %v4303_v41, %v2184_v53  ;;  %v2247_v50 = vmax.f32 %v2231_v45, 0.0 }
 0x36c   : > { %v2250_v9 = vmax.f32 %v2234_v54, 0.0  ;;  %3894 = vrot.lane.b32.xlu1 %v2249_v36, %s4853_s21 }
 0x36d   : > { %v2248_v1 = vmax.f32 %v2232_v37, 0.0 }
 0x36e   : > { %3896 = vrot.lane.b32.xlu0 %v2250_v9, %s4853_s21 }
 0x36f   : > { %v4710_v23 = vpop.f32.mrb[32].mxu1 }
 0x370   : > { %3890 = vrot.lane.b32.xlu1 %v2247_v50, %s4853_s21  ;;  %v3771_v26 = vpop.f32.mrb[33].mxu1  ;;  %v3780_v62 = vadd.f32 %v4710_v23, %v6902_v15 }
 0x371   : > { %v4711_v46 = vpop.f32.mrb[34].mxu1  ;;  %v3772_v18 = vadd.f32 %v6902_v15, %v3771_v26 }
 0x372   : > { %3892 = vrot.lane.b32.xlu0 %v2248_v1, %s4853_s21  ;;  %v3774_v20 = vpop.f32.mrb[35].mxu1  ;;  %v3836_v27 = vmax.f32 %v3780_v62, 0.0  ;;  %v3783_v10 = vadd.f32 %v4711_v46, %v6902_v15  ;;  %s4855_s21 = smov 32  }
 0x373   : > { %v3775_v49 = vadd.f32 %v6902_v15, %v3774_v20  ;;  %v3834_v56 = vmax.f32 %v3772_v18, 0.0 }
 0x374   : > { %v3837_v34 = vmax.f32 %v3783_v10, 0.0 }
 0x375   : > { %v3835_v4 = vmax.f32 %v3775_v49, 0.0 }
 0x377   : > { %v4714_v0 = vpop.f32.mrb[36].mxu1 }
 0x378   : > { %v3787_v52 = vpop.f32.mrb[37].mxu1  ;;  %v3796_v17 = vadd.f32 %v4714_v0, %v6902_v15 }
 0x379   : > { %v4692_v31 = vpop.f32.mrb[32].mxu0  ;;  %v4715_v59 = vpop.f32.mrb[38].mxu1  ;;  %v3788_v6 = vadd.f32 %v6902_v15, %v3787_v52 }
 0x37a   : > { %v3442_v57 = vadd.f32 %v4692_v31, %v6897_v30  ;;  %v3354_v33 = vpop.f32.mrb[33].mxu0  ;;  %v3790_v42 = vpop.f32.mrb[39].mxu1  ;;  %v3840_v2 = vmax.f32 %v3796_v17, 0.0  ;;  %v3799_v5 = vadd.f32 %v4715_v59, %v6902_v15 }
 0x37b   : > { %v4693_v29 = vpop.f32.mrb[34].mxu0  ;;  %v3440_v21 = vadd.f32 %v6897_v30, %v3354_v33  ;;  %v3791_v54 = vadd.f32 %v6902_v15, %v3790_v42  ;;  %v3838_v9 = vmax.f32 %v3788_v6, 0.0 }
 0x37c   : > { %v3458_v41 = vmax.f32 %v3442_v57, 0.0  ;;  %v3443_v25 = vadd.f32 %v4693_v29, %v6897_v30  ;;  %v3357_v22 = vpop.f32.mrb[35].mxu0  ;;  %v3841_v32 = vmax.f32 %v3799_v5, 0.0  ;;  %v7460_v5 = vld [vmem:[#allocation17_spill] sm:$0xff] }
 0x37d   : > { %v3441_v48 = vadd.f32 %v6897_v30, %v3357_v22  ;;  %v3456_v58 = vmax.f32 %v3440_v21, 0.0  ;;  %v3839_v50 = vmax.f32 %v3791_v54, 0.0  ;;  %v7461_v54 = vld [vmem:[#allocation2_spill] sm:$0xff] }
 0x37e   : > { %v3459_v24 = vmax.f32 %v3443_v25, 0.0  ;;  %3934 = vrot.lane.b32.xlu1 %v3458_v41, %s4855_s21 }
 0x37f   : > { %v4718_v11 = vpop.f32.mrb[40].mxu1  ;;  %v3457_v39 = vmax.f32 %v3441_v48, 0.0 }
 0x380   : > { %3936 = vrot.lane.b32.xlu0 %v3459_v24, %s4855_s21  ;;  %v6911_v28 = vpop.f32.mrb[41].mxu1  ;;  %v3812_v1 = vadd.f32 %v4718_v11, %v6902_v15 }
 0x381   : > { %v4719_v16 = vpop.f32.mrb[42].mxu1  ;;  %v3804_v62 = vadd.f32 %v6902_v15, %v6911_v28 }
 0x382   : > { %3998 = vrot.lane.b32.xlu1 %v3836_v27, %s4856_s23  ;;  %v6915_v14 = vpop.f32.mrb[43].mxu1  ;;  %v3844_v20 = vmax.f32 %v3812_v1, 0.0  ;;  %v3815_v0 = vadd.f32 %v4719_v16, %v6902_v15 }
 0x383   : > { %v3807_v25 = vadd.f32 %v6902_v15, %v6915_v14  ;;  %v3842_v27 = vmax.f32 %v3804_v62, 0.0 }
 0x384   : > { %4000 = vrot.lane.b32.xlu0 %v3837_v34, %s4856_s23  ;;  %v4696_v7 = vpop.f32.mrb[36].mxu0  ;;  %v3845_v59 = vmax.f32 %v3815_v0, 0.0 }
 0x385   : > { %v3370_v43 = vpop.f32.mrb[37].mxu0  ;;  %v3446_v60 = vadd.f32 %v4696_v7, %v6897_v30  ;;  %v3843_v10 = vmax.f32 %v3807_v25, 0.0 }
 0x386   : > { %3930 = vrot.lane.b32.xlu1 %v3456_v58, %s4855_s21  ;;  %v4697_v44 = vpop.f32.mrb[38].mxu0  ;;  %v3444_v55 = vadd.f32 %v6897_v30, %v3370_v43 }
 0x387   : > { %v3373_v51 = vpop.f32.mrb[39].mxu0  ;;  %v6921_v3 = vpop.f32.mrb[44].mxu1  ;;  %v3447_v19 = vadd.f32 %v4697_v44, %v6897_v30  ;;  %v3462_v40 = vmax.f32 %v3446_v60, 0.0 }
 0x388   : > { %3932 = vrot.lane.b32.xlu0 %v3457_v39, %s4855_s21  ;;  %v6925_v47 = vpop.f32.mrb[45].mxu1  ;;  %v3445_v35 = vadd.f32 %v6897_v30, %v3373_v51  ;;  %v3460_v13 = vmax.f32 %v3444_v55, 0.0  ;;  %v3828_v43 = vadd.f32 %v6921_v3, %v6902_v15  ;;  %v3871_v51 = vpop.permute.xlu1 %3870 }
 0x389   : > { %v6927_v12 = vpop.f32.mrb[46].mxu1  ;;  %v3463_v38 = vmax.f32 %v3447_v19, 0.0  ;;  %v3820_v48 = vadd.f32 %v6902_v15, %v6925_v47 }
 0x38a   : > { %3994 = vrot.lane.b32.xlu1 %v3834_v56, %s4856_s23  ;;  %v6932_v8 = vpop.f32.mrb[47].mxu1  ;;  %v3461_v45 = vmax.f32 %v3445_v35, 0.0  ;;  %v3848_v49 = vmax.f32 %v3828_v43, 0.0  ;;  %v3873_v56 = vpop.permute.xlu0 %3872 }
 0x38b   : > { %v3846_v18 = vmax.f32 %v3820_v48, 0.0  ;;  %v3823_v7 = vadd.f32 %v6902_v15, %v6932_v8  ;;  %v6999_v8 = vld [vmem:[%s7132_s2] ss:$0 sm:$0xff] }
 0x38c   : > { %3996 = vrot.lane.b32.xlu0 %v3835_v4, %s4856_s23  ;;  %v3867_v60 = vpop.permute.xlu1 %3866  ;;  %v653_v55 = vadd.f32 %v7460_v5, %v6999_v8 }
 0x38d   : > { %v3847_v39 = vmax.f32 %v3823_v7, 0.0  ;;  %v7466_v7 = vld [vmem:[#allocation8_spill] sm:$0xff] }
 0x38e   : > { %3942 = vrot.lane.b32.xlu1 %v3462_v40, %s4855_s21  ;;  %v3869_v3 = vpop.permute.xlu0 %3868  ;;  %v7459_v40 = vld [vmem:[#allocation15_spill] sm:$0xff]  ;;  %v621_v43 = vadd.f32 %v7466_v7, %v6999_v8 }
 0x390   : > { %3944 = vrot.lane.b32.xlu0 %v3463_v38, %s4855_s21  ;;  %v3879_v47 = vpop.permute.xlu1 %3878  ;;  %v650_v38 = vadd.f32 %v7459_v40, %v6999_v8  ;;  %v7467_v40 = vld [vmem:[#allocation7_spill] sm:$0xff] }
 0x392   : > { %4006 = vrot.lane.b32.xlu1 %v3840_v2, %s4856_s23  ;;  %v6986_v4 = vpop.permute.xlu0 %3880 }
 0x393   : > { %v4700_v61 = vpop.f32.mrb[40].mxu0 }
 0x394   : > { %4008 = vrot.lane.b32.xlu0 %v3841_v32, %s4856_s23  ;;  %v3386_v63 = vpop.f32.mrb[41].mxu0  ;;  %v3450_v37 = vadd.f32 %v4700_v61, %v6897_v30  ;;  %v6988_v19 = vpop.permute.xlu1 %3874  ;;  %v670_v32 = vmax.f32 %v650_v38, 0.0  ;;  %v610_v38 = vadd.f32 %v6999_v8, %v7467_v40 }
 0x395   : > { %v4701_v36 = vpop.f32.mrb[42].mxu0  ;;  %v3448_v52 = vadd.f32 %v6897_v30, %v3386_v63 }
 0x396   : > { %3938 = vrot.lane.b32.xlu1 %v3460_v13, %s4855_s21  ;;  %v3389_v53 = vpop.f32.mrb[43].mxu0  ;;  %v3451_v23 = vadd.f32 %v4701_v36, %v6897_v30  ;;  %v3466_v26 = vmax.f32 %v3450_v37, 0.0  ;;  %v671_v13 = vmax.f32 %v653_v55, 0.0  ;;  %v7462_v37 = vld [vmem:[#allocation4_spill] sm:$0xff] }
 0x397   : > { %v3449_v31 = vadd.f32 %v6897_v30, %v3389_v53  ;;  %v3464_v33 = vmax.f32 %v3448_v52, 0.0  ;;  %v602_v53 = vadd.f32 %v7461_v54, %v6999_v8 }
 0x398   : > { %3940 = vrot.lane.b32.xlu0 %v3461_v45, %s4855_s21  ;;  %v3467_v46 = vmax.f32 %v3451_v23, 0.0 }
 0x399   : > { %v3465_v41 = vmax.f32 %v3449_v31, 0.0  ;;  %v658_v1 = vmax.f32 %v602_v53, 0.0  ;;  %v7463_v31 = vld [vmem:[#allocation3_spill] sm:$0xff]  ;;  %v660_v53 = vmax.f32 %v610_v38, 0.0 }
 0x39a   : > { %4002 = vrot.lane.b32.xlu1 %v3838_v9, %s4856_s23 }
 0x39c   : > { %4004 = vrot.lane.b32.xlu0 %v3839_v50, %s4856_s23  ;;  %v605_v50 = vadd.f32 %v7462_v37, %v6999_v8 }
 0x39e   : > { %3950 = vrot.lane.b32.xlu1 %v3466_v26, %s4855_s21 }
 0x3a0   : > { %3952 = vrot.lane.b32.xlu0 %v3467_v46, %s4855_s21  ;;  %v659_v46 = vmax.f32 %v605_v50, 0.0 }
 0x3a2   : > { %4014 = vrot.lane.b32.xlu1 %v3844_v20, %s4856_s23  ;;  %v4044_v20 = vsel %vm1287_vm7, %v658_v1, %v3871_v51  ;;  %v663_v51 = vmax.f32 %v621_v43, 0.0 }
 0x3a3   : > { %v4704_v57 = vpop.f32.mrb[44].mxu0 }
 0x3a4   : > { %4016 = vrot.lane.b32.xlu0 %v3845_v59, %s4856_s23  ;;  %v3402_v29 = vpop.f32.mrb[45].mxu0  ;;  %v3454_v24 = vadd.f32 %v4704_v57, %v6897_v30  ;;  %v594_v59 = vadd.f32 %v6999_v8, %v7463_v31  ;;  %v4045_v57 = vsel %vm1287_vm7, %v659_v46, %v3873_v56  ;;  %v4049_v5 = vsel %vm1287_vm7, %v663_v51, %v6986_v4 }
 0x3a5   : > { %v4705_v42 = vpop.f32.mrb[46].mxu0  ;;  %v3452_v28 = vadd.f32 %v6897_v30, %v3402_v29  ;;  %v4046_v4 = vsel %vm1287_vm7, %v660_v53, %v6988_v19 }
 0x3a6   : > { %3946 = vrot.lane.b32.xlu1 %v3464_v33, %s4855_s21  ;;  %v3405_v22 = vpop.f32.mrb[47].mxu0  ;;  %v3455_v11 = vadd.f32 %v4705_v42, %v6897_v30  ;;  %v3470_v21 = vmax.f32 %v3454_v24, 0.0  ;;  %v7464_v42 = vld [vmem:[#allocation5_spill] sm:$0xff] }
 0x3a7   : > { %v3453_v34 = vadd.f32 %v6897_v30, %v3405_v22  ;;  %v3468_v14 = vmax.f32 %v3452_v28, 0.0  ;;  %v3831_v30 = vadd.f32 %v6927_v12, %v6902_v15  ;;  %v6990_v15 = vpop.permute.xlu0 %3876  ;;  %v6992_v12 = vpop.permute.xlu1 %3886 }
 0x3a8   : > { %3948 = vrot.lane.b32.xlu0 %v3465_v41, %s4855_s21  ;;  %v3471_v16 = vmax.f32 %v3455_v11, 0.0  ;;  %v597_v41 = vadd.f32 %v6999_v8, %v7464_v42 }
 0x3a9   : > { %v3469_v58 = vmax.f32 %v3453_v34, 0.0  ;;  %v3849_v44 = vmax.f32 %v3831_v30, 0.0 }
 0x3aa   : > { %4010 = vrot.lane.b32.xlu1 %v3842_v27, %s4856_s23  ;;  %v656_v27 = vmax.f32 %v594_v59, 0.0  ;;  %v7470_v59 = vld [vmem:[#allocation12_spill] sm:$0xff] }
 0x3ab   : > { %v6994_v17 = vpop.permute.xlu0 %3888  ;;  %v7003_v2 = vpop.permute.xlu1 %3882 }
 0x3ac   : > { %4012 = vrot.lane.b32.xlu0 %v3843_v10, %s4856_s23  ;;  %v657_v10 = vmax.f32 %v597_v41, 0.0  ;;  %v4042_v11 = vsel %vm1287_vm7, %v656_v27, %v3867_v60 }
 0x3ae   : > { %3958 = vrot.lane.b32.xlu1 %v3470_v21, %s4855_s21  ;;  %v4043_v48 = vsel %vm1287_vm7, %v657_v10, %v3869_v3 }
 0x3af   : > { %v7007_v35 = vpop.permute.xlu0 %3884 }
 0x3b0   : > { %3960 = vrot.lane.b32.xlu0 %v3471_v16, %s4855_s21  ;;  %v7465_v16 = vld [vmem:[#allocation6_spill] sm:$0xff] }
 0x3b1   : > { %v618_v34 = vadd.f32 %v7465_v16, %v6999_v8 }
 0x3b2   : > { %3954 = vrot.lane.b32.xlu1 %v3468_v14, %s4855_s21 }
 0x3b4   : > { %3956 = vrot.lane.b32.xlu0 %v3469_v58, %s4855_s21 }
 0x3b6   : > { %4018 = vrot.lane.b32.xlu1 %v3846_v18, %s4856_s23 }
 0x3b8   : > { %4020 = vrot.lane.b32.xlu0 %v3847_v39, %s4856_s23 }
 0x3ba   : > { %4022 = vrot.lane.b32.xlu1 %v3848_v49, %s4856_s23  ;;  %v662_v49 = vmax.f32 %v618_v34, 0.0 }
 0x3bc   : > { %4024 = vrot.lane.b32.xlu0 %v3849_v44, %s4856_s23  ;;  %v4048_v56 = vsel %vm1287_vm7, %v662_v49, %v3879_v47 }
 0x3de   : > { %v3895_v61 = vpop.permute.xlu1 %3894 }
 0x3df   : > { %v7010_v6 = vsel %vm1287_vm7, %v670_v32, %v3895_v61 }
 0x3e0   : > { %v3897_v63 = vpop.permute.xlu0 %3896 }
 0x3e1   : > { %v7013_v36 = vsel %vm1287_vm7, %v671_v13, %v3897_v63  ;;  %v7468_v13 = vld [vmem:[#allocation9_spill] sm:$0xff] }
 0x3e2   : > { %v7015_v45 = vpop.permute.xlu1 %3890  ;;  %v613_v63 = vadd.f32 %v6999_v8, %v7468_v13 }
 0x3e4   : > { %v7019_v9 = vpop.permute.xlu0 %3892  ;;  %v661_v50 = vmax.f32 %v613_v63, 0.0 }
 0x3f0   : > { %v3935_v23 = vpop.permute.xlu1 %3934 }
 0x3f1   : > { %v4061_v0 = vsel %vm4058_vm10, %v4044_v20, %v3935_v23  ;;  %v4047_v20 = vsel %vm1287_vm7, %v661_v50, %v6990_v15 }
 0x3f2   : > { %v3937_v26 = vpop.permute.xlu0 %3936 }
 0x3f3   : > { %v4062_v62 = vsel %vm4058_vm10, %v4045_v57, %v3937_v26  ;;  %v7469_v26 = vld [vmem:[#allocation10_spill] sm:$0xff]  ;;  %v637_v57 = vadd.f32 %v7470_v59, %v6999_v8 }
 0x3f4   : > { %v3999_v52 = vpop.permute.xlu1 %3998  ;;  %v634_v46 = vadd.f32 %v7469_v26, %v6999_v8 }
 0x3f5   : > { %v4078_v33 = vsel %vm4075_vm11, %v4061_v0, %v3999_v52  ;;  %v667_v42 = vmax.f32 %v637_v57, 0.0 }
 0x3f6   : > { %4094 = vst [vmem:[%s7029_s24 + $0x10] sm:$0xff] %v4078_v33  ;;  %v4001_v29 = vpop.permute.xlu0 %4000 }
 0x3f7   : > { %v4079_v25 = vsel %vm4075_vm11, %v4062_v62, %v4001_v29  ;;  %v666_v62 = vmax.f32 %v634_v46, 0.0 }
 0x3f8   : > { %4095 = vst [vmem:[%s7029_s24 + $0x18] sm:$0xff] %v4079_v25  ;;  %v3931_v22 = vpop.permute.xlu1 %3930 }
 0x3f9   : > { %v4059_v21 = vsel %vm4058_vm10, %v4042_v11, %v3931_v22  ;;  %v4052_v15 = vsel %vm1287_vm7, %v666_v62, %v6992_v12  ;;  %v7471_v22 = vld [vmem:[#allocation11_spill] sm:$0xff] }
 0x3fa   : > { %v3933_v24 = vpop.permute.xlu0 %3932  ;;  %v626_v27 = vadd.f32 %v6999_v8, %v7471_v22 }
 0x3fb   : > { %v4060_v58 = vsel %vm4058_vm10, %v4043_v48, %v3933_v24  ;;  %v4053_v24 = vsel %vm1287_vm7, %v667_v42, %v6994_v17 }
 0x3fc   : > { %v3995_v28 = vpop.permute.xlu1 %3994  ;;  %v664_v48 = vmax.f32 %v626_v27, 0.0 }
 0x3fd   : > { %v4076_v14 = vsel %vm4075_vm11, %v4059_v21, %v3995_v28  ;;  %v7472_v28 = vld [vmem:[#allocation13_spill] sm:$0xff] }
 0x3fe   : > { %4092 = vst [vmem:[%s7029_s24] sm:$0xff] %v4076_v14  ;;  %v3997_v18 = vpop.permute.xlu0 %3996  ;;  %v629_v16 = vadd.f32 %v6999_v8, %v7472_v28  ;;  %v4050_v17 = vsel %vm1287_vm7, %v664_v48, %v7003_v2 }
 0x3ff   : > { %v4077_v30 = vsel %vm4075_vm11, %v4060_v58, %v3997_v18 }
 0x400   : > { %4093 = vst [vmem:[%s7029_s24 + $0x8] sm:$0xff] %v4077_v30  ;;  %v3943_v39 = vpop.permute.xlu1 %3942  ;;  %v665_v58 = vmax.f32 %v629_v16, 0.0 }
 0x401   : > { %v4065_v60 = vsel %vm4058_vm10, %v4048_v56, %v3943_v39  ;;  %v7473_v56 = vld [vmem:[#allocation16_spill] sm:$0xff] }
 0x402   : > { %v3945_v44 = vpop.permute.xlu0 %3944  ;;  %v4051_v43 = vsel %vm1287_vm7, %v665_v58, %v7007_v35  ;;  %v642_v2 = vadd.f32 %v6999_v8, %v7473_v56 }
 0x403   : > { %v4066_v32 = vsel %vm4058_vm10, %v4049_v5, %v3945_v44 }
 0x404   : > { %v4007_v3 = vpop.permute.xlu1 %4006  ;;  %v668_v38 = vmax.f32 %v642_v2, 0.0 }
 0x405   : > { %v4082_v55 = vsel %vm4075_vm11, %v4065_v60, %v4007_v3  ;;  %v7474_v3 = vld [vmem:[#allocation18_spill] sm:$0xff] }
 0x406   : > { %4098 = vst [vmem:[%s7029_s24 + $0x30] sm:$0xff] %v4082_v55  ;;  %v4009_v61 = vpop.permute.xlu0 %4008  ;;  %v645_v40 = vadd.f32 %v6999_v8, %v7474_v3 }
 0x407   : > { %v4083_v47 = vsel %vm4075_vm11, %v4066_v32, %v4009_v61  ;;  %v4054_v32 = vsel %vm1287_vm7, %v668_v38, %v7015_v45 }
 0x408   : > { %4099 = vst [vmem:[%s7029_s24 + $0x38] sm:$0xff] %v4083_v47  ;;  %v3939_v54 = vpop.permute.xlu1 %3938  ;;  %v669_v55 = vmax.f32 %v645_v40, 0.0 }
 0x409   : > { %v4063_v23 = vsel %vm4058_vm10, %v4046_v4, %v3939_v54 }
 0x40a   : > { %v3941_v37 = vpop.permute.xlu0 %3940  ;;  %v4055_v63 = vsel %vm1287_vm7, %v669_v55, %v7019_v9 }
 0x40b   : > { %v4064_v52 = vsel %vm4058_vm10, %v4047_v20, %v3941_v37 }
 0x40c   : > { %v4003_v1 = vpop.permute.xlu1 %4002 }
 0x40d   : > { %v4080_v0 = vsel %vm4075_vm11, %v4063_v23, %v4003_v1 }
 0x40e   : > { %4096 = vst [vmem:[%s7029_s24 + $0x20] sm:$0xff] %v4080_v0  ;;  %v4005_v31 = vpop.permute.xlu0 %4004 }
 0x40f   : > { %v4081_v19 = vsel %vm4075_vm11, %v4064_v52, %v4005_v31 }
 0x410   : > { %4097 = vst [vmem:[%s7029_s24 + $0x28] sm:$0xff] %v4081_v19  ;;  %v3951_v33 = vpop.permute.xlu1 %3950 }
 0x411   : > { %v4069_v41 = vsel %vm4058_vm10, %v4052_v15, %v3951_v33 }
 0x412   : > { %v3953_v29 = vpop.permute.xlu0 %3952 }
 0x413   : > { %v4070_v11 = vsel %vm4058_vm10, %v4053_v24, %v3953_v29 }
 0x414   : > { %v4015_v25 = vpop.permute.xlu1 %4014 }
 0x415   : > { %v4086_v10 = vsel %vm4075_vm11, %v4069_v41, %v4015_v25 }
 0x416   : > { %4102 = vst [vmem:[%s7029_s24 + $0x50] sm:$0xff] %v4086_v10  ;;  %v4017_v21 = vpop.permute.xlu0 %4016 }
 0x417   : > { %v4087_v12 = vsel %vm4075_vm11, %v4070_v11, %v4017_v21 }
 0x418   : > { %4103 = vst [vmem:[%s7029_s24 + $0x58] sm:$0xff] %v4087_v12  ;;  %v3947_v34 = vpop.permute.xlu1 %3946 }
 0x419   : > { %v4067_v18 = vsel %vm4058_vm10, %v4050_v17, %v3947_v34 }
 0x41a   : > { %v3949_v14 = vpop.permute.xlu0 %3948 }
 0x41b   : > { %v4068_v39 = vsel %vm4058_vm10, %v4051_v43, %v3949_v14 }
 0x41c   : > { %v4011_v7 = vpop.permute.xlu1 %4010 }
 0x41d   : > { %v4084_v30 = vsel %vm4075_vm11, %v4067_v18, %v4011_v7 }
 0x41e   : > { %4100 = vst [vmem:[%s7029_s24 + $0x40] sm:$0xff] %v4084_v30  ;;  %v4013_v49 = vpop.permute.xlu0 %4012 }
 0x41f   : > { %v4085_v44 = vsel %vm4075_vm11, %v4068_v39, %v4013_v49 }
 0x420   : > { %4101 = vst [vmem:[%s7029_s24 + $0x48] sm:$0xff] %v4085_v44  ;;  %v3959_v51 = vpop.permute.xlu1 %3958 }
 0x421   : > { %v4073_v37 = vsel %vm4058_vm10, %v7010_v6, %v3959_v51 }
 0x422   : > { %v3961_v60 = vpop.permute.xlu0 %3960 }
 0x423   : > { %v4074_v4 = vsel %vm4058_vm10, %v7013_v36, %v3961_v60 }
 0x424   : > { %v3955_v35 = vpop.permute.xlu1 %3954 }
 0x425   : > { %v4071_v61 = vsel %vm4058_vm10, %v4054_v32, %v3955_v35 }
 0x426   : > { %v3957_v5 = vpop.permute.xlu0 %3956 }
 0x427   : > { %v4072_v54 = vsel %vm4058_vm10, %v4055_v63, %v3957_v5 }
 0x428   : > { %v4019_v13 = vpop.permute.xlu1 %4018 }
 0x429   : > { %v4088_v47 = vsel %vm4075_vm11, %v4071_v61, %v4019_v13 }
 0x42a   : > { %4104 = vst [vmem:[%s7029_s24 + $0x60] sm:$0xff] %v4088_v47  ;;  %v4021_v8 = vpop.permute.xlu0 %4020 }
 0x42b   : > { %v4089_v53 = vsel %vm4075_vm11, %v4072_v54, %v4021_v8 }
 0x42c   : > { %4105 = vst [vmem:[%s7029_s24 + $0x68] sm:$0xff] %v4089_v53  ;;  %v4023_v45 = vpop.permute.xlu1 %4022 }
 0x42d   : > { %v4090_v50 = vsel %vm4075_vm11, %v4073_v37, %v4023_v45 }
 0x42e   : > { %4106 = vst [vmem:[%s7029_s24 + $0x70] sm:$0xff] %v4090_v50  ;;  %v4025_v9 = vpop.permute.xlu0 %4024 }
 0x42f   : > { %v4091_v23 = vsel %vm4075_vm11, %v4074_v4, %v4025_v9 }
 0x430   : > { %4107 = vst [vmem:[%s7029_s24 + $0x78] sm:$0xff] %v4091_v23 }
 0x431 PF: > { %s23_s25 = sadd.s32 1, %s4850_s25  }
 0x432   : > { %p20_p4 = scmp.ge.s32.totalorder %s23_s25, 4  }
 0x434   :  { %22 = sbr.rel (!%p20_p4) target bundleno = 1 (0x1), region = 106 }

</bundles_post_ra>
